<compile_context>
chip_gen: v7x
topology: tpu7x:2x2x1
jax: 0.10.0
libtpu: 0.0.40
codegen_flags: <defaults>
</compile_context>

<pallas_src>
import jax
import jax.numpy as jnp
from jax.experimental import pallas as pl
from jax.experimental.pallas import tpu as pltpu


def _round_up(v, mult):
    return ((v + mult - 1) // mult) * mult


def _adnm_kernel(xT_ref, w_ref, q_ref, a_ref, dk_ref, dq_ref, o_ref):
    # xT_ref: [I, b_t]        activations, batch on the lane axis
    # w_ref : [M, o_t, I]     synaptic weights (M-major layout)
    # q_ref : [M, o_t, I]     synaptic thresholds
    # a_ref : [o_t, I]        tanh(m), precomputed in the wrapper
    # dk_ref: [M, o_t, 1]
    # dq_ref: [M, o_t, 1]
    # o_ref : [o_t, b_t]      output block (transposed: batch on the lane axis)
    xT = xT_ref[...]
    w = w_ref[...]
    q = q_ref[...]
    a = a_ref[...]

    # Synaptic layer: one sigmoid per (m, o, i, b) element -- the EUP-bound part.
    # Batch (b_t) sits on lanes so the EUP/VPU run lane-dense even for small I.
    # TODO(synk): optional approximate sigmoid (pl.reciprocal(approx=True)) for
    # more EUP throughput; kept exact f32 to match the PyTorch reference.
    z = w[:, :, :, None] * xT[None, None, :, :] - q[:, :, :, None]   # [M,o_t,I,b_t]
    s = jax.nn.sigmoid(z)

    # Dendritic branch activation: weight by tanh(m), reduce over input
    # (sublane axis -> mostly plain vreg adds).
    d = jnp.sum(s * a[None, :, :, None], axis=2)                     # [M,o_t,b_t]
    d = dk_ref[...] * d - dq_ref[...]                                 # [M,o_t,b_t]

    # Soma: reduce sigmoid over the M branches (leading axis -> plain adds).
    o_ref[...] = jnp.sum(jax.nn.sigmoid(d), axis=0)                   # [o_t,b_t]


def adnm_forward(x, w, q, m, d_k, d_q, *, b_tile=256,
                 slab_bytes=2 * 1024 * 1024):
    """ADNM forward pass.  x: [..., input_size] -> [..., out_size]."""
    x = jnp.asarray(x, jnp.float32)
    w = jnp.asarray(w, jnp.float32)
    q = jnp.asarray(q, jnp.float32)
    m = jnp.asarray(m, jnp.float32)
    d_k = jnp.asarray(d_k, jnp.float32)
    d_q = jnp.asarray(d_q, jnp.float32)

    lead = x.shape[:-1]
    I = x.shape[-1]
    O, M, _ = w.shape
    x2 = x.reshape(-1, I)
    B = x2.shape[0]

    # ---- Tile selection ----------------------------------------------------
    # Batch tile: whole batch if small, otherwise fixed lane-dense 256-col tiles.
    if B <= b_tile:
        b_t, B_pad = B, B
    else:
        b_t = b_tile
        B_pad = _round_up(B, b_t)

    # Output tile: bound the live [M, o_t, I, b_t] slab to ~slab_bytes so the
    # full [B, O, M, I] intermediate is never materialized.
    cap_o = max(1, slab_bytes // (4 * M * max(1, b_t) * I))
    if cap_o >= O:
        o_t, O_pad = O, O
    else:
        o_t = max(8, (cap_o // 8) * 8)      # sublane-aligned O tile
        O_pad = _round_up(O, o_t)

    # ---- Parameter repacking (wrapper-side, once per call) -----------------
    a2 = jnp.tanh(m[:, 0, :])                        # [O, I] (precomputed tanh)
    w_t = jnp.transpose(w, (1, 0, 2))                # [M, O, I]
    q_t = jnp.transpose(q, (1, 0, 2))                # [M, O, I]
    dk_t = jnp.transpose(d_k, (1, 0))[:, :, None]    # [M, O, 1]
    dq_t = jnp.transpose(d_q, (1, 0))[:, :, None]    # [M, O, 1]
    xT = x2.T                                        # [I, B] (batch -> lanes)

    def pad_axis(arr, axis, new):
        if arr.shape[axis] == new:
            return arr
        pads = [(0, 0)] * arr.ndim
        pads[axis] = (0, new - arr.shape[axis])
        return jnp.pad(arr, pads)

    x_p = pad_axis(xT, 1, B_pad)
    w_p = pad_axis(w_t, 1, O_pad)
    q_p = pad_axis(q_t, 1, O_pad)
    a_p = pad_axis(a2, 0, O_pad)
    dk_p = pad_axis(dk_t, 1, O_pad)
    dq_p = pad_axis(dq_t, 1, O_pad)

    # O outermost / batch innermost: parameter block indices are constant
    # across consecutive batch tiles, so the (dominant) w/q streams are fetched
    # once per O-tile instead of once per grid step.
    grid = (O_pad // o_t, B_pad // b_t)

    cost = pl.CostEstimate(
        flops=4 * B * O * M * I + 3 * B * O * M,
        transcendentals=B * O * M * (I + 1),
        bytes_accessed=4 * (B * I + 2 * O * M * I + O * I + 2 * O * M + B * O),
    )

    out_t = pl.pallas_call(
        _adnm_kernel,
        out_shape=jax.ShapeDtypeStruct((O_pad, B_pad), jnp.float32),
        grid=grid,
        in_specs=[
            pl.BlockSpec((I, b_t), lambda o, b: (0, b)),        # x^T
            pl.BlockSpec((M, o_t, I), lambda o, b: (0, o, 0)),  # w
            pl.BlockSpec((M, o_t, I), lambda o, b: (0, o, 0)),  # q
            pl.BlockSpec((o_t, I), lambda o, b: (o, 0)),        # tanh(m)
            pl.BlockSpec((M, o_t, 1), lambda o, b: (0, o, 0)),  # D_k
            pl.BlockSpec((M, o_t, 1), lambda o, b: (0, o, 0)),  # D_q
        ],
        out_specs=pl.BlockSpec((o_t, b_t), lambda o, b: (o, b)),
        compiler_params=pltpu.CompilerParams(
            dimension_semantics=("parallel", "parallel"),
        ),
        cost_estimate=cost,
    )(x_p, w_p, q_p, a_p, dk_p, dq_p)

    out = out_t[:O, :B].T                            # [B, O]
    return out.reshape(*lead, O)


def adnm_reference(x, w, q, m, d_k, d_q):
    # Pure-JAX reference mirroring the PyTorch forward.
    S = jax.nn.sigmoid(x[..., None, None, :] * w - q)
    A = jnp.tanh(m)
    D = jnp.sum(S * A, axis=-1)
    D = d_k * D - d_q
    return jnp.sum(jax.nn.sigmoid(D), axis=-1)


if __name__ == "__main__":
    key = jax.random.PRNGKey(0)

    def make_params(k, O, M, I):
        k_w, k_m, k_dk, k_dq = jax.random.split(k, 4)
        w = jax.random.uniform(k_w, (O, M, I), dtype=jnp.float32)
        q = jnp.full((O, M, I), 0.1, dtype=jnp.float32)           # constant_ init
        m = jax.random.uniform(k_m, (O, 1, I), dtype=jnp.float32,
                               minval=-10.0, maxval=10.0)         # uniform_ init
        d_k = jax.random.uniform(k_dk, (O, M), dtype=jnp.float32)
        d_q = jax.random.uniform(k_dq, (O, M), dtype=jnp.float32)
        return w, q, m, d_k, d_q

    k1, k2 = jax.random.split(key)

    # --- Test 1: small shapes matching the module defaults (single block). ---
    B, I, O, M = 2, 32, 8, 5
    kx, kp = jax.random.split(k1)
    w, q, m, d_k, d_q = make_params(kp, O, M, I)
    x = jax.random.uniform(kx, (B, I), dtype=jnp.float32)

    out = jax.block_until_ready(adnm_forward(x, w, q, m, d_k, d_q))
    ref = adnm_reference(x, w, q, m, d_k, d_q)
    assert out.shape == (B, O)
    assert jnp.allclose(out, ref, atol=2e-5, rtol=2e-5), (out, ref)

    # --- Test 2: exercises the tiled path (B/O padding, multi-step grid,
    #             parameter reuse across inner batch tiles, leading dims). ---
    B2a, B2b, I2, O2, M2 = 30, 10, 32, 37, 5
    kx2, kp2 = jax.random.split(k2)
    w2, q2, m2, d_k2, d_q2 = make_params(kp2, O2, M2, I2)
    x2 = jax.random.uniform(kx2, (B2a, B2b, I2), dtype=jnp.float32)

    out2 = jax.block_until_ready(adnm_forward(x2, w2, q2, m2, d_k2, d_q2))
    ref2 = adnm_reference(x2, w2, q2, m2, d_k2, d_q2)
    assert out2.shape == (B2a, B2b, O2)
    assert jnp.allclose(out2, ref2, atol=2e-5, rtol=2e-5), float(
        jnp.max(jnp.abs(out2 - ref2)))

    print("KERNEL_OK")
</pallas_src>

<mosaic_0001>
module attributes {stable_mosaic.version = 11 : i64} {
  func.func @_adnm_kernel(%arg0: i32, %arg1: i32, %arg2: memref<32x2xf32, #tpu.memory_space<vmem>>, %arg3: memref<5x8x32xf32, #tpu.memory_space<vmem>>, %arg4: memref<5x8x32xf32, #tpu.memory_space<vmem>>, %arg5: memref<8x32xf32, #tpu.memory_space<vmem>>, %arg6: memref<5x8x1xf32, #tpu.memory_space<vmem>>, %arg7: memref<5x8x1xf32, #tpu.memory_space<vmem>>, %arg8: memref<8x2xf32, #tpu.memory_space<vmem>>) attributes {dimension_semantics = [#tpu.dimension_semantics<parallel>, #tpu.dimension_semantics<parallel>], iteration_bounds = array<i64: 1, 1>, scalar_prefetch = 0 : i64, scratch_operands = 0 : i64, tpu.core_type = #tpu.core_type<tc>, window_params = [{transform_indices = @transform_0, window_bounds = array<i64: 32, 2>}, {transform_indices = @transform_1, window_bounds = array<i64: 5, 8, 32>}, {transform_indices = @transform_2, window_bounds = array<i64: 5, 8, 32>}, {transform_indices = @transform_3, window_bounds = array<i64: 8, 32>}, {transform_indices = @transform_4, window_bounds = array<i64: 5, 8, 1>}, {transform_indices = @transform_5, window_bounds = array<i64: 5, 8, 1>}, {transform_indices = @transform_6, window_bounds = array<i64: 8, 2>}]} {
    %c0 = arith.constant 0 : index
    %c0_0 = arith.constant 0 : index
    %0 = vector.load %arg2[%c0, %c0_0] : memref<32x2xf32, #tpu.memory_space<vmem>>, vector<32x2xf32>
    %c0_1 = arith.constant 0 : index
    %c0_2 = arith.constant 0 : index
    %c0_3 = arith.constant 0 : index
    %1 = vector.load %arg3[%c0_1, %c0_2, %c0_3] : memref<5x8x32xf32, #tpu.memory_space<vmem>>, vector<5x8x32xf32>
    %c0_4 = arith.constant 0 : index
    %c0_5 = arith.constant 0 : index
    %c0_6 = arith.constant 0 : index
    %2 = vector.load %arg4[%c0_4, %c0_5, %c0_6] : memref<5x8x32xf32, #tpu.memory_space<vmem>>, vector<5x8x32xf32>
    %c0_7 = arith.constant 0 : index
    %c0_8 = arith.constant 0 : index
    %3 = vector.load %arg5[%c0_7, %c0_8] : memref<8x32xf32, #tpu.memory_space<vmem>>, vector<8x32xf32>
    %4 = vector.shape_cast %1 : vector<5x8x32xf32> to vector<5x8x32x1xf32>
    %5 = vector.shape_cast %0 : vector<32x2xf32> to vector<1x1x32x2xf32>
    %6 = vector.broadcast %4 : vector<5x8x32x1xf32> to vector<5x8x32x2xf32>
    %7 = vector.broadcast %5 : vector<1x1x32x2xf32> to vector<5x8x32x2xf32>
    %8 = arith.mulf %6, %7 : vector<5x8x32x2xf32>
    %9 = vector.shape_cast %2 : vector<5x8x32xf32> to vector<5x8x32x1xf32>
    %10 = vector.broadcast %9 : vector<5x8x32x1xf32> to vector<5x8x32x2xf32>
    %11 = arith.subf %8, %10 : vector<5x8x32x2xf32>
    %12 = arith.negf %11 : vector<5x8x32x2xf32>
    %13 = math.exp %12 : vector<5x8x32x2xf32>
    %cst = arith.constant 1.000000e+00 : f32
    %14 = vector.broadcast %cst : f32 to vector<5x8x32x2xf32>
    %15 = arith.addf %14, %13 : vector<5x8x32x2xf32>
    %16 = arith.divf %14, %15 : vector<5x8x32x2xf32>
    %17 = vector.shape_cast %3 : vector<8x32xf32> to vector<1x8x32x1xf32>
    %18 = vector.broadcast %17 : vector<1x8x32x1xf32> to vector<5x8x32x2xf32>
    %19 = arith.mulf %16, %18 : vector<5x8x32x2xf32>
    %cst_9 = arith.constant dense<0.000000e+00> : vector<5x8x2xf32>
    %20 = vector.multi_reduction <add>, %19, %cst_9 [2] : vector<5x8x32x2xf32> to vector<5x8x2xf32>
    %c0_10 = arith.constant 0 : index
    %c0_11 = arith.constant 0 : index
    %c0_12 = arith.constant 0 : index
    %21 = vector.load %arg6[%c0_10, %c0_11, %c0_12] : memref<5x8x1xf32, #tpu.memory_space<vmem>>, vector<5x8x1xf32>
    %22 = vector.broadcast %21 : vector<5x8x1xf32> to vector<5x8x2xf32>
    %23 = arith.mulf %22, %20 : vector<5x8x2xf32>
    %c0_13 = arith.constant 0 : index
    %c0_14 = arith.constant 0 : index
    %c0_15 = arith.constant 0 : index
    %24 = vector.load %arg7[%c0_13, %c0_14, %c0_15] : memref<5x8x1xf32, #tpu.memory_space<vmem>>, vector<5x8x1xf32>
    %25 = vector.broadcast %24 : vector<5x8x1xf32> to vector<5x8x2xf32>
    %26 = arith.subf %23, %25 : vector<5x8x2xf32>
    %27 = arith.negf %26 : vector<5x8x2xf32>
    %28 = math.exp %27 : vector<5x8x2xf32>
    %cst_16 = arith.constant 1.000000e+00 : f32
    %29 = vector.broadcast %cst_16 : f32 to vector<5x8x2xf32>
    %30 = arith.addf %29, %28 : vector<5x8x2xf32>
    %31 = arith.divf %29, %30 : vector<5x8x2xf32>
    %cst_17 = arith.constant dense<0.000000e+00> : vector<8x2xf32>
    %32 = vector.multi_reduction <add>, %31, %cst_17 [0] : vector<5x8x2xf32> to vector<8x2xf32>
    %c0_18 = arith.constant 0 : index
    %c0_19 = arith.constant 0 : index
    %33 = vector.load %arg8[%c0_18, %c0_19] : memref<8x2xf32, #tpu.memory_space<vmem>>, vector<8x2xf32>
    tpu.vector_store %arg8[%c0_18, %c0_19], %32 {strides = array<i32>} : memref<8x2xf32, #tpu.memory_space<vmem>>, vector<8x2xf32>,
    return
  }
  func.func @transform_0(%arg0: i32, %arg1: i32) -> (i32, i32) {
    %c0_i32 = arith.constant 0 : i32
    %c0_i32_0 = arith.constant 0 : i32
    return %c0_i32, %arg1 : i32, i32
  }
  func.func @transform_1(%arg0: i32, %arg1: i32) -> (i32, i32, i32) {
    %c0_i32 = arith.constant 0 : i32
    %c0_i32_0 = arith.constant 0 : i32
    %c0_i32_1 = arith.constant 0 : i32
    return %c0_i32, %arg0, %c0_i32_0 : i32, i32, i32
  }
  func.func @transform_2(%arg0: i32, %arg1: i32) -> (i32, i32, i32) {
    %c0_i32 = arith.constant 0 : i32
    %c0_i32_0 = arith.constant 0 : i32
    %c0_i32_1 = arith.constant 0 : i32
    return %c0_i32, %arg0, %c0_i32_0 : i32, i32, i32
  }
  func.func @transform_3(%arg0: i32, %arg1: i32) -> (i32, i32) {
    %c0_i32 = arith.constant 0 : i32
    %c0_i32_0 = arith.constant 0 : i32
    return %arg0, %c0_i32 : i32, i32
  }
  func.func @transform_4(%arg0: i32, %arg1: i32) -> (i32, i32, i32) {
    %c0_i32 = arith.constant 0 : i32
    %c0_i32_0 = arith.constant 0 : i32
    %c0_i32_1 = arith.constant 0 : i32
    return %c0_i32, %arg0, %c0_i32_0 : i32, i32, i32
  }
  func.func @transform_5(%arg0: i32, %arg1: i32) -> (i32, i32, i32) {
    %c0_i32 = arith.constant 0 : i32
    %c0_i32_0 = arith.constant 0 : i32
    %c0_i32_1 = arith.constant 0 : i32
    return %c0_i32, %arg0, %c0_i32_0 : i32, i32, i32
  }
  func.func @transform_6(%arg0: i32, %arg1: i32) -> (i32, i32) {
    %c0_i32 = arith.constant 0 : i32
    return %arg0, %arg1 : i32, i32
  }
}

</mosaic_0001>

<bundles_post_ra>
// kernel: tpu_custom_call.1
= control target key start
LH: loop header
LB: loop body
LE: loop exit
PB: predicated region body
PF: predicated region fallthrough
CT: control target
= control target key end

     0   :  { %v38_v0 = vlaneseq  ;;  %vm3150_vm0 = vcmask 15360   ;;  %vm3741_vm1 = vcmask 1041409   ;;  %vm3743_vm2 = vcmask 1042434   ;;  %s6818_s1 = inlined_call_operand.vmem [shape: f32[5,8,32], index: 1, kind: input, shape index: {}]   ;;  %s6819_s2 = inlined_call_operand.vmem [shape: f32[5,8,32], index: 2, kind: input, shape index: {}]   ;;  %s6820_s0 = inlined_call_operand.vmem [shape: f32[32,2], index: 0, kind: input, shape index: {}]   ;;  %s6821_s3 = inlined_call_operand.vmem [shape: f32[8,32], index: 3, kind: input, shape index: {}]   ;;  %s6822_s4 = inlined_call_operand.vmem [shape: f32[5,8,1], index: 4, kind: input, shape index: {}]   ;;  %s6823_s5 = inlined_call_operand.vmem [shape: f32[5,8,1], index: 5, kind: input, shape index: {}]   ;;  %s6824_s6 = inlined_call_operand.vmem [shape: f32[8,2], index: 6, kind: output, shape index: {}]  }
   0x1   :  { %v27_v2 = vld [vmem:[%s6818_s1] sm:$0xff]  ;;  %v28_v19 = vld [vmem:[%s6818_s1 + $0x8] sm:$0xff]  ;;  %v4793_v32 = vld [vmem:[%s6818_s1 + $0x10] sm:$0xff]  ;;  %vm3745_vm3 = vcmask 1043459   ;;  %vm3747_vm4 = vcmask 1044484   ;;  %vm3749_vm5 = vcmask 1045509  }
   0x2   :  { %v39_v1 = vshrl.u32 %v38_v0, 7  ;;  %vm3751_vm6 = vcmask 1046534   ;;  %vm3753_vm7 = vcmask 1047559  }
   0x4   :  { %v4747_v3 = vsub.s32 0, %v39_v1  ;;  %v4750_v5 = vsub.s32 1, %v39_v1  ;;  %v4753_v7 = vsub.s32 2, %v39_v1  ;;  %v4756_v9 = vsub.s32 3, %v39_v1 }
   0x5   :  { %v4759_v11 = vsub.s32 4, %v39_v1  ;;  %v4762_v13 = vsub.s32 5, %v39_v1  ;;  %v4765_v15 = vsub.s32 6, %v39_v1  ;;  %v4768_v17 = vsub.s32 7, %v39_v1 }
   0x6   :  { %v41_v4 = vrot.slane %v27_v2, %v4747_v3  ;;  %v60_v6 = vrot.slane %v27_v2, %v4750_v5  ;;  %v79_v8 = vrot.slane %v27_v2, %v4753_v7  ;;  %v98_v10 = vrot.slane %v27_v2, %v4756_v9 }
   0x7   :  { %v117_v12 = vrot.slane %v27_v2, %v4759_v11  ;;  %v136_v14 = vrot.slane %v27_v2, %v4762_v13  ;;  %v155_v16 = vrot.slane %v27_v2, %v4765_v15  ;;  %v174_v18 = vrot.slane %v27_v2, %v4768_v17 }
   0x8   :  { %51 = vbcast.lane.b32.xlu1 %v41_v4, 272  ;;  %43 = vbcast.lane.b32.xlu0 %v41_v4, 256  ;;  %v193_v20 = vrot.slane %v28_v19, %v4747_v3  ;;  %v212_v21 = vrot.slane %v28_v19, %v4750_v5  ;;  %v231_v22 = vrot.slane %v28_v19, %v4753_v7 }
   0x9   :  { %v250_v23 = vrot.slane %v28_v19, %v4756_v9  ;;  %v269_v24 = vrot.slane %v28_v19, %v4759_v11  ;;  %v288_v25 = vrot.slane %v28_v19, %v4762_v13  ;;  %v307_v26 = vrot.slane %v28_v19, %v4765_v15 }
   0xa   :  { %v326_v29 = vrot.slane %v28_v19, %v4768_v17  ;;  %v345_v35 = vrot.slane %v4793_v32, %v4747_v3  ;;  %v364_v40 = vrot.slane %v4793_v32, %v4750_v5  ;;  %v383_v45 = vrot.slane %v4793_v32, %v4753_v7 }
   0xb   :  { %v402_v50 = vrot.slane %v4793_v32, %v4756_v9  ;;  %v421_v55 = vrot.slane %v4793_v32, %v4759_v11  ;;  %v440_v60 = vrot.slane %v4793_v32, %v4762_v13  ;;  %v459_v1 = vrot.slane %v4793_v32, %v4765_v15 }
   0xc   :  { %55 = vbcast.lane.b32.xlu1 %v41_v4, 280  ;;  %47 = vbcast.lane.b32.xlu0 %v41_v4, 264 }
  0x10   :  { %66 = vbcast.lane.b32.xlu1 %v60_v6, 264  ;;  %62 = vbcast.lane.b32.xlu0 %v60_v6, 256 }
  0x14   :  { %74 = vbcast.lane.b32.xlu1 %v60_v6, 280  ;;  %70 = vbcast.lane.b32.xlu0 %v60_v6, 272 }
  0x18   :  { %85 = vbcast.lane.b32.xlu1 %v79_v8, 264  ;;  %81 = vbcast.lane.b32.xlu0 %v79_v8, 256 }
  0x1c   :  { %93 = vbcast.lane.b32.xlu1 %v79_v8, 280  ;;  %89 = vbcast.lane.b32.xlu0 %v79_v8, 272 }
  0x20   :  { %104 = vbcast.lane.b32.xlu1 %v98_v10, 264  ;;  %100 = vbcast.lane.b32.xlu0 %v98_v10, 256 }
  0x24   :  { %112 = vbcast.lane.b32.xlu1 %v98_v10, 280  ;;  %108 = vbcast.lane.b32.xlu0 %v98_v10, 272  ;;  %v478_v10 = vrot.slane %v4793_v32, %v4768_v17 }
  0x28   :  { %123 = vbcast.lane.b32.xlu1 %v117_v12, 264  ;;  %119 = vbcast.lane.b32.xlu0 %v117_v12, 256 }
  0x2c   :  { %131 = vbcast.lane.b32.xlu1 %v117_v12, 280  ;;  %127 = vbcast.lane.b32.xlu0 %v117_v12, 272 }
  0x30   :  { %142 = vbcast.lane.b32.xlu1 %v136_v14, 264  ;;  %138 = vbcast.lane.b32.xlu0 %v136_v14, 256 }
  0x34   :  { %150 = vbcast.lane.b32.xlu1 %v136_v14, 280  ;;  %146 = vbcast.lane.b32.xlu0 %v136_v14, 272 }
  0x38   :  { %161 = vbcast.lane.b32.xlu1 %v155_v16, 264  ;;  %157 = vbcast.lane.b32.xlu0 %v155_v16, 256 }
  0x3c   :  { %169 = vbcast.lane.b32.xlu1 %v155_v16, 280  ;;  %165 = vbcast.lane.b32.xlu0 %v155_v16, 272  ;;  %v4878_v16 = vld [vmem:[%s6818_s1 + $0x18] sm:$0xff] }
  0x40   :  { %180 = vbcast.lane.b32.xlu1 %v174_v18, 264  ;;  %176 = vbcast.lane.b32.xlu0 %v174_v18, 256 }
  0x44   :  { %188 = vbcast.lane.b32.xlu1 %v174_v18, 280  ;;  %184 = vbcast.lane.b32.xlu0 %v174_v18, 272 }
  0x48   :  { %199 = vbcast.lane.b32.xlu1 %v193_v20, 264  ;;  %195 = vbcast.lane.b32.xlu0 %v193_v20, 256 }
  0x4c   :  { %207 = vbcast.lane.b32.xlu1 %v193_v20, 280  ;;  %203 = vbcast.lane.b32.xlu0 %v193_v20, 272  ;;  %v497_v20 = vrot.slane %v4878_v16, %v4747_v3 }
  0x50   :  { %218 = vbcast.lane.b32.xlu1 %v212_v21, 264  ;;  %214 = vbcast.lane.b32.xlu0 %v212_v21, 256 }
  0x54   :  { %226 = vbcast.lane.b32.xlu1 %v212_v21, 280  ;;  %222 = vbcast.lane.b32.xlu0 %v212_v21, 272 }
  0x58   :  { %237 = vbcast.lane.b32.xlu1 %v231_v22, 264  ;;  %233 = vbcast.lane.b32.xlu0 %v231_v22, 256 }
  0x5c   :  { %245 = vbcast.lane.b32.xlu1 %v231_v22, 280  ;;  %241 = vbcast.lane.b32.xlu0 %v231_v22, 272 }
  0x60   :  { %256 = vbcast.lane.b32.xlu1 %v250_v23, 264  ;;  %252 = vbcast.lane.b32.xlu0 %v250_v23, 256 }
  0x64   :  { %264 = vbcast.lane.b32.xlu1 %v250_v23, 280  ;;  %260 = vbcast.lane.b32.xlu0 %v250_v23, 272 }
  0x68   :  { %275 = vbcast.lane.b32.xlu1 %v269_v24, 264  ;;  %271 = vbcast.lane.b32.xlu0 %v269_v24, 256 }
  0x6c   :  { %283 = vbcast.lane.b32.xlu1 %v269_v24, 280  ;;  %279 = vbcast.lane.b32.xlu0 %v269_v24, 272 }
  0x70   :  { %294 = vbcast.lane.b32.xlu1 %v288_v25, 264  ;;  %290 = vbcast.lane.b32.xlu0 %v288_v25, 256 }
  0x74   :  { %302 = vbcast.lane.b32.xlu1 %v288_v25, 280  ;;  %298 = vbcast.lane.b32.xlu0 %v288_v25, 272  ;;  %v516_v25 = vrot.slane %v4878_v16, %v4750_v5 }
  0x78   :  { %313 = vbcast.lane.b32.xlu1 %v307_v26, 264  ;;  %309 = vbcast.lane.b32.xlu0 %v307_v26, 256 }
  0x7a   :  { %v4781_v27 = vpop.permute.xlu1 %51  ;;  %v4783_v28 = vpop.permute.xlu0 %43 }
  0x7c   :  { %321 = vbcast.lane.b32.xlu1 %v307_v26, 280  ;;  %317 = vbcast.lane.b32.xlu0 %v307_v26, 272 }
  0x7e   :  { %v4786_v30 = vpop.permute.xlu1 %55  ;;  %v4788_v31 = vpop.permute.xlu0 %47 }
  0x80   :  { %332 = vbcast.lane.b32.xlu1 %v326_v29, 264  ;;  %328 = vbcast.lane.b32.xlu0 %v326_v29, 256 }
  0x82   :  { %v4795_v33 = vpop.permute.xlu1 %66  ;;  %v4797_v34 = vpop.permute.xlu0 %62 }
  0x84   :  { %340 = vbcast.lane.b32.xlu1 %v326_v29, 280  ;;  %336 = vbcast.lane.b32.xlu0 %v326_v29, 272 }
  0x86   :  { %v4801_v36 = vpop.permute.xlu1 %74  ;;  %v4803_v37 = vpop.permute.xlu0 %70 }
  0x88   :  { %351 = vbcast.lane.b32.xlu1 %v345_v35, 264  ;;  %347 = vbcast.lane.b32.xlu0 %v345_v35, 256 }
  0x8a   :  { %v4805_v38 = vpop.permute.xlu1 %85  ;;  %v4807_v39 = vpop.permute.xlu0 %81 }
  0x8c   :  { %359 = vbcast.lane.b32.xlu1 %v345_v35, 280  ;;  %355 = vbcast.lane.b32.xlu0 %v345_v35, 272 }
  0x8e   :  { %v4811_v41 = vpop.permute.xlu1 %93  ;;  %v4813_v42 = vpop.permute.xlu0 %89 }
  0x90   :  { %370 = vbcast.lane.b32.xlu1 %v364_v40, 264  ;;  %366 = vbcast.lane.b32.xlu0 %v364_v40, 256 }
  0x92   :  { %v4815_v43 = vpop.permute.xlu1 %104  ;;  %v4817_v44 = vpop.permute.xlu0 %100 }
  0x94   :  { %378 = vbcast.lane.b32.xlu1 %v364_v40, 280  ;;  %374 = vbcast.lane.b32.xlu0 %v364_v40, 272  ;;  %v535_v40 = vrot.slane %v4878_v16, %v4753_v7 }
  0x96   :  { %v4821_v46 = vpop.permute.xlu1 %112  ;;  %v4823_v47 = vpop.permute.xlu0 %108 }
  0x98   :  { %389 = vbcast.lane.b32.xlu1 %v383_v45, 264  ;;  %385 = vbcast.lane.b32.xlu0 %v383_v45, 256 }
  0x9a   :  { %v4825_v48 = vpop.permute.xlu1 %123  ;;  %v4827_v49 = vpop.permute.xlu0 %119 }
  0x9c   :  { %397 = vbcast.lane.b32.xlu1 %v383_v45, 280  ;;  %393 = vbcast.lane.b32.xlu0 %v383_v45, 272 }
  0x9e   :  { %v4831_v51 = vpop.permute.xlu1 %131  ;;  %v4833_v52 = vpop.permute.xlu0 %127 }
  0xa0   :  { %408 = vbcast.lane.b32.xlu1 %v402_v50, 264  ;;  %404 = vbcast.lane.b32.xlu0 %v402_v50, 256 }
  0xa2   :  { %v4835_v53 = vpop.permute.xlu1 %142  ;;  %v4837_v54 = vpop.permute.xlu0 %138 }
  0xa4   :  { %416 = vbcast.lane.b32.xlu1 %v402_v50, 280  ;;  %412 = vbcast.lane.b32.xlu0 %v402_v50, 272 }
  0xa6   :  { %v4841_v56 = vpop.permute.xlu1 %150  ;;  %v4843_v57 = vpop.permute.xlu0 %146 }
  0xa8   :  { %427 = vbcast.lane.b32.xlu1 %v421_v55, 264  ;;  %423 = vbcast.lane.b32.xlu0 %v421_v55, 256 }
  0xaa   :  { %v4845_v58 = vpop.permute.xlu1 %161  ;;  %v4847_v59 = vpop.permute.xlu0 %157 }
  0xac   :  { %435 = vbcast.lane.b32.xlu1 %v421_v55, 280  ;;  %431 = vbcast.lane.b32.xlu0 %v421_v55, 272 }
  0xae   :  { %v4851_v61 = vpop.permute.xlu1 %169  ;;  %v4853_v62 = vpop.permute.xlu0 %165 }
  0xb0   :  { %446 = vbcast.lane.b32.xlu1 %v440_v60, 264  ;;  %442 = vbcast.lane.b32.xlu0 %v440_v60, 256 }
  0xb2   :  { %v4855_v63 = vpop.permute.xlu1 %180  ;;  %v4857_v0 = vpop.permute.xlu0 %176 }
  0xb4   :  { %454 = vbcast.lane.b32.xlu1 %v440_v60, 280  ;;  %450 = vbcast.lane.b32.xlu0 %v440_v60, 272 }
  0xb6   :  { %v4861_v2 = vpop.permute.xlu1 %188  ;;  %v4863_v4 = vpop.permute.xlu0 %184 }
  0xb8   :  { %465 = vbcast.lane.b32.xlu1 %v459_v1, 264  ;;  %461 = vbcast.lane.b32.xlu0 %v459_v1, 256 }
  0xba   :  { %v4865_v6 = vpop.permute.xlu1 %199  ;;  %v4867_v8 = vpop.permute.xlu0 %195 }
  0xbc   :  { %473 = vbcast.lane.b32.xlu1 %v459_v1, 280  ;;  %469 = vbcast.lane.b32.xlu0 %v459_v1, 272  ;;  %v554_v1 = vrot.slane %v4878_v16, %v4756_v9 }
  0xbe   :  { %v4871_v12 = vpop.permute.xlu1 %207  ;;  %v4873_v14 = vpop.permute.xlu0 %203 }
  0xc0   :  { %484 = vbcast.lane.b32.xlu1 %v478_v10, 264  ;;  %480 = vbcast.lane.b32.xlu0 %v478_v10, 256 }
  0xc2   :  { %v4880_v18 = vpop.permute.xlu1 %218  ;;  %v4882_v19 = vpop.permute.xlu0 %214 }
  0xc3   :  { %6827 = vst [vmem:[#allocation2_spill] sm:$0xff] %v4882_v19 }
  0xc4   :  { %492 = vbcast.lane.b32.xlu1 %v478_v10, 280  ;;  %488 = vbcast.lane.b32.xlu0 %v478_v10, 272 }
  0xc6   :  { %v4886_v21 = vpop.permute.xlu1 %226  ;;  %v4888_v22 = vpop.permute.xlu0 %222 }
  0xc7   :  { %6828 = vst [vmem:[#allocation3_spill] sm:$0xff] %v4886_v21  ;;  %6829 = vst [vmem:[#allocation4_spill] sm:$0xff] %v4888_v22 }
  0xc8   :  { %503 = vbcast.lane.b32.xlu1 %v497_v20, 264  ;;  %499 = vbcast.lane.b32.xlu0 %v497_v20, 256 }
  0xca   :  { %v4890_v23 = vpop.permute.xlu1 %237  ;;  %v4892_v24 = vpop.permute.xlu0 %233 }
  0xcb   :  { %6830 = vst [vmem:[#allocation5_spill] sm:$0xff] %v4890_v23  ;;  %6831 = vst [vmem:[#allocation6_spill] sm:$0xff] %v4892_v24 }
  0xcc   :  { %511 = vbcast.lane.b32.xlu1 %v497_v20, 280  ;;  %507 = vbcast.lane.b32.xlu0 %v497_v20, 272 }
  0xce   :  { %v4896_v26 = vpop.permute.xlu1 %245  ;;  %v4898_v29 = vpop.permute.xlu0 %241 }
  0xcf   :  { %6832 = vst [vmem:[#allocation7_spill] sm:$0xff] %v4896_v26  ;;  %6833 = vst [vmem:[#allocation8_spill] sm:$0xff] %v4898_v29 }
  0xd0   :  { %522 = vbcast.lane.b32.xlu1 %v516_v25, 264  ;;  %518 = vbcast.lane.b32.xlu0 %v516_v25, 256 }
  0xd2   :  { %v4900_v32 = vpop.permute.xlu1 %256  ;;  %v4902_v35 = vpop.permute.xlu0 %252 }
  0xd3   :  { %6834 = vst [vmem:[#allocation9_spill] sm:$0xff] %v4900_v32  ;;  %6835 = vst [vmem:[#allocation10_spill] sm:$0xff] %v4902_v35 }
  0xd4   :  { %530 = vbcast.lane.b32.xlu1 %v516_v25, 280  ;;  %526 = vbcast.lane.b32.xlu0 %v516_v25, 272 }
  0xd6   :  { %v4906_v45 = vpop.permute.xlu1 %264  ;;  %v4908_v50 = vpop.permute.xlu0 %260 }
  0xd7   :  { %6836 = vst [vmem:[#allocation11_spill] sm:$0xff] %v4906_v45  ;;  %6837 = vst [vmem:[#allocation12_spill] sm:$0xff] %v4908_v50  ;;  %v5227_v45 = vld [vmem:[%s6820_s0 + $0x18] sm:$0xff] }
  0xd8   :  { %541 = vbcast.lane.b32.xlu1 %v535_v40, 264  ;;  %537 = vbcast.lane.b32.xlu0 %v535_v40, 256  ;;  %v801_v29 = vmul.f32 %v4786_v30, %v5227_v45  ;;  %v5242_v30 = vld [vmem:[%s6819_s2 + $0x10] sm:$0xff] }
  0xda   :  { %v4910_v55 = vpop.permute.xlu1 %275  ;;  %v4912_v60 = vpop.permute.xlu0 %271 }
  0xdb   :  { %6838 = vst [vmem:[#allocation13_spill] sm:$0xff] %v4910_v55  ;;  %6839 = vst [vmem:[#allocation14_spill] sm:$0xff] %v4912_v60  ;;  %v573_v60 = vrot.slane %v4878_v16, %v4759_v11 }
  0xdc   :  { %549 = vbcast.lane.b32.xlu1 %v535_v40, 280  ;;  %545 = vbcast.lane.b32.xlu0 %v535_v40, 272 }
  0xde   :  { %v4916_v10 = vpop.permute.xlu1 %283  ;;  %v4918_v20 = vpop.permute.xlu0 %279 }
  0xdf   :  { %6840 = vst [vmem:[#allocation15_spill] sm:$0xff] %v4916_v10  ;;  %6841 = vst [vmem:[#allocation16_spill] sm:$0xff] %v4918_v20 }
  0xe0   :  { %560 = vbcast.lane.b32.xlu1 %v554_v1, 264  ;;  %556 = vbcast.lane.b32.xlu0 %v554_v1, 256 }
  0xe2   :  { %v4920_v25 = vpop.permute.xlu1 %294  ;;  %v4922_v50 = vpop.permute.xlu0 %290 }
  0xe3   :  { %6842 = vst [vmem:[#allocation17_spill] sm:$0xff] %v4920_v25  ;;  %6843 = vst [vmem:[#allocation18_spill] sm:$0xff] %v4922_v50  ;;  %v592_v50 = vrot.slane %v4878_v16, %v4762_v13 }
  0xe4   :  { %568 = vbcast.lane.b32.xlu1 %v554_v1, 280  ;;  %564 = vbcast.lane.b32.xlu0 %v554_v1, 272 }
  0xe6   :  { %v4926_v55 = vpop.permute.xlu1 %302  ;;  %v4928_v40 = vpop.permute.xlu0 %298 }
  0xe7   :  { %6844 = vst [vmem:[#allocation19_spill] sm:$0xff] %v4926_v55  ;;  %6845 = vst [vmem:[#allocation20_spill] sm:$0xff] %v4928_v40 }
  0xe8   :  { %579 = vbcast.lane.b32.xlu1 %v573_v60, 264  ;;  %575 = vbcast.lane.b32.xlu0 %v573_v60, 256 }
  0xea   :  { %v4930_v10 = vpop.permute.xlu1 %313  ;;  %v4932_v20 = vpop.permute.xlu0 %309 }
  0xeb   :  { %6846 = vst [vmem:[#allocation21_spill] sm:$0xff] %v4930_v10  ;;  %6847 = vst [vmem:[#allocation22_spill] sm:$0xff] %v4932_v20  ;;  %v611_v20 = vrot.slane %v4878_v16, %v4765_v15 }
  0xec   :  { %587 = vbcast.lane.b32.xlu1 %v573_v60, 280  ;;  %583 = vbcast.lane.b32.xlu0 %v573_v60, 272 }
  0xee   :  { %v4936_v25 = vpop.permute.xlu1 %321  ;;  %v4938_v1 = vpop.permute.xlu0 %317 }
  0xef   :  { %6848 = vst [vmem:[#allocation23_spill] sm:$0xff] %v4936_v25  ;;  %6849 = vst [vmem:[#allocation24_spill] sm:$0xff] %v4938_v1 }
  0xf0   :  { %598 = vbcast.lane.b32.xlu1 %v592_v50, 264  ;;  %594 = vbcast.lane.b32.xlu0 %v592_v50, 256 }
  0xf2   :  { %v4940_v55 = vpop.permute.xlu1 %332  ;;  %v4942_v40 = vpop.permute.xlu0 %328 }
  0xf3   :  { %6850 = vst [vmem:[#allocation25_spill] sm:$0xff] %v4940_v55  ;;  %6851 = vst [vmem:[#allocation26_spill] sm:$0xff] %v4942_v40  ;;  %v630_v40 = vrot.slane %v4878_v16, %v4768_v17 }
  0xf4   :  { %606 = vbcast.lane.b32.xlu1 %v592_v50, 280  ;;  %602 = vbcast.lane.b32.xlu0 %v592_v50, 272 }
  0xf6   :  { %v4946_v10 = vpop.permute.xlu1 %340  ;;  %v4948_v60 = vpop.permute.xlu0 %336 }
  0xf7   :  { %6852 = vst [vmem:[#allocation27_spill] sm:$0xff] %v4946_v10  ;;  %6853 = vst [vmem:[#allocation28_spill] sm:$0xff] %v4948_v60  ;;  %v4963_v60 = vld [vmem:[%s6818_s1 + $0x20] sm:$0xff] }
  0xf8   :  { %617 = vbcast.lane.b32.xlu1 %v611_v20, 264  ;;  %613 = vbcast.lane.b32.xlu0 %v611_v20, 256  ;;  %v649_v16 = vrot.slane %v4963_v60, %v4747_v3 }
  0xfa   :  { %v4950_v25 = vpop.permute.xlu1 %351  ;;  %v4952_v1 = vpop.permute.xlu0 %347 }
  0xfb   :  { %6854 = vst [vmem:[#allocation29_spill] sm:$0xff] %v4950_v25  ;;  %6855 = vst [vmem:[#allocation30_spill] sm:$0xff] %v4952_v1 }
  0xfc   :  { %625 = vbcast.lane.b32.xlu1 %v611_v20, 280  ;;  %621 = vbcast.lane.b32.xlu0 %v611_v20, 272 }
  0xfe   :  { %v4956_v55 = vpop.permute.xlu1 %359  ;;  %v4958_v50 = vpop.permute.xlu0 %355 }
  0xff   :  { %6856 = vst [vmem:[#allocation31_spill] sm:$0xff] %v4956_v55  ;;  %6857 = vst [vmem:[#allocation32_spill] sm:$0xff] %v4958_v50 }
 0x100   :  { %636 = vbcast.lane.b32.xlu1 %v630_v40, 264  ;;  %632 = vbcast.lane.b32.xlu0 %v630_v40, 256 }
 0x102   :  { %v4965_v10 = vpop.permute.xlu1 %370  ;;  %v4967_v25 = vpop.permute.xlu0 %366 }
 0x103   :  { %6858 = vst [vmem:[#allocation33_spill] sm:$0xff] %v4965_v10  ;;  %6859 = vst [vmem:[#allocation34_spill] sm:$0xff] %v4967_v25  ;;  %v668_v25 = vrot.slane %v4963_v60, %v4750_v5 }
 0x104   :  { %644 = vbcast.lane.b32.xlu1 %v630_v40, 280  ;;  %640 = vbcast.lane.b32.xlu0 %v630_v40, 272 }
 0x106   :  { %v4971_v20 = vpop.permute.xlu1 %378  ;;  %v4973_v55 = vpop.permute.xlu0 %374 }
 0x107   :  { %6860 = vst [vmem:[#allocation35_spill] sm:$0xff] %v4971_v20  ;;  %6861 = vst [vmem:[#allocation36_spill] sm:$0xff] %v4973_v55 }
 0x108   :  { %655 = vbcast.lane.b32.xlu1 %v649_v16, 264  ;;  %651 = vbcast.lane.b32.xlu0 %v649_v16, 256 }
 0x10a   :  { %v4975_v50 = vpop.permute.xlu1 %389  ;;  %v4977_v1 = vpop.permute.xlu0 %385 }
 0x10b   :  { %6862 = vst [vmem:[#allocation37_spill] sm:$0xff] %v4975_v50  ;;  %6863 = vst [vmem:[#allocation38_spill] sm:$0xff] %v4977_v1  ;;  %v687_v1 = vrot.slane %v4963_v60, %v4753_v7 }
 0x10c   :  { %663 = vbcast.lane.b32.xlu1 %v649_v16, 280  ;;  %659 = vbcast.lane.b32.xlu0 %v649_v16, 272 }
 0x10e   :  { %v4981_v10 = vpop.permute.xlu1 %397  ;;  %v4983_v40 = vpop.permute.xlu0 %393 }
 0x10f   :  { %6864 = vst [vmem:[#allocation39_spill] sm:$0xff] %v4981_v10  ;;  %6865 = vst [vmem:[#allocation40_spill] sm:$0xff] %v4983_v40 }
 0x110   :  { %674 = vbcast.lane.b32.xlu1 %v668_v25, 264  ;;  %670 = vbcast.lane.b32.xlu0 %v668_v25, 256 }
 0x112   :  { %v4985_v20 = vpop.permute.xlu1 %408  ;;  %v4987_v55 = vpop.permute.xlu0 %404 }
 0x113   :  { %6866 = vst [vmem:[#allocation41_spill] sm:$0xff] %v4985_v20  ;;  %6867 = vst [vmem:[#allocation42_spill] sm:$0xff] %v4987_v55  ;;  %v706_v55 = vrot.slane %v4963_v60, %v4756_v9 }
 0x114   :  { %682 = vbcast.lane.b32.xlu1 %v668_v25, 280  ;;  %678 = vbcast.lane.b32.xlu0 %v668_v25, 272 }
 0x116   :  { %v4991_v50 = vpop.permute.xlu1 %416  ;;  %v4993_v16 = vpop.permute.xlu0 %412 }
 0x117   :  { %6868 = vst [vmem:[#allocation43_spill] sm:$0xff] %v4991_v50  ;;  %6869 = vst [vmem:[#allocation44_spill] sm:$0xff] %v4993_v16 }
 0x118   :  { %693 = vbcast.lane.b32.xlu1 %v687_v1, 264  ;;  %689 = vbcast.lane.b32.xlu0 %v687_v1, 256 }
 0x11a   :  { %v4995_v10 = vpop.permute.xlu1 %427  ;;  %v4997_v40 = vpop.permute.xlu0 %423 }
 0x11b   :  { %6870 = vst [vmem:[#allocation45_spill] sm:$0xff] %v4995_v10  ;;  %6871 = vst [vmem:[#allocation46_spill] sm:$0xff] %v4997_v40  ;;  %v725_v40 = vrot.slane %v4963_v60, %v4759_v11 }
 0x11c   :  { %701 = vbcast.lane.b32.xlu1 %v687_v1, 280  ;;  %697 = vbcast.lane.b32.xlu0 %v687_v1, 272 }
 0x11e   :  { %v5001_v20 = vpop.permute.xlu1 %435  ;;  %v5003_v25 = vpop.permute.xlu0 %431 }
 0x11f   :  { %6872 = vst [vmem:[#allocation47_spill] sm:$0xff] %v5001_v20  ;;  %6873 = vst [vmem:[#allocation48_spill] sm:$0xff] %v5003_v25 }
 0x120   :  { %712 = vbcast.lane.b32.xlu1 %v706_v55, 264  ;;  %708 = vbcast.lane.b32.xlu0 %v706_v55, 256 }
 0x122   :  { %v5005_v50 = vpop.permute.xlu1 %446  ;;  %v5007_v16 = vpop.permute.xlu0 %442 }
 0x123   :  { %6874 = vst [vmem:[#allocation49_spill] sm:$0xff] %v5005_v50  ;;  %6875 = vst [vmem:[#allocation50_spill] sm:$0xff] %v5007_v16  ;;  %v744_v16 = vrot.slane %v4963_v60, %v4762_v13 }
 0x124   :  { %720 = vbcast.lane.b32.xlu1 %v706_v55, 280  ;;  %716 = vbcast.lane.b32.xlu0 %v706_v55, 272 }
 0x126   :  { %v5011_v10 = vpop.permute.xlu1 %454  ;;  %v5013_v1 = vpop.permute.xlu0 %450 }
 0x127   :  { %6876 = vst [vmem:[#allocation51_spill] sm:$0xff] %v5011_v10  ;;  %6877 = vst [vmem:[#allocation52_spill] sm:$0xff] %v5013_v1 }
 0x128   :  { %731 = vbcast.lane.b32.xlu1 %v725_v40, 264  ;;  %727 = vbcast.lane.b32.xlu0 %v725_v40, 256 }
 0x12a   :  { %v5015_v20 = vpop.permute.xlu1 %465  ;;  %v5017_v25 = vpop.permute.xlu0 %461 }
 0x12b   :  { %6878 = vst [vmem:[#allocation53_spill] sm:$0xff] %v5015_v20  ;;  %6879 = vst [vmem:[#allocation54_spill] sm:$0xff] %v5017_v25  ;;  %v763_v25 = vrot.slane %v4963_v60, %v4765_v15 }
 0x12c   :  { %739 = vbcast.lane.b32.xlu1 %v725_v40, 280  ;;  %735 = vbcast.lane.b32.xlu0 %v725_v40, 272 }
 0x12e   :  { %v5021_v50 = vpop.permute.xlu1 %473  ;;  %v5023_v55 = vpop.permute.xlu0 %469 }
 0x12f   :  { %6880 = vst [vmem:[#allocation55_spill] sm:$0xff] %v5021_v50  ;;  %6881 = vst [vmem:[#allocation56_spill] sm:$0xff] %v5023_v55 }
 0x130   :  { %750 = vbcast.lane.b32.xlu1 %v744_v16, 264  ;;  %746 = vbcast.lane.b32.xlu0 %v744_v16, 256 }
 0x132   :  { %v5025_v10 = vpop.permute.xlu1 %484  ;;  %v5027_v1 = vpop.permute.xlu0 %480 }
 0x133   :  { %6882 = vst [vmem:[#allocation57_spill] sm:$0xff] %v5025_v10  ;;  %6883 = vst [vmem:[#allocation58_spill] sm:$0xff] %v5027_v1  ;;  %v782_v1 = vrot.slane %v4963_v60, %v4768_v17 }
 0x134   :  { %758 = vbcast.lane.b32.xlu1 %v744_v16, 280  ;;  %754 = vbcast.lane.b32.xlu0 %v744_v16, 272 }
 0x136   :  { %v5031_v20 = vpop.permute.xlu1 %492  ;;  %v5033_v40 = vpop.permute.xlu0 %488 }
 0x137   :  { %6884 = vst [vmem:[#allocation59_spill] sm:$0xff] %v5031_v20  ;;  %6885 = vst [vmem:[#allocation60_spill] sm:$0xff] %v5033_v40  ;;  %v5048_v40 = vld [vmem:[%s6819_s2] sm:$0xff] }
 0x138   :  { %769 = vbcast.lane.b32.xlu1 %v763_v25, 264  ;;  %765 = vbcast.lane.b32.xlu0 %v763_v25, 256  ;;  %v961_v60 = vrot.slane %v5048_v40, %v4747_v3 }
 0x13a   :  { %v5035_v50 = vpop.permute.xlu1 %503  ;;  %v5037_v55 = vpop.permute.xlu0 %499 }
 0x13b   :  { %6886 = vst [vmem:[#allocation61_spill] sm:$0xff] %v5035_v50  ;;  %6887 = vst [vmem:[#allocation62_spill] sm:$0xff] %v5037_v55 }
 0x13c   :  { %777 = vbcast.lane.b32.xlu1 %v763_v25, 280  ;;  %773 = vbcast.lane.b32.xlu0 %v763_v25, 272 }
 0x13e   :  { %v5041_v10 = vpop.permute.xlu1 %511  ;;  %v5043_v16 = vpop.permute.xlu0 %507 }
 0x13f   :  { %6888 = vst [vmem:[#allocation63_spill] sm:$0xff] %v5041_v10  ;;  %6889 = vst [vmem:[#allocation64_spill] sm:$0xff] %v5043_v16 }
 0x140   :  { %788 = vbcast.lane.b32.xlu1 %v782_v1, 264  ;;  %784 = vbcast.lane.b32.xlu0 %v782_v1, 256 }
 0x142   :  { %v5050_v20 = vpop.permute.xlu1 %522  ;;  %v5052_v50 = vpop.permute.xlu0 %518 }
 0x143   :  { %6890 = vst [vmem:[#allocation65_spill] sm:$0xff] %v5050_v20  ;;  %6891 = vst [vmem:[#allocation66_spill] sm:$0xff] %v5052_v50  ;;  %v980_v50 = vrot.slane %v5048_v40, %v4750_v5 }
 0x144   :  { %796 = vbcast.lane.b32.xlu1 %v782_v1, 280  ;;  %792 = vbcast.lane.b32.xlu0 %v782_v1, 272 }
 0x146   :  { %v5056_v25 = vpop.permute.xlu1 %530  ;;  %v5058_v10 = vpop.permute.xlu0 %526 }
 0x147   :  { %6892 = vst [vmem:[#allocation67_spill] sm:$0xff] %v5056_v25  ;;  %6893 = vst [vmem:[#allocation68_spill] sm:$0xff] %v5058_v10 }
 0x148   :  { %967 = vbcast.lane.b32.xlu1 %v961_v60, 264  ;;  %963 = vbcast.lane.b32.xlu0 %v961_v60, 256 }
 0x14a   :  { %v5060_v16 = vpop.permute.xlu1 %541  ;;  %v5062_v55 = vpop.permute.xlu0 %537 }
 0x14b   :  { %6894 = vst [vmem:[#allocation69_spill] sm:$0xff] %v5060_v16  ;;  %6895 = vst [vmem:[#allocation70_spill] sm:$0xff] %v5062_v55  ;;  %v999_v55 = vrot.slane %v5048_v40, %v4753_v7 }
 0x14c   :  { %975 = vbcast.lane.b32.xlu1 %v961_v60, 280  ;;  %971 = vbcast.lane.b32.xlu0 %v961_v60, 272 }
 0x14e   :  { %v5066_v20 = vpop.permute.xlu1 %549  ;;  %v5068_v1 = vpop.permute.xlu0 %545 }
 0x14f   :  { %6896 = vst [vmem:[#allocation71_spill] sm:$0xff] %v5066_v20  ;;  %6897 = vst [vmem:[#allocation72_spill] sm:$0xff] %v5068_v1 }
 0x150   :  { %986 = vbcast.lane.b32.xlu1 %v980_v50, 264  ;;  %982 = vbcast.lane.b32.xlu0 %v980_v50, 256 }
 0x152   :  { %v5070_v25 = vpop.permute.xlu1 %560  ;;  %v5072_v10 = vpop.permute.xlu0 %556 }
 0x153   :  { %6898 = vst [vmem:[#allocation73_spill] sm:$0xff] %v5070_v25  ;;  %6899 = vst [vmem:[#allocation74_spill] sm:$0xff] %v5072_v10  ;;  %v1018_v10 = vrot.slane %v5048_v40, %v4756_v9 }
 0x154   :  { %994 = vbcast.lane.b32.xlu1 %v980_v50, 280  ;;  %990 = vbcast.lane.b32.xlu0 %v980_v50, 272 }
 0x156   :  { %v5076_v16 = vpop.permute.xlu1 %568  ;;  %v5078_v60 = vpop.permute.xlu0 %564 }
 0x157   :  { %6900 = vst [vmem:[#allocation75_spill] sm:$0xff] %v5076_v16  ;;  %6901 = vst [vmem:[#allocation76_spill] sm:$0xff] %v5078_v60 }
 0x158   :  { %1005 = vbcast.lane.b32.xlu1 %v999_v55, 264  ;;  %1001 = vbcast.lane.b32.xlu0 %v999_v55, 256 }
 0x15a   :  { %v5080_v20 = vpop.permute.xlu1 %579  ;;  %v5082_v1 = vpop.permute.xlu0 %575 }
 0x15b   :  { %6902 = vst [vmem:[#allocation77_spill] sm:$0xff] %v5080_v20  ;;  %6903 = vst [vmem:[#allocation78_spill] sm:$0xff] %v5082_v1  ;;  %v1037_v1 = vrot.slane %v5048_v40, %v4759_v11 }
 0x15c   :  { %1013 = vbcast.lane.b32.xlu1 %v999_v55, 280  ;;  %1009 = vbcast.lane.b32.xlu0 %v999_v55, 272 }
 0x15e   :  { %v5086_v25 = vpop.permute.xlu1 %587  ;;  %v5088_v50 = vpop.permute.xlu0 %583 }
 0x15f   :  { %6904 = vst [vmem:[#allocation79_spill] sm:$0xff] %v5086_v25  ;;  %6905 = vst [vmem:[#allocation80_spill] sm:$0xff] %v5088_v50 }
 0x160   :  { %1024 = vbcast.lane.b32.xlu1 %v1018_v10, 264  ;;  %1020 = vbcast.lane.b32.xlu0 %v1018_v10, 256 }
 0x162   :  { %v5090_v16 = vpop.permute.xlu1 %598  ;;  %v5092_v60 = vpop.permute.xlu0 %594 }
 0x163   :  { %6906 = vst [vmem:[#allocation81_spill] sm:$0xff] %v5090_v16  ;;  %6907 = vst [vmem:[#allocation82_spill] sm:$0xff] %v5092_v60  ;;  %v1056_v60 = vrot.slane %v5048_v40, %v4762_v13 }
 0x164   :  { %1032 = vbcast.lane.b32.xlu1 %v1018_v10, 280  ;;  %1028 = vbcast.lane.b32.xlu0 %v1018_v10, 272 }
 0x166   :  { %v5096_v20 = vpop.permute.xlu1 %606  ;;  %v5098_v55 = vpop.permute.xlu0 %602 }
 0x167   :  { %6908 = vst [vmem:[#allocation83_spill] sm:$0xff] %v5096_v20  ;;  %6909 = vst [vmem:[#allocation84_spill] sm:$0xff] %v5098_v55 }
 0x168   :  { %1043 = vbcast.lane.b32.xlu1 %v1037_v1, 264  ;;  %1039 = vbcast.lane.b32.xlu0 %v1037_v1, 256 }
 0x16a   :  { %v5100_v25 = vpop.permute.xlu1 %617  ;;  %v5102_v50 = vpop.permute.xlu0 %613 }
 0x16b   :  { %6910 = vst [vmem:[#allocation85_spill] sm:$0xff] %v5100_v25  ;;  %6911 = vst [vmem:[#allocation86_spill] sm:$0xff] %v5102_v50  ;;  %v1075_v50 = vrot.slane %v5048_v40, %v4765_v15 }
 0x16c   :  { %1051 = vbcast.lane.b32.xlu1 %v1037_v1, 280  ;;  %1047 = vbcast.lane.b32.xlu0 %v1037_v1, 272 }
 0x16e   :  { %v5106_v16 = vpop.permute.xlu1 %625  ;;  %v5108_v10 = vpop.permute.xlu0 %621 }
 0x16f   :  { %6912 = vst [vmem:[#allocation87_spill] sm:$0xff] %v5106_v16  ;;  %6913 = vst [vmem:[#allocation88_spill] sm:$0xff] %v5108_v10 }
 0x170   :  { %1062 = vbcast.lane.b32.xlu1 %v1056_v60, 264  ;;  %1058 = vbcast.lane.b32.xlu0 %v1056_v60, 256 }
 0x172   :  { %v5110_v20 = vpop.permute.xlu1 %636  ;;  %v5112_v55 = vpop.permute.xlu0 %632 }
 0x173   :  { %6914 = vst [vmem:[#allocation89_spill] sm:$0xff] %v5110_v20  ;;  %6915 = vst [vmem:[#allocation90_spill] sm:$0xff] %v5112_v55  ;;  %v1094_v55 = vrot.slane %v5048_v40, %v4768_v17 }
 0x174   :  { %1070 = vbcast.lane.b32.xlu1 %v1056_v60, 280  ;;  %1066 = vbcast.lane.b32.xlu0 %v1056_v60, 272 }
 0x176   :  { %v5116_v25 = vpop.permute.xlu1 %644  ;;  %v5118_v1 = vpop.permute.xlu0 %640 }
 0x177   :  { %6916 = vst [vmem:[#allocation91_spill] sm:$0xff] %v5116_v25  ;;  %6917 = vst [vmem:[#allocation92_spill] sm:$0xff] %v5118_v1  ;;  %v5133_v1 = vld [vmem:[%s6819_s2 + $0x8] sm:$0xff] }
 0x178   :  { %1081 = vbcast.lane.b32.xlu1 %v1075_v50, 264  ;;  %1077 = vbcast.lane.b32.xlu0 %v1075_v50, 256  ;;  %v1113_v40 = vrot.slane %v5133_v1, %v4747_v3 }
 0x17a   :  { %v5120_v16 = vpop.permute.xlu1 %655  ;;  %v5122_v10 = vpop.permute.xlu0 %651 }
 0x17b   :  { %6918 = vst [vmem:[#allocation93_spill] sm:$0xff] %v5120_v16  ;;  %6919 = vst [vmem:[#allocation94_spill] sm:$0xff] %v5122_v10 }
 0x17c   :  { %1089 = vbcast.lane.b32.xlu1 %v1075_v50, 280  ;;  %1085 = vbcast.lane.b32.xlu0 %v1075_v50, 272 }
 0x17e   :  { %v5126_v20 = vpop.permute.xlu1 %663  ;;  %v5128_v60 = vpop.permute.xlu0 %659 }
 0x17f   :  { %6920 = vst [vmem:[#allocation95_spill] sm:$0xff] %v5126_v20  ;;  %6921 = vst [vmem:[#allocation96_spill] sm:$0xff] %v5128_v60 }
 0x180   :  { %1100 = vbcast.lane.b32.xlu1 %v1094_v55, 264  ;;  %1096 = vbcast.lane.b32.xlu0 %v1094_v55, 256 }
 0x182   :  { %v5135_v25 = vpop.permute.xlu1 %674  ;;  %v5137_v16 = vpop.permute.xlu0 %670 }
 0x183   :  { %6922 = vst [vmem:[#allocation97_spill] sm:$0xff] %v5135_v25  ;;  %6923 = vst [vmem:[#allocation98_spill] sm:$0xff] %v5137_v16  ;;  %v1132_v16 = vrot.slane %v5133_v1, %v4750_v5 }
 0x184   :  { %1108 = vbcast.lane.b32.xlu1 %v1094_v55, 280  ;;  %1104 = vbcast.lane.b32.xlu0 %v1094_v55, 272 }
 0x186   :  { %v5141_v50 = vpop.permute.xlu1 %682  ;;  %v5143_v20 = vpop.permute.xlu0 %678 }
 0x187   :  { %6924 = vst [vmem:[#allocation99_spill] sm:$0xff] %v5141_v50  ;;  %6925 = vst [vmem:[#allocation100_spill] sm:$0xff] %v5143_v20 }
 0x188   :  { %1119 = vbcast.lane.b32.xlu1 %v1113_v40, 264  ;;  %1115 = vbcast.lane.b32.xlu0 %v1113_v40, 256 }
 0x18a   :  { %v5145_v60 = vpop.permute.xlu1 %693  ;;  %v5147_v10 = vpop.permute.xlu0 %689 }
 0x18b   :  { %6926 = vst [vmem:[#allocation101_spill] sm:$0xff] %v5145_v60  ;;  %6927 = vst [vmem:[#allocation102_spill] sm:$0xff] %v5147_v10  ;;  %v1151_v10 = vrot.slane %v5133_v1, %v4753_v7 }
 0x18c   :  { %1127 = vbcast.lane.b32.xlu1 %v1113_v40, 280  ;;  %1123 = vbcast.lane.b32.xlu0 %v1113_v40, 272 }
 0x18e   :  { %v5151_v25 = vpop.permute.xlu1 %701  ;;  %v5153_v55 = vpop.permute.xlu0 %697 }
 0x18f   :  { %6928 = vst [vmem:[#allocation103_spill] sm:$0xff] %v5151_v25  ;;  %6929 = vst [vmem:[#allocation104_spill] sm:$0xff] %v5153_v55 }
 0x190   :  { %1138 = vbcast.lane.b32.xlu1 %v1132_v16, 264  ;;  %1134 = vbcast.lane.b32.xlu0 %v1132_v16, 256 }
 0x192   :  { %v5155_v50 = vpop.permute.xlu1 %712  ;;  %v5157_v20 = vpop.permute.xlu0 %708 }
 0x193   :  { %6930 = vst [vmem:[#allocation105_spill] sm:$0xff] %v5155_v50  ;;  %6931 = vst [vmem:[#allocation106_spill] sm:$0xff] %v5157_v20  ;;  %v1170_v20 = vrot.slane %v5133_v1, %v4756_v9 }
 0x194   :  { %1146 = vbcast.lane.b32.xlu1 %v1132_v16, 280  ;;  %1142 = vbcast.lane.b32.xlu0 %v1132_v16, 272 }
 0x196   :  { %v5161_v60 = vpop.permute.xlu1 %720  ;;  %v5163_v40 = vpop.permute.xlu0 %716 }
 0x197   :  { %6932 = vst [vmem:[#allocation107_spill] sm:$0xff] %v5161_v60  ;;  %6933 = vst [vmem:[#allocation108_spill] sm:$0xff] %v5163_v40 }
 0x198   :  { %1157 = vbcast.lane.b32.xlu1 %v1151_v10, 264  ;;  %1153 = vbcast.lane.b32.xlu0 %v1151_v10, 256 }
 0x19a   :  { %v5165_v25 = vpop.permute.xlu1 %731  ;;  %v5167_v55 = vpop.permute.xlu0 %727 }
 0x19b   :  { %6934 = vst [vmem:[#allocation109_spill] sm:$0xff] %v5165_v25  ;;  %6935 = vst [vmem:[#allocation110_spill] sm:$0xff] %v5167_v55  ;;  %v1189_v55 = vrot.slane %v5133_v1, %v4759_v11 }
 0x19c   :  { %1165 = vbcast.lane.b32.xlu1 %v1151_v10, 280  ;;  %1161 = vbcast.lane.b32.xlu0 %v1151_v10, 272 }
 0x19e   :  { %v5171_v50 = vpop.permute.xlu1 %739  ;;  %v5173_v16 = vpop.permute.xlu0 %735 }
 0x19f   :  { %6936 = vst [vmem:[#allocation111_spill] sm:$0xff] %v5171_v50  ;;  %6937 = vst [vmem:[#allocation112_spill] sm:$0xff] %v5173_v16 }
 0x1a0   :  { %1176 = vbcast.lane.b32.xlu1 %v1170_v20, 264  ;;  %1172 = vbcast.lane.b32.xlu0 %v1170_v20, 256 }
 0x1a2   :  { %v5175_v60 = vpop.permute.xlu1 %750  ;;  %v5177_v40 = vpop.permute.xlu0 %746 }
 0x1a3   :  { %6938 = vst [vmem:[#allocation113_spill] sm:$0xff] %v5175_v60  ;;  %6939 = vst [vmem:[#allocation114_spill] sm:$0xff] %v5177_v40  ;;  %v1208_v60 = vrot.slane %v5133_v1, %v4762_v13 }
 0x1a4   :  { %1184 = vbcast.lane.b32.xlu1 %v1170_v20, 280  ;;  %1180 = vbcast.lane.b32.xlu0 %v1170_v20, 272 }
 0x1a6   :  { %v5181_v25 = vpop.permute.xlu1 %758  ;;  %v5183_v10 = vpop.permute.xlu0 %754 }
 0x1a7   :  { %6940 = vst [vmem:[#allocation115_spill] sm:$0xff] %v5181_v25  ;;  %6941 = vst [vmem:[#allocation116_spill] sm:$0xff] %v5183_v10 }
 0x1a8   :  { %1195 = vbcast.lane.b32.xlu1 %v1189_v55, 264  ;;  %1191 = vbcast.lane.b32.xlu0 %v1189_v55, 256 }
 0x1aa   :  { %v5185_v50 = vpop.permute.xlu1 %769  ;;  %v5187_v16 = vpop.permute.xlu0 %765 }
 0x1ab   :  { %6942 = vst [vmem:[#allocation117_spill] sm:$0xff] %v5185_v50  ;;  %6943 = vst [vmem:[#allocation118_spill] sm:$0xff] %v5187_v16  ;;  %v1227_v16 = vrot.slane %v5133_v1, %v4765_v15  ;;  %v5222_v50 = vld [vmem:[%s6820_s0 + $0x10] sm:$0xff] }
 0x1ac   :  { %1203 = vbcast.lane.b32.xlu1 %v1189_v55, 280  ;;  %1199 = vbcast.lane.b32.xlu0 %v1189_v55, 272  ;;  %v5204_v55 = vld [vmem:[%s6820_s0] sm:$0xff] }
 0x1ae   :  { %v5191_v40 = vpop.permute.xlu1 %777  ;;  %v5193_v20 = vpop.permute.xlu0 %773 }
 0x1af   :  { %6944 = vst [vmem:[#allocation119_spill] sm:$0xff] %v5191_v40  ;;  %6945 = vst [vmem:[#allocation120_spill] sm:$0xff] %v5193_v20  ;;  %v5209_v40 = vld [vmem:[%s6820_s0 + $0x8] sm:$0xff] }
 0x1b0   :  { %1214 = vbcast.lane.b32.xlu1 %v1208_v60, 264  ;;  %1210 = vbcast.lane.b32.xlu0 %v1208_v60, 256 }
 0x1b2   :  { %v5195_v25 = vpop.permute.xlu1 %788  ;;  %v5197_v10 = vpop.permute.xlu0 %784 }
 0x1b3   :  { %6946 = vst [vmem:[#allocation121_spill] sm:$0xff] %v5195_v25  ;;  %6947 = vst [vmem:[#allocation122_spill] sm:$0xff] %v5197_v10  ;;  %v799_v10 = vmul.f32 %v4788_v31, %v5209_v40  ;;  %v800_v31 = vmul.f32 %v4781_v27, %v5222_v50 }
 0x1b4   :  { %1222 = vbcast.lane.b32.xlu1 %v1208_v60, 280  ;;  %1218 = vbcast.lane.b32.xlu0 %v1208_v60, 272  ;;  %v798_v60 = vmul.f32 %v4783_v28, %v5204_v55  ;;  %v1246_v28 = vrot.slane %v5133_v1, %v4768_v17  ;;  %v802_v1 = vmul.f32 %v4797_v34, %v5204_v55 }
 0x1b5   :  { %v805_v34 = vmul.f32 %v4801_v36, %v5227_v45  ;;  %v806_v36 = vmul.f32 %v4807_v39, %v5204_v55  ;;  %v808_v39 = vmul.f32 %v4813_v42, %v5222_v50  ;;  %v810_v42 = vmul.f32 %v4817_v44, %v5204_v55 }
 0x1b6   :  { %v5211_v20 = vpop.permute.xlu1 %796  ;;  %v5213_v25 = vpop.permute.xlu0 %792 }
 0x1b7   :  { %6948 = vst [vmem:[#allocation123_spill] sm:$0xff] %v5211_v20  ;;  %6949 = vst [vmem:[#allocation124_spill] sm:$0xff] %v5213_v25 }
 0x1b8   :  { %1233 = vbcast.lane.b32.xlu1 %v1227_v16, 264  ;;  %1229 = vbcast.lane.b32.xlu0 %v1227_v16, 256 }
 0x1ba   :  { %v968_v20 = vpop.permute.xlu1 %967  ;;  %v964_v25 = vpop.permute.xlu0 %963 }
 0x1bb   :  { %v1719_v35 = vsub.f32 %v799_v10, %v968_v20  ;;  %v1718_v32 = vsub.f32 %v798_v60, %v964_v25  ;;  %v803_v25 = vmul.f32 %v4795_v33, %v5209_v40  ;;  %v1265_v33 = vrot.slane %v5242_v30, %v4747_v3 }
 0x1bc   :  { %1241 = vbcast.lane.b32.xlu1 %v1227_v16, 280  ;;  %1237 = vbcast.lane.b32.xlu0 %v1227_v16, 272 }
 0x1bd   :  { %v3873_v26 = vmul.f32 -1.442695, %v1719_v35  ;;  %v3872_v24 = vmul.f32 -1.442695, %v1718_v32 }
 0x1be   :  { %v976_v23 = vpop.permute.xlu1 %975  ;;  %v972_v22 = vpop.permute.xlu0 %971 }
 0x1bf   :  { %4040 = vpow2.f32 %v3873_v26  ;;  %v1721_v21 = vsub.f32 %v801_v29, %v976_v23  ;;  %v1720_v19 = vsub.f32 %v800_v31, %v972_v22 }
 0x1c0   :  { %4042 = vpow2.f32 %v3872_v24  ;;  %1252 = vbcast.lane.b32.xlu1 %v1246_v28, 264  ;;  %1248 = vbcast.lane.b32.xlu0 %v1246_v28, 256 }
 0x1c1   :  { %v3875_v27 = vmul.f32 -1.442695, %v1721_v21  ;;  %v3874_v16 = vmul.f32 -1.442695, %v1720_v19  ;;  %v804_v19 = vmul.f32 %v4803_v37, %v5222_v50 }
 0x1c2   :  { %v987_v32 = vpop.permute.xlu1 %986  ;;  %v983_v26 = vpop.permute.xlu0 %982 }
 0x1c3   :  { %4044 = vpow2.f32 %v3875_v27  ;;  %v1723_v22 = vsub.f32 %v803_v25, %v987_v32  ;;  %v1722_v23 = vsub.f32 %v802_v1, %v983_v26 }
 0x1c4   :  { %4046 = vpow2.f32 %v3874_v16  ;;  %1260 = vbcast.lane.b32.xlu1 %v1246_v28, 280  ;;  %1256 = vbcast.lane.b32.xlu0 %v1246_v28, 272  ;;  %v807_v28 = vmul.f32 %v4805_v38, %v5209_v40  ;;  %v809_v38 = vmul.f32 %v4811_v41, %v5227_v45  ;;  %v811_v41 = vmul.f32 %v4815_v43, %v5209_v40 }
 0x1c5   :  { %v3877_v21 = vmul.f32 -1.442695, %v1723_v22  ;;  %v3876_v24 = vmul.f32 -1.442695, %v1722_v23  ;;  %v1284_v23 = vrot.slane %v5242_v30, %v4750_v5  ;;  %v1303_v43 = vrot.slane %v5242_v30, %v4753_v7 }
 0x1c6   :  { %v995_v29 = vpop.permute.xlu1 %994  ;;  %v991_v35 = vpop.permute.xlu0 %990 }
 0x1c7   :  { %4048 = vpow2.f32 %v3877_v21  ;;  %v1725_v10 = vsub.f32 %v805_v34, %v995_v29  ;;  %v1724_v20 = vsub.f32 %v804_v19, %v991_v35 }
 0x1c8   :  { %4050 = vpow2.f32 %v3876_v24  ;;  %1271 = vbcast.lane.b32.xlu1 %v1265_v33, 264  ;;  %1267 = vbcast.lane.b32.xlu0 %v1265_v33, 256 }
 0x1c9   :  { %v4041_v60 = vpop.eup %4040  ;;  %v3879_v31 = vmul.f32 -1.442695, %v1725_v10  ;;  %v3878_v1 = vmul.f32 -1.442695, %v1724_v20 }
 0x1ca   :  { %v4043_v25 = vpop.eup %4042  ;;  %v2359_v37 = vadd.f32 1.0, %v4041_v60  ;;  %v1006_v27 = vpop.permute.xlu1 %1005 }
 0x1cb   :  { %v1002_v16 = vpop.permute.xlu0 %1001  ;;  %4052 = vpow2.f32 %v3879_v31  ;;  %v1727_v32 = vsub.f32 %v807_v28, %v1006_v27  ;;  %v2358_v22 = vadd.f32 1.0, %v4043_v25 }
 0x1cc   :  { %v1726_v26 = vsub.f32 %v806_v36, %v1002_v16  ;;  %1279 = vbcast.lane.b32.xlu1 %v1265_v33, 280  ;;  %1275 = vbcast.lane.b32.xlu0 %v1265_v33, 272  ;;  %4054 = vrcp.f32 %v2359_v37 }
 0x1cd   :  { %v4045_v34 = vpop.eup %4044  ;;  %v3881_v19 = vmul.f32 -1.442695, %v1727_v32  ;;  %4056 = vpow2.f32 %v3878_v1 }
 0x1ce   :  { %v4047_v21 = vpop.eup %4046  ;;  %v2361_v24 = vadd.f32 1.0, %v4045_v34  ;;  %v3880_v29 = vmul.f32 -1.442695, %v1726_v26  ;;  %v1014_v35 = vpop.permute.xlu1 %1013  ;;  %v813_v26 = vmul.f32 %v4821_v46, %v5227_v45  ;;  %v812_v34 = vmul.f32 %v4823_v47, %v5222_v50 }
 0x1cf   :  { %v1010_v10 = vpop.permute.xlu0 %1009  ;;  %4058 = vpow2.f32 %v3881_v19  ;;  %v1729_v33 = vsub.f32 %v809_v38, %v1014_v35  ;;  %v2360_v60 = vadd.f32 1.0, %v4047_v21 }
 0x1d0   :  { %v1728_v20 = vsub.f32 %v808_v39, %v1010_v10  ;;  %4060 = vrcp.f32 %v2358_v22  ;;  %1290 = vbcast.lane.b32.xlu1 %v1284_v23, 264  ;;  %1286 = vbcast.lane.b32.xlu0 %v1284_v23, 256  ;;  %v815_v10 = vmul.f32 %v4825_v48, %v5209_v40 }
 0x1d1   :  { %v4049_v28 = vpop.eup %4048  ;;  %4062 = vrcp.f32 %v2361_v24  ;;  %v3883_v36 = vmul.f32 -1.442695, %v1729_v33  ;;  %v814_v33 = vmul.f32 %v4827_v49, %v5204_v55  ;;  %v1322_v49 = vrot.slane %v5242_v30, %v4756_v9 }
 0x1d2   :  { %v4051_v31 = vpop.eup %4050  ;;  %v2363_v25 = vadd.f32 1.0, %v4049_v28  ;;  %4064 = vpow2.f32 %v3880_v29  ;;  %v3882_v37 = vmul.f32 -1.442695, %v1728_v20  ;;  %v1025_v1 = vpop.permute.xlu1 %1024 }
 0x1d3   :  { %v1021_v27 = vpop.permute.xlu0 %1020  ;;  %4066 = vpow2.f32 %v3883_v36  ;;  %v1731_v16 = vsub.f32 %v811_v41, %v1025_v1  ;;  %v2362_v22 = vadd.f32 1.0, %v4051_v31 }
 0x1d4   :  { %v1730_v32 = vsub.f32 %v810_v42, %v1021_v27  ;;  %4068 = vrcp.f32 %v2360_v60  ;;  %1298 = vbcast.lane.b32.xlu1 %v1284_v23, 280  ;;  %1294 = vbcast.lane.b32.xlu0 %v1284_v23, 272  ;;  %v817_v27 = vmul.f32 %v4831_v51, %v5227_v45 }
 0x1d5   :  { %v4053_v44 = vpop.eup %4052  ;;  %4070 = vrcp.f32 %v2363_v25  ;;  %v3885_v38 = vmul.f32 -1.442695, %v1731_v16 }
 0x1d6   :  { %v3884_v39 = vmul.f32 -1.442695, %v1730_v32  ;;  %v2365_v19 = vadd.f32 1.0, %v4053_v44  ;;  %4072 = vpow2.f32 %v3882_v37  ;;  %v1033_v21 = vpop.permute.xlu1 %1032  ;;  %v5270_v29 = vpop.eup %4054  ;;  %v816_v32 = vmul.f32 %v4833_v52, %v5222_v50 }
 0x1d7   :  { %v1029_v24 = vpop.permute.xlu0 %1028  ;;  %4074 = vpow2.f32 %v3885_v38  ;;  %v1733_v46 = vsub.f32 %v813_v26, %v1033_v21  ;;  %v4057_v23 = vpop.eup %4056 }
 0x1d8   :  { %v1732_v35 = vsub.f32 %v812_v34, %v1029_v24  ;;  %4076 = vrcp.f32 %v2362_v22  ;;  %1309 = vbcast.lane.b32.xlu1 %v1303_v43, 264  ;;  %1305 = vbcast.lane.b32.xlu0 %v1303_v43, 256  ;;  %v2364_v20 = vadd.f32 1.0, %v4057_v23 }
 0x1d9   :  { %v4059_v47 = vpop.eup %4058  ;;  %4078 = vpow2.f32 %v3884_v39  ;;  %v3887_v60 = vmul.f32 -1.442695, %v1733_v46  ;;  %v819_v46 = vmul.f32 %v4835_v53, %v5209_v40 }
 0x1da   :  { %v5276_v28 = vpop.eup %4060  ;;  %4080 = vrcp.f32 %v2365_v19  ;;  %v2367_v41 = vadd.f32 1.0, %v4059_v47  ;;  %v3886_v42 = vmul.f32 -1.442695, %v1732_v35  ;;  %v1044_v36 = vpop.permute.xlu1 %1043  ;;  %v818_v35 = vmul.f32 %v4837_v54, %v5204_v55 }
 0x1db   :  { %v1040_v31 = vpop.permute.xlu0 %1039  ;;  %v5278_v25 = vpop.eup %4062  ;;  %4082 = vrcp.f32 %v2364_v20  ;;  %v1735_v48 = vsub.f32 %v815_v10, %v1044_v36 }
 0x1dc   :  { %6950 = vst [vmem:[#allocation125_spill] sm:$0xff] %v5278_v25  ;;  %v1734_v37 = vsub.f32 %v814_v33, %v1040_v31  ;;  %v4065_v1 = vpop.eup %4064  ;;  %4084 = vrcp.f32 %v2367_v41  ;;  %1317 = vbcast.lane.b32.xlu1 %v1303_v43, 280  ;;  %1313 = vbcast.lane.b32.xlu0 %v1303_v43, 272 }
 0x1dd   :  { %v4067_v16 = vpop.eup %4066  ;;  %v2366_v26 = vadd.f32 1.0, %v4065_v1  ;;  %4086 = vpow2.f32 %v3887_v60  ;;  %v3889_v22 = vmul.f32 -1.442695, %v1735_v48  ;;  %v821_v48 = vmul.f32 %v4841_v56, %v5227_v45 }
 0x1de   :  { %v5286_v44 = vpop.eup %4068  ;;  %v2369_v34 = vadd.f32 1.0, %v4067_v16  ;;  %4088 = vpow2.f32 %v3886_v42  ;;  %v3888_v38 = vmul.f32 -1.442695, %v1734_v37  ;;  %v1052_v39 = vpop.permute.xlu1 %1051  ;;  %v1341_v37 = vrot.slane %v5242_v30, %v4759_v11 }
 0x1df   :  { %v1048_v51 = vpop.permute.xlu0 %1047  ;;  %v5288_v19 = vpop.eup %4070  ;;  %4090 = vrcp.f32 %v2366_v26  ;;  %v1737_v43 = vsub.f32 %v817_v27, %v1052_v39  ;;  %v820_v27 = vmul.f32 %v4843_v57, %v5222_v50 }
 0x1e0   :  { %v1736_v21 = vsub.f32 %v816_v32, %v1048_v51  ;;  %v4073_v24 = vpop.eup %4072  ;;  %4092 = vrcp.f32 %v2369_v34  ;;  %1328 = vbcast.lane.b32.xlu1 %v1322_v49, 264  ;;  %1324 = vbcast.lane.b32.xlu0 %v1322_v49, 256  ;;  %v823_v51 = vmul.f32 %v4845_v58, %v5209_v40  ;;  %v825_v58 = vmul.f32 %v4851_v61, %v5227_v45 }
 0x1e1   :  { %v4075_v52 = vpop.eup %4074  ;;  %v2368_v23 = vadd.f32 1.0, %v4073_v24  ;;  %4094 = vpow2.f32 %v3889_v22  ;;  %v3891_v10 = vmul.f32 -1.442695, %v1737_v43  ;;  %v822_v43 = vmul.f32 %v4847_v59, %v5204_v55 }
 0x1e2   :  { %v5294_v47 = vpop.eup %4076  ;;  %v2371_v33 = vadd.f32 1.0, %v4075_v52  ;;  %4096 = vpow2.f32 %v3888_v38  ;;  %v1063_v20 = vpop.permute.xlu1 %1062  ;;  %v3890_v42 = vmul.f32 -1.442695, %v1736_v21 }
 0x1e3   :  { %v1059_v60 = vpop.permute.xlu0 %1058  ;;  %v4079_v41 = vpop.eup %4078  ;;  %4098 = vrcp.f32 %v2368_v23  ;;  %v1739_v53 = vsub.f32 %v819_v46, %v1063_v20 }
 0x1e4   :  { %v1738_v36 = vsub.f32 %v818_v35, %v1059_v60  ;;  %v5296_v31 = vpop.eup %4080  ;;  %4100 = vrcp.f32 %v2371_v33  ;;  %v2370_v54 = vadd.f32 1.0, %v4079_v41  ;;  %1336 = vbcast.lane.b32.xlu1 %v1322_v49, 280  ;;  %1332 = vbcast.lane.b32.xlu0 %v1322_v49, 272  ;;  %v824_v41 = vmul.f32 %v4853_v62, %v5222_v50 }
 0x1e5   :  { %6951 = vst [vmem:[#allocation126_spill] sm:$0xff] %v5296_v31  ;;  %v5302_v1 = vpop.eup %4082  ;;  %4102 = vpow2.f32 %v3891_v10  ;;  %v3893_v16 = vmul.f32 -1.442695, %v1739_v53  ;;  %v1360_v53 = vrot.slane %v5242_v30, %v4762_v13 }
 0x1e6   :  { %v3892_v32 = vmul.f32 -1.442695, %v1738_v36  ;;  %v5306_v26 = vpop.eup %4084  ;;  %4104 = vrcp.f32 %v2370_v54  ;;  %v1071_v22 = vpop.permute.xlu1 %1070 }
 0x1e7   :  { %v1067_v56 = vpop.permute.xlu0 %1066  ;;  %v4087_v34 = vpop.eup %4086  ;;  %4106 = vpow2.f32 %v3890_v42  ;;  %v1741_v38 = vsub.f32 %v821_v48, %v1071_v22 }
 0x1e8   :  { %v1740_v49 = vsub.f32 %v820_v27, %v1067_v56  ;;  %v4089_v39 = vpop.eup %4088  ;;  %v2373_v57 = vadd.f32 1.0, %v4087_v34  ;;  %4108 = vpow2.f32 %v3893_v16  ;;  %1347 = vbcast.lane.b32.xlu1 %v1341_v37, 264  ;;  %1343 = vbcast.lane.b32.xlu0 %v1341_v37, 256 }
 0x1e9   :  { %v5312_v21 = vpop.eup %4090  ;;  %v2372_v24 = vadd.f32 1.0, %v4089_v39  ;;  %4110 = vpow2.f32 %v3892_v32  ;;  %v3895_v46 = vmul.f32 -1.442695, %v1741_v38  ;;  %v826_v39 = vmul.f32 %v4857_v0, %v5204_v55 }
 0x1ea   :  { %v3894_v52 = vmul.f32 -1.442695, %v1740_v49  ;;  %v5314_v35 = vpop.eup %4092  ;;  %4112 = vrcp.f32 %v2373_v57  ;;  %v1082_v23 = vpop.permute.xlu1 %1081  ;;  %v827_v49 = vmul.f32 %v4855_v63, %v5209_v40  ;;  %v1379_v0 = vrot.slane %v5242_v30, %v4765_v15 }
 0x1eb   :  { %6952 = vst [vmem:[#allocation127_spill] sm:$0xff] %v5314_v35  ;;  %v1078_v10 = vpop.permute.xlu0 %1077  ;;  %v4095_v33 = vpop.eup %4094  ;;  %4114 = vrcp.f32 %v2372_v24  ;;  %v1743_v59 = vsub.f32 %v823_v51, %v1082_v23 }
 0x1ec   :  { %v1742_v20 = vsub.f32 %v822_v43, %v1078_v10  ;;  %v4097_v60 = vpop.eup %4096  ;;  %v2375_v42 = vadd.f32 1.0, %v4095_v33  ;;  %4116 = vpow2.f32 %v3895_v46  ;;  %1355 = vbcast.lane.b32.xlu1 %v1341_v37, 280  ;;  %1351 = vbcast.lane.b32.xlu0 %v1341_v37, 272 }
 0x1ed   :  { %v5322_v36 = vpop.eup %4098  ;;  %v2374_v48 = vadd.f32 1.0, %v4097_v60  ;;  %4118 = vpow2.f32 %v3894_v52  ;;  %v3897_v54 = vmul.f32 -1.442695, %v1743_v59  ;;  %v829_v60 = vmul.f32 %v4861_v2, %v5227_v45 }
 0x1ee   :  { %6953 = vst [vmem:[#allocation128_spill] sm:$0xff] %v5322_v36  ;;  %v3896_v61 = vmul.f32 -1.442695, %v1742_v20  ;;  %v5324_v27 = vpop.eup %4100  ;;  %4120 = vrcp.f32 %v2375_v42  ;;  %v1090_v16 = vpop.permute.xlu1 %1089 }
 0x1ef   :  { %6954 = vst [vmem:[#allocation129_spill] sm:$0xff] %v5324_v27  ;;  %v1086_v32 = vpop.permute.xlu0 %1085  ;;  %v4103_v22 = vpop.eup %4102  ;;  %4122 = vrcp.f32 %v2374_v48  ;;  %v1745_v62 = vsub.f32 %v825_v58, %v1090_v16 }
 0x1f0   :  { %v1744_v56 = vsub.f32 %v824_v41, %v1086_v32  ;;  %v5326_v34 = vpop.eup %4104  ;;  %v2377_v37 = vadd.f32 1.0, %v4103_v22  ;;  %4124 = vpow2.f32 %v3897_v54  ;;  %1366 = vbcast.lane.b32.xlu1 %v1360_v53, 264  ;;  %1362 = vbcast.lane.b32.xlu0 %v1360_v53, 256  ;;  %v828_v41 = vmul.f32 %v4863_v4, %v5222_v50 }
 0x1f1   :  { %6955 = vst [vmem:[#allocation130_spill] sm:$0xff] %v5326_v34  ;;  %v4107_v38 = vpop.eup %4106  ;;  %4126 = vpow2.f32 %v3896_v61  ;;  %v3899_v51 = vmul.f32 -1.442695, %v1745_v62  ;;  %v831_v4 = vmul.f32 %v4865_v6, %v5209_v40  ;;  %v1398_v6 = vrot.slane %v5242_v30, %v4768_v17 }
 0x1f2   :  { %v4109_v43 = vpop.eup %4108  ;;  %4128 = vrcp.f32 %v2377_v37  ;;  %v2376_v57 = vadd.f32 1.0, %v4107_v38  ;;  %v3898_v24 = vmul.f32 -1.442695, %v1744_v56  ;;  %v1101_v46 = vpop.permute.xlu1 %1100  ;;  %v830_v38 = vmul.f32 %v4867_v8, %v5204_v55 }
 0x1f3   :  { %v1097_v52 = vpop.permute.xlu0 %1096  ;;  %v4111_v23 = vpop.eup %4110  ;;  %v2379_v10 = vadd.f32 1.0, %v4109_v43  ;;  %4130 = vpow2.f32 %v3899_v51  ;;  %v1747_v33 = vsub.f32 %v827_v49, %v1101_v46 }
 0x1f4   :  { %v1746_v58 = vsub.f32 %v826_v39, %v1097_v52  ;;  %v5332_v59 = vpop.eup %4112  ;;  %4132 = vrcp.f32 %v2376_v57  ;;  %v2378_v63 = vadd.f32 1.0, %v4111_v23  ;;  %1374 = vbcast.lane.b32.xlu1 %v1360_v53, 280  ;;  %1370 = vbcast.lane.b32.xlu0 %v1360_v53, 272 }
 0x1f5   :  { %6956 = vst [vmem:[#allocation131_spill] sm:$0xff] %v5332_v59  ;;  %v5336_v20 = vpop.eup %4114  ;;  %4134 = vrcp.f32 %v2379_v10  ;;  %v3901_v42 = vmul.f32 -1.442695, %v1747_v33 }
 0x1f6   :  { %6957 = vst [vmem:[#allocation132_spill] sm:$0xff] %v5336_v20  ;;  %v4117_v48 = vpop.eup %4116  ;;  %4136 = vrcp.f32 %v2378_v63  ;;  %v3900_v54 = vmul.f32 -1.442695, %v1746_v58  ;;  %v1109_v61 = vpop.permute.xlu1 %1108  ;;  %v833_v58 = vmul.f32 %v4871_v12, %v5227_v45  ;;  %v832_v63 = vmul.f32 %v4873_v14, %v5222_v50 }
 0x1f7   :  { %v1105_v16 = vpop.permute.xlu0 %1104  ;;  %v4119_v32 = vpop.eup %4118  ;;  %v2381_v53 = vadd.f32 1.0, %v4117_v48  ;;  %4138 = vpow2.f32 %v3898_v24  ;;  %v1749_v22 = vsub.f32 %v829_v60, %v1109_v61  ;;  %v835_v14 = vmul.f32 %v4880_v18, %v5209_v40 }
 0x1f8   :  { %v1748_v62 = vsub.f32 %v828_v41, %v1105_v16  ;;  %v5342_v56 = vpop.eup %4120  ;;  %v2380_v37 = vadd.f32 1.0, %v4119_v32  ;;  %4140 = vpow2.f32 %v3901_v42  ;;  %1385 = vbcast.lane.b32.xlu1 %v1379_v0, 264  ;;  %1381 = vbcast.lane.b32.xlu0 %v1379_v0, 256 }
 0x1f9   :  { %6958 = vst [vmem:[#allocation133_spill] sm:$0xff] %v5342_v56  ;;  %v5344_v2 = vpop.eup %4122  ;;  %4142 = vrcp.f32 %v2381_v53  ;;  %v3903_v49 = vmul.f32 -1.442695, %v1749_v22  ;;  %v6964_v53 = vld [vmem:[#allocation2_spill] sm:$0xff] }
 0x1fa   :  { %6959 = vst [vmem:[#allocation134_spill] sm:$0xff] %v5344_v2  ;;  %v4125_v39 = vpop.eup %4124  ;;  %4144 = vrcp.f32 %v2380_v37  ;;  %v3902_v51 = vmul.f32 -1.442695, %v1748_v62  ;;  %v1120_v43 = vpop.permute.xlu1 %1119  ;;  %v834_v22 = vmul.f32 %v6964_v53, %v5204_v55  ;;  %v5371_v37 = vld [vmem:[%s6819_s2 + $0x18] sm:$0xff] }
 0x1fb   :  { %v1116_v57 = vpop.permute.xlu0 %1115  ;;  %v4127_v24 = vpop.eup %4126  ;;  %v2383_v46 = vadd.f32 1.0, %v4125_v39  ;;  %4146 = vpow2.f32 %v3900_v54  ;;  %v1751_v52 = vsub.f32 %v831_v4, %v1120_v43 }
 0x1fc   :  { %v1750_v23 = vsub.f32 %v830_v38, %v1116_v57  ;;  %v5350_v10 = vpop.eup %4128  ;;  %v2382_v33 = vadd.f32 1.0, %v4127_v24  ;;  %4148 = vpow2.f32 %v3903_v49  ;;  %1393 = vbcast.lane.b32.xlu1 %v1379_v0, 280  ;;  %1389 = vbcast.lane.b32.xlu0 %v1379_v0, 272 }
 0x1fd   :  { %6960 = vst [vmem:[#allocation135_spill] sm:$0xff] %v5350_v10  ;;  %v4131_v8 = vpop.eup %4130  ;;  %4150 = vrcp.f32 %v2383_v46  ;;  %v3905_v60 = vmul.f32 -1.442695, %v1751_v52  ;;  %v1417_v52 = vrot.slane %v5371_v37, %v4747_v3 }
 0x1fe   :  { %v5358_v41 = vpop.eup %4132  ;;  %4152 = vrcp.f32 %v2382_v33  ;;  %v2385_v42 = vadd.f32 1.0, %v4131_v8  ;;  %v3904_v48 = vmul.f32 -1.442695, %v1750_v23  ;;  %v1128_v54 = vpop.permute.xlu1 %1127  ;;  %v6967_v33 = vld [vmem:[#allocation3_spill] sm:$0xff] }
 0x1ff   :  { %6961 = vst [vmem:[#allocation136_spill] sm:$0xff] %v5358_v41  ;;  %v1124_v61 = vpop.permute.xlu0 %1123  ;;  %v5360_v0 = vpop.eup %4134  ;;  %4154 = vpow2.f32 %v3902_v51  ;;  %v1753_v30 = vsub.f32 %v833_v58, %v1128_v54  ;;  %v837_v8 = vmul.f32 %v6967_v33, %v5227_v45  ;;  %v6968_v58 = vld [vmem:[#allocation4_spill] sm:$0xff] }
 0x200   :  { %6962 = vst [vmem:[#allocation137_spill] sm:$0xff] %v5360_v0  ;;  %v1752_v16 = vsub.f32 %v832_v63, %v1124_v61  ;;  %v5362_v32 = vpop.eup %4136  ;;  %4156 = vrcp.f32 %v2385_v42  ;;  %1404 = vbcast.lane.b32.xlu1 %v1398_v6, 264  ;;  %1400 = vbcast.lane.b32.xlu0 %v1398_v6, 256  ;;  %v836_v63 = vmul.f32 %v6968_v58, %v5222_v50 }
 0x201   :  { %6963 = vst [vmem:[#allocation138_spill] sm:$0xff] %v5362_v32  ;;  %v4139_v12 = vpop.eup %4138  ;;  %4158 = vpow2.f32 %v3905_v60  ;;  %v3907_v62 = vmul.f32 -1.442695, %v1753_v30 }
 0x202   :  { %v4141_v4 = vpop.eup %4140  ;;  %v2384_v38 = vadd.f32 1.0, %v4139_v12  ;;  %4160 = vpow2.f32 %v3904_v48  ;;  %v3906_v49 = vmul.f32 -1.442695, %v1752_v16  ;;  %v1139_v39 = vpop.permute.xlu1 %1138 }
 0x203   :  { %v1135_v51 = vpop.permute.xlu0 %1134  ;;  %v5373_v43 = vpop.eup %4142  ;;  %v2387_v57 = vadd.f32 1.0, %v4141_v4  ;;  %4162 = vpow2.f32 %v3907_v62  ;;  %v1755_v18 = vsub.f32 %v835_v14, %v1139_v39 }
 0x204   :  { %6965 = vst [vmem:[#allocation2_spill] sm:$0xff] %v5373_v43  ;;  %v1754_v24 = vsub.f32 %v834_v22, %v1135_v51  ;;  %v5375_v46 = vpop.eup %4144  ;;  %4164 = vrcp.f32 %v2384_v38  ;;  %1412 = vbcast.lane.b32.xlu1 %v1398_v6, 280  ;;  %1408 = vbcast.lane.b32.xlu0 %v1398_v6, 272  ;;  %v6971_v22 = vld [vmem:[#allocation5_spill] sm:$0xff]  ;;  %v6972_v38 = vld [vmem:[#allocation6_spill] sm:$0xff] }
 0x205   :  { %6966 = vst [vmem:[#allocation139_spill] sm:$0xff] %v5375_v46  ;;  %v4147_v23 = vpop.eup %4146  ;;  %4166 = vrcp.f32 %v2387_v57  ;;  %v3909_v60 = vmul.f32 -1.442695, %v1755_v18  ;;  %v839_v62 = vmul.f32 %v6971_v22, %v5209_v40 }
 0x206   :  { %v4149_v42 = vpop.eup %4148  ;;  %v2386_v48 = vadd.f32 1.0, %v4147_v23  ;;  %4168 = vpow2.f32 %v3906_v49  ;;  %v3908_v54 = vmul.f32 -1.442695, %v1754_v24  ;;  %v1147_v61 = vpop.permute.xlu1 %1146  ;;  %v838_v49 = vmul.f32 %v6972_v38, %v5204_v55 }
 0x207   :  { %v1143_v30 = vpop.permute.xlu0 %1142  ;;  %v5383_v16 = vpop.eup %4150  ;;  %v2389_v6 = vadd.f32 1.0, %v4149_v42  ;;  %4170 = vpow2.f32 %v3909_v60  ;;  %v1757_v12 = vsub.f32 %v837_v8, %v1147_v61  ;;  %v6974_v60 = vld [vmem:[#allocation7_spill] sm:$0xff]  ;;  %v1436_v61 = vrot.slane %v5371_v37, %v4750_v5 }
 0x208   :  { %6969 = vst [vmem:[#allocation3_spill] sm:$0xff] %v5383_v16  ;;  %v1756_v14 = vsub.f32 %v836_v63, %v1143_v30  ;;  %v5385_v53 = vpop.eup %4152  ;;  %4172 = vrcp.f32 %v2386_v48  ;;  %1423 = vbcast.lane.b32.xlu1 %v1417_v52, 264  ;;  %1419 = vbcast.lane.b32.xlu0 %v1417_v52, 256  ;;  %v841_v42 = vmul.f32 %v6974_v60, %v5227_v45 }
 0x209   :  { %6970 = vst [vmem:[#allocation4_spill] sm:$0xff] %v5385_v53  ;;  %v4155_v4 = vpop.eup %4154  ;;  %4174 = vrcp.f32 %v2389_v6  ;;  %v3911_v39 = vmul.f32 -1.442695, %v1757_v12 }
 0x20a   :  { %v3910_v51 = vmul.f32 -1.442695, %v1756_v14  ;;  %v5391_v57 = vpop.eup %4156  ;;  %v2388_v18 = vadd.f32 1.0, %v4155_v4  ;;  %4176 = vpow2.f32 %v3908_v54  ;;  %v1158_v24 = vpop.permute.xlu1 %1157  ;;  %v6975_v54 = vld [vmem:[#allocation8_spill] sm:$0xff] }
 0x20b   :  { %6973 = vst [vmem:[#allocation5_spill] sm:$0xff] %v5391_v57  ;;  %v1154_v23 = vpop.permute.xlu0 %1153  ;;  %v4159_v33 = vpop.eup %4158  ;;  %4178 = vpow2.f32 %v3911_v39  ;;  %v1759_v8 = vsub.f32 %v839_v62, %v1158_v24  ;;  %v840_v6 = vmul.f32 %v6975_v54, %v5222_v50 }
 0x20c   :  { %v1758_v58 = vsub.f32 %v838_v49, %v1154_v23  ;;  %v4161_v63 = vpop.eup %4160  ;;  %4180 = vrcp.f32 %v2388_v18  ;;  %v2391_v48 = vadd.f32 1.0, %v4159_v33  ;;  %1431 = vbcast.lane.b32.xlu1 %v1417_v52, 280  ;;  %1427 = vbcast.lane.b32.xlu0 %v1417_v52, 272  ;;  %v6978_v23 = vld [vmem:[#allocation9_spill] sm:$0xff] }
 0x20d   :  { %v4163_v30 = vpop.eup %4162  ;;  %v2390_v12 = vadd.f32 1.0, %v4161_v63  ;;  %4182 = vpow2.f32 %v3910_v51  ;;  %v3913_v14 = vmul.f32 -1.442695, %v1759_v8  ;;  %v843_v33 = vmul.f32 %v6978_v23, %v5209_v40  ;;  %v6979_v8 = vld [vmem:[#allocation10_spill] sm:$0xff]  ;;  %v6982_v23 = vld [vmem:[#allocation11_spill] sm:$0xff] }
 0x20e   :  { %v5399_v22 = vpop.eup %4164  ;;  %4184 = vrcp.f32 %v2391_v48  ;;  %v2393_v62 = vadd.f32 1.0, %v4163_v30  ;;  %v3912_v4 = vmul.f32 -1.442695, %v1758_v58  ;;  %v1166_v38 = vpop.permute.xlu1 %1165  ;;  %v842_v63 = vmul.f32 %v6979_v8, %v5204_v55 }
 0x20f   :  { %6976 = vst [vmem:[#allocation6_spill] sm:$0xff] %v5399_v22  ;;  %v1162_v49 = vpop.permute.xlu0 %1161  ;;  %v5401_v39 = vpop.eup %4166  ;;  %4186 = vrcp.f32 %v2390_v12  ;;  %v1761_v52 = vsub.f32 %v841_v42, %v1166_v38  ;;  %v845_v57 = vmul.f32 %v6982_v23, %v5227_v45  ;;  %v6991_v22 = vld [vmem:[#allocation18_spill] sm:$0xff] }
 0x210   :  { %6977 = vst [vmem:[#allocation7_spill] sm:$0xff] %v5401_v39  ;;  %v1760_v18 = vsub.f32 %v840_v6, %v1162_v49  ;;  %v4169_v24 = vpop.eup %4168  ;;  %4188 = vrcp.f32 %v2393_v62  ;;  %1442 = vbcast.lane.b32.xlu1 %v1436_v61, 264  ;;  %1438 = vbcast.lane.b32.xlu0 %v1436_v61, 256 }
 0x211   :  { %v4171_v51 = vpop.eup %4170  ;;  %v2392_v60 = vadd.f32 1.0, %v4169_v24  ;;  %4190 = vpow2.f32 %v3913_v14  ;;  %v3915_v58 = vmul.f32 -1.442695, %v1761_v52  ;;  %v1455_v14 = vrot.slane %v5371_v37, %v4753_v7 }
 0x212   :  { %v5407_v48 = vpop.eup %4172  ;;  %v2395_v30 = vadd.f32 1.0, %v4171_v51  ;;  %4192 = vpow2.f32 %v3912_v4  ;;  %v3914_v42 = vmul.f32 -1.442695, %v1760_v18  ;;  %v1177_v54 = vpop.permute.xlu1 %1176  ;;  %v6983_v4 = vld [vmem:[#allocation12_spill] sm:$0xff] }
 0x213   :  { %6980 = vst [vmem:[#allocation8_spill] sm:$0xff] %v5407_v48  ;;  %v1173_v6 = vpop.permute.xlu0 %1172  ;;  %v5409_v12 = vpop.eup %4174  ;;  %4194 = vrcp.f32 %v2392_v60  ;;  %v1763_v62 = vsub.f32 %v843_v33, %v1177_v54  ;;  %v844_v18 = vmul.f32 %v6983_v4, %v5222_v50  ;;  %v850_v48 = vmul.f32 %v6991_v22, %v5204_v55 }
 0x214   :  { %6981 = vst [vmem:[#allocation9_spill] sm:$0xff] %v5409_v12  ;;  %v1762_v38 = vsub.f32 %v842_v63, %v1173_v6  ;;  %v4177_v49 = vpop.eup %4176  ;;  %4196 = vrcp.f32 %v2395_v30  ;;  %1450 = vbcast.lane.b32.xlu1 %v1436_v61, 280  ;;  %1446 = vbcast.lane.b32.xlu0 %v1436_v61, 272  ;;  %v6985_v12 = vld [vmem:[#allocation13_spill] sm:$0xff] }
 0x215   :  { %v4179_v52 = vpop.eup %4178  ;;  %v2394_v24 = vadd.f32 1.0, %v4177_v49  ;;  %4198 = vpow2.f32 %v3915_v58  ;;  %v3917_v51 = vmul.f32 -1.442695, %v1763_v62  ;;  %v847_v43 = vmul.f32 %v6985_v12, %v5209_v40  ;;  %v6988_v12 = vld [vmem:[#allocation15_spill] sm:$0xff] }
 0x216   :  { %v5417_v8 = vpop.eup %4180  ;;  %v2397_v33 = vadd.f32 1.0, %v4179_v52  ;;  %4200 = vpow2.f32 %v3914_v42  ;;  %v1185_v63 = vpop.permute.xlu1 %1184  ;;  %v3916_v30 = vmul.f32 -1.442695, %v1762_v38  ;;  %v6986_v42 = vld [vmem:[#allocation14_spill] sm:$0xff] }
 0x217   :  { %6984 = vst [vmem:[#allocation10_spill] sm:$0xff] %v5417_v8  ;;  %v1181_v60 = vpop.permute.xlu0 %1180  ;;  %v4183_v54 = vpop.eup %4182  ;;  %4202 = vrcp.f32 %v2394_v24  ;;  %v1765_v61 = vsub.f32 %v845_v57, %v1185_v63  ;;  %v846_v62 = vmul.f32 %v6986_v42, %v5204_v55  ;;  %v6989_v8 = vld [vmem:[#allocation16_spill] sm:$0xff] }
 0x218   :  { %v1764_v6 = vsub.f32 %v844_v18, %v1181_v60  ;;  %v5419_v23 = vpop.eup %4184  ;;  %4204 = vrcp.f32 %v2397_v33  ;;  %v2396_v49 = vadd.f32 1.0, %v4183_v54  ;;  %1461 = vbcast.lane.b32.xlu1 %v1455_v14, 264  ;;  %1457 = vbcast.lane.b32.xlu0 %v1455_v14, 256  ;;  %v849_v33 = vmul.f32 %v6988_v12, %v5227_v45 }
 0x219   :  { %v5423_v58 = vpop.eup %4186  ;;  %4206 = vpow2.f32 %v3917_v51  ;;  %v3919_v52 = vmul.f32 -1.442695, %v1765_v61  ;;  %v848_v10 = vmul.f32 %v6989_v8, %v5222_v50  ;;  %v1474_v51 = vrot.slane %v5371_v37, %v4756_v9 }
 0x21a   :  { %v3918_v4 = vmul.f32 -1.442695, %v1764_v6  ;;  %v5427_v38 = vpop.eup %4188  ;;  %4208 = vrcp.f32 %v2396_v49  ;;  %v1196_v57 = vpop.permute.xlu1 %1195 }
 0x21b   :  { %6987 = vst [vmem:[#allocation11_spill] sm:$0xff] %v5427_v38  ;;  %v1192_v18 = vpop.permute.xlu0 %1191  ;;  %v4191_v24 = vpop.eup %4190  ;;  %4210 = vpow2.f32 %v3916_v30  ;;  %v1767_v63 = vsub.f32 %v847_v43, %v1196_v57 }
 0x21c   :  { %v1766_v60 = vsub.f32 %v846_v62, %v1192_v18  ;;  %v4193_v54 = vpop.eup %4192  ;;  %v2399_v42 = vadd.f32 1.0, %v4191_v24  ;;  %4212 = vpow2.f32 %v3919_v52  ;;  %1469 = vbcast.lane.b32.xlu1 %v1455_v14, 280  ;;  %1465 = vbcast.lane.b32.xlu0 %v1455_v14, 272  ;;  %v6990_v14 = vld [vmem:[#allocation17_spill] sm:$0xff] }
 0x21d   :  { %v5435_v61 = vpop.eup %4194  ;;  %v2398_v6 = vadd.f32 1.0, %v4193_v54  ;;  %4214 = vpow2.f32 %v3918_v4  ;;  %v3921_v49 = vmul.f32 -1.442695, %v1767_v63  ;;  %v851_v24 = vmul.f32 %v6990_v14, %v5209_v40 }
 0x21e   :  { %v3920_v12 = vmul.f32 -1.442695, %v1766_v60  ;;  %v5437_v30 = vpop.eup %4196  ;;  %4216 = vrcp.f32 %v2399_v42  ;;  %v1204_v43 = vpop.permute.xlu1 %1203 }
 0x21f   :  { %v1200_v62 = vpop.permute.xlu0 %1199  ;;  %v4199_v57 = vpop.eup %4198  ;;  %4218 = vrcp.f32 %v2398_v6  ;;  %v1769_v8 = vsub.f32 %v849_v33, %v1204_v43 }
 0x220   :  { %v1768_v52 = vsub.f32 %v848_v10, %v1200_v62  ;;  %v4201_v18 = vpop.eup %4200  ;;  %v2401_v54 = vadd.f32 1.0, %v4199_v57  ;;  %4220 = vpow2.f32 %v3921_v49  ;;  %1480 = vbcast.lane.b32.xlu1 %v1474_v51, 264  ;;  %1476 = vbcast.lane.b32.xlu0 %v1474_v51, 256  ;;  %v1493_v49 = vrot.slane %v5371_v37, %v4759_v11  ;;  %v6993_v57 = vld [vmem:[#allocation19_spill] sm:$0xff] }
 0x221   :  { %v5443_v4 = vpop.eup %4202  ;;  %v2400_v63 = vadd.f32 1.0, %v4201_v18  ;;  %4222 = vpow2.f32 %v3920_v12  ;;  %v3923_v60 = vmul.f32 -1.442695, %v1769_v8  ;;  %v853_v8 = vmul.f32 %v6993_v57, %v5227_v45 }
 0x222   :  { %v3922_v42 = vmul.f32 -1.442695, %v1768_v52  ;;  %v5445_v6 = vpop.eup %4204  ;;  %4224 = vrcp.f32 %v2401_v54  ;;  %v1215_v10 = vpop.permute.xlu1 %1214  ;;  %v6994_v52 = vld [vmem:[#allocation20_spill] sm:$0xff] }
 0x223   :  { %6992 = vst [vmem:[#allocation12_spill] sm:$0xff] %v5445_v6  ;;  %v1211_v33 = vpop.permute.xlu0 %1210  ;;  %v4207_v43 = vpop.eup %4206  ;;  %4226 = vrcp.f32 %v2400_v63  ;;  %v1771_v40 = vsub.f32 %v851_v24, %v1215_v10  ;;  %v852_v18 = vmul.f32 %v6994_v52, %v5222_v50 }
 0x224   :  { %v1770_v62 = vsub.f32 %v850_v48, %v1211_v33  ;;  %v5447_v55 = vpop.eup %4208  ;;  %v2403_v22 = vadd.f32 1.0, %v4207_v43  ;;  %4228 = vpow2.f32 %v3923_v60  ;;  %1488 = vbcast.lane.b32.xlu1 %v1474_v51, 280  ;;  %1484 = vbcast.lane.b32.xlu0 %v1474_v51, 272 }
 0x225   :  { %v4211_v12 = vpop.eup %4210  ;;  %4230 = vpow2.f32 %v3922_v42  ;;  %v3925_v14 = vmul.f32 -1.442695, %v1771_v40  ;;  %v5462_v42 = vld [vmem:[%s6820_s0 + $0x8] sm:$0xff]  ;;  %v6995_v40 = vld [vmem:[#allocation21_spill] sm:$0xff] }
 0x226   :  { %v4213_v24 = vpop.eup %4212  ;;  %4232 = vrcp.f32 %v2403_v22  ;;  %v2402_v48 = vadd.f32 1.0, %v4211_v12  ;;  %v3924_v54 = vmul.f32 -1.442695, %v1770_v62  ;;  %v1223_v63 = vpop.permute.xlu1 %1222  ;;  %v855_v62 = vmul.f32 %v5462_v42, %v6995_v40  ;;  %v5469_v22 = vld [vmem:[%s6820_s0] sm:$0xff] }
 0x227   :  { %v1219_v60 = vpop.permute.xlu0 %1218  ;;  %v4215_v10 = vpop.eup %4214  ;;  %v2405_v51 = vadd.f32 1.0, %v4213_v24  ;;  %4234 = vpow2.f32 %v3925_v14  ;;  %v1773_v33 = vsub.f32 %v853_v8, %v1223_v63  ;;  %v6996_v12 = vld [vmem:[#allocation22_spill] sm:$0xff] }
 0x228   :  { %v1772_v43 = vsub.f32 %v852_v18, %v1219_v60  ;;  %v5455_v39 = vpop.eup %4216  ;;  %4236 = vrcp.f32 %v2402_v48  ;;  %v2404_v45 = vadd.f32 1.0, %v4215_v10  ;;  %1499 = vbcast.lane.b32.xlu1 %v1493_v49, 264  ;;  %1495 = vbcast.lane.b32.xlu0 %v1493_v49, 256  ;;  %v854_v57 = vmul.f32 %v5469_v22, %v6996_v12  ;;  %v7000_v12 = vld [vmem:[#allocation24_spill] sm:$0xff] }
 0x229   :  { %v5457_v50 = vpop.eup %4218  ;;  %4238 = vrcp.f32 %v2405_v51  ;;  %v3927_v8 = vmul.f32 -1.442695, %v1773_v33  ;;  %v1512_v51 = vrot.slane %v5371_v37, %v4762_v13 }
 0x22a   :  { %v4221_v52 = vpop.eup %4220  ;;  %4240 = vrcp.f32 %v2404_v45  ;;  %v3926_v18 = vmul.f32 -1.442695, %v1772_v43  ;;  %v1234_v14 = vpop.permute.xlu1 %1233  ;;  %v5482_v43 = vld [vmem:[%s6820_s0 + $0x18] sm:$0xff]  ;;  %v6999_v45 = vld [vmem:[#allocation23_spill] sm:$0xff] }
 0x22b   :  { %v1230_v24 = vpop.permute.xlu0 %1229  ;;  %v4223_v48 = vpop.eup %4222  ;;  %v2407_v63 = vadd.f32 1.0, %v4221_v52  ;;  %4242 = vpow2.f32 %v3924_v54  ;;  %v1775_v60 = vsub.f32 %v855_v62, %v1234_v14  ;;  %v857_v54 = vmul.f32 %v5482_v43, %v6999_v45  ;;  %v5489_v62 = vld [vmem:[%s6820_s0 + $0x10] sm:$0xff] }
 0x22c   :  { %v1774_v10 = vsub.f32 %v854_v57, %v1230_v24  ;;  %v5473_v40 = vpop.eup %4224  ;;  %v2406_v59 = vadd.f32 1.0, %v4223_v48  ;;  %4244 = vpow2.f32 %v3927_v8  ;;  %1507 = vbcast.lane.b32.xlu1 %v1493_v49, 280  ;;  %1503 = vbcast.lane.b32.xlu0 %v1493_v49, 272  ;;  %v856_v49 = vmul.f32 %v5489_v62, %v7000_v12  ;;  %v7002_v12 = vld [vmem:[#allocation25_spill] sm:$0xff] }
 0x22d   :  { %6997 = vst [vmem:[#allocation13_spill] sm:$0xff] %v5473_v40  ;;  %v5477_v33 = vpop.eup %4226  ;;  %4246 = vrcp.f32 %v2407_v63  ;;  %v3929_v57 = vmul.f32 -1.442695, %v1775_v60  ;;  %v859_v63 = vmul.f32 %v5462_v42, %v7002_v12  ;;  %v7003_v60 = vld [vmem:[#allocation26_spill] sm:$0xff]  ;;  %v7007_v12 = vld [vmem:[#allocation27_spill] sm:$0xff] }
 0x22e   :  { %6998 = vst [vmem:[#allocation14_spill] sm:$0xff] %v5477_v33  ;;  %v4229_v8 = vpop.eup %4228  ;;  %4248 = vrcp.f32 %v2406_v59  ;;  %v3928_v52 = vmul.f32 -1.442695, %v1774_v10  ;;  %v1242_v14 = vpop.permute.xlu1 %1241  ;;  %v858_v59 = vmul.f32 %v5469_v22, %v7003_v60 }
 0x22f   :  { %v1238_v24 = vpop.permute.xlu0 %1237  ;;  %v4231_v48 = vpop.eup %4230  ;;  %v2409_v46 = vadd.f32 1.0, %v4229_v8  ;;  %4250 = vpow2.f32 %v3926_v18  ;;  %v1777_v53 = vsub.f32 %v857_v54, %v1242_v14 }
 0x230   :  { %v1776_v45 = vsub.f32 %v856_v49, %v1238_v24  ;;  %v5493_v16 = vpop.eup %4232  ;;  %v2408_v40 = vadd.f32 1.0, %v4231_v48  ;;  %4252 = vpow2.f32 %v3929_v57  ;;  %1518 = vbcast.lane.b32.xlu1 %v1512_v51, 264  ;;  %1514 = vbcast.lane.b32.xlu0 %v1512_v51, 256 }
 0x231   :  { %7001 = vst [vmem:[#allocation15_spill] sm:$0xff] %v5493_v16  ;;  %v4235_v35 = vpop.eup %4234  ;;  %4254 = vrcp.f32 %v2409_v46  ;;  %v3931_v10 = vmul.f32 -1.442695, %v1777_v53  ;;  %v1531_v46 = vrot.slane %v5371_v37, %v4765_v15  ;;  %v7110_v16 = vld [vmem:[#allocation87_spill] sm:$0xff] }
 0x232   :  { %v5499_v41 = vpop.eup %4236  ;;  %4256 = vrcp.f32 %v2408_v40  ;;  %v2411_v18 = vadd.f32 1.0, %v4235_v35  ;;  %v3930_v54 = vmul.f32 -1.442695, %v1776_v45  ;;  %v1253_v49 = vpop.permute.xlu1 %1252  ;;  %v861_v35 = vmul.f32 %v5482_v43, %v7007_v12  ;;  %v7008_v40 = vld [vmem:[#allocation28_spill] sm:$0xff] }
 0x233   :  { %7004 = vst [vmem:[#allocation16_spill] sm:$0xff] %v5499_v41  ;;  %v1249_v8 = vpop.permute.xlu0 %1248  ;;  %v5501_v14 = vpop.eup %4238  ;;  %4258 = vpow2.f32 %v3928_v52  ;;  %v1779_v57 = vsub.f32 %v859_v63, %v1253_v49  ;;  %v860_v45 = vmul.f32 %v5489_v62, %v7008_v40 }
 0x234   :  { %7005 = vst [vmem:[#allocation17_spill] sm:$0xff] %v5501_v14  ;;  %v1778_v24 = vsub.f32 %v858_v59, %v1249_v8  ;;  %v5503_v48 = vpop.eup %4240  ;;  %4260 = vrcp.f32 %v2411_v18  ;;  %1526 = vbcast.lane.b32.xlu1 %v1512_v51, 280  ;;  %1522 = vbcast.lane.b32.xlu0 %v1512_v51, 272 }
 0x235   :  { %7006 = vst [vmem:[#allocation18_spill] sm:$0xff] %v5503_v48  ;;  %v4243_v53 = vpop.eup %4242  ;;  %4262 = vpow2.f32 %v3931_v10  ;;  %v3933_v60 = vmul.f32 -1.442695, %v1779_v57  ;;  %v7011_v10 = vld [vmem:[#allocation29_spill] sm:$0xff] }
 0x236   :  { %v4245_v52 = vpop.eup %4244  ;;  %v2410_v63 = vadd.f32 1.0, %v4243_v53  ;;  %4264 = vpow2.f32 %v3930_v54  ;;  %v3932_v59 = vmul.f32 -1.442695, %v1778_v24  ;;  %v1261_v49 = vpop.permute.xlu1 %1260  ;;  %v863_v57 = vmul.f32 %v5462_v42, %v7011_v10  ;;  %v7012_v53 = vld [vmem:[#allocation30_spill] sm:$0xff]  ;;  %v7015_v10 = vld [vmem:[#allocation31_spill] sm:$0xff] }
 0x237   :  { %v1257_v18 = vpop.permute.xlu0 %1256  ;;  %v5511_v8 = vpop.eup %4246  ;;  %v2413_v51 = vadd.f32 1.0, %v4245_v52  ;;  %4266 = vpow2.f32 %v3933_v60  ;;  %v1781_v14 = vsub.f32 %v861_v35, %v1261_v49  ;;  %v862_v54 = vmul.f32 %v5469_v22, %v7012_v53 }
 0x238   :  { %7009 = vst [vmem:[#allocation19_spill] sm:$0xff] %v5511_v8  ;;  %v1780_v32 = vsub.f32 %v860_v45, %v1257_v18  ;;  %v5513_v0 = vpop.eup %4248  ;;  %4268 = vrcp.f32 %v2410_v63  ;;  %1537 = vbcast.lane.b32.xlu1 %v1531_v46, 264  ;;  %1533 = vbcast.lane.b32.xlu0 %v1531_v46, 256  ;;  %v865_v48 = vmul.f32 %v5482_v43, %v7015_v10  ;;  %v7018_v10 = vld [vmem:[#allocation33_spill] sm:$0xff] }
 0x239   :  { %7010 = vst [vmem:[#allocation20_spill] sm:$0xff] %v5513_v0  ;;  %v4251_v12 = vpop.eup %4250  ;;  %4270 = vrcp.f32 %v2413_v51  ;;  %v3935_v24 = vmul.f32 -1.442695, %v1781_v14  ;;  %v1550_v14 = vrot.slane %v5371_v37, %v4768_v17  ;;  %v867_v37 = vmul.f32 %v5462_v42, %v7018_v10 }
 0x23a   :  { %v4253_v40 = vpop.eup %4252  ;;  %v2412_v6 = vadd.f32 1.0, %v4251_v12  ;;  %4272 = vpow2.f32 %v3932_v59  ;;  %v3934_v60 = vmul.f32 -1.442695, %v1780_v32  ;;  %v1272_v35 = vpop.permute.xlu1 %1271  ;;  %v7016_v59 = vld [vmem:[#allocation32_spill] sm:$0xff] }
 0x23b   :  { %v1268_v45 = vpop.permute.xlu0 %1267  ;;  %v5519_v52 = vpop.eup %4254  ;;  %v2415_v63 = vadd.f32 1.0, %v4253_v40  ;;  %4274 = vpow2.f32 %v3935_v24  ;;  %v1783_v49 = vsub.f32 %v863_v57, %v1272_v35  ;;  %v864_v51 = vmul.f32 %v5489_v62, %v7016_v59 }
 0x23c   :  { %7013 = vst [vmem:[#allocation21_spill] sm:$0xff] %v5519_v52  ;;  %v1782_v18 = vsub.f32 %v862_v54, %v1268_v45  ;;  %v5521_v31 = vpop.eup %4256  ;;  %4276 = vrcp.f32 %v2412_v6  ;;  %1545 = vbcast.lane.b32.xlu1 %v1531_v46, 280  ;;  %1541 = vbcast.lane.b32.xlu0 %v1531_v46, 272 }
 0x23d   :  { %7014 = vst [vmem:[#allocation22_spill] sm:$0xff] %v5521_v31  ;;  %v4259_v32 = vpop.eup %4258  ;;  %4278 = vrcp.f32 %v2415_v63  ;;  %v3937_v12 = vmul.f32 -1.442695, %v1783_v49  ;;  %v7019_v49 = vld [vmem:[#allocation34_spill] sm:$0xff] }
 0x23e   :  { %v3936_v53 = vmul.f32 -1.442695, %v1782_v18  ;;  %v5529_v57 = vpop.eup %4260  ;;  %v2414_v54 = vadd.f32 1.0, %v4259_v32  ;;  %4280 = vpow2.f32 %v3934_v60  ;;  %v1280_v24 = vpop.permute.xlu1 %1279  ;;  %v866_v18 = vmul.f32 %v5469_v22, %v7019_v49 }
 0x23f   :  { %7017 = vst [vmem:[#allocation23_spill] sm:$0xff] %v5529_v57  ;;  %v1276_v40 = vpop.permute.xlu0 %1275  ;;  %v4263_v35 = vpop.eup %4262  ;;  %4282 = vpow2.f32 %v3937_v12  ;;  %v1785_v6 = vsub.f32 %v865_v48, %v1280_v24  ;;  %v5538_v48 = vld [vmem:[%s6819_s2 + $0x20] sm:$0xff]  ;;  %v7026_v57 = vld [vmem:[#allocation37_spill] sm:$0xff] }
 0x240   :  { %v1784_v46 = vsub.f32 %v864_v51, %v1276_v40  ;;  %v4265_v45 = vpop.eup %4264  ;;  %4284 = vrcp.f32 %v2414_v54  ;;  %v2417_v52 = vadd.f32 1.0, %v4263_v35  ;;  %1556 = vbcast.lane.b32.xlu1 %v1550_v14, 264  ;;  %1552 = vbcast.lane.b32.xlu0 %v1550_v14, 256  ;;  %v1569_v49 = vrot.slane %v5538_v48, %v4747_v3 }
 0x241   :  { %v4267_v63 = vpop.eup %4266  ;;  %v2416_v32 = vadd.f32 1.0, %v4265_v45  ;;  %4286 = vpow2.f32 %v3936_v53  ;;  %v3939_v60 = vmul.f32 -1.442695, %v1785_v6  ;;  %v7022_v53 = vld [vmem:[#allocation35_spill] sm:$0xff]  ;;  %v871_v20 = vmul.f32 %v5462_v42, %v7026_v57 }
 0x242   :  { %v5540_v59 = vpop.eup %4268  ;;  %4288 = vrcp.f32 %v2417_v52  ;;  %v2419_v51 = vadd.f32 1.0, %v4267_v63  ;;  %v3938_v12 = vmul.f32 -1.442695, %v1784_v46  ;;  %v1291_v54 = vpop.permute.xlu1 %1290  ;;  %v869_v6 = vmul.f32 %v5482_v43, %v7022_v53  ;;  %v7023_v63 = vld [vmem:[#allocation36_spill] sm:$0xff] }
 0x243   :  { %7020 = vst [vmem:[#allocation24_spill] sm:$0xff] %v5540_v59  ;;  %v1287_v24 = vpop.permute.xlu0 %1286  ;;  %v5542_v40 = vpop.eup %4270  ;;  %4290 = vrcp.f32 %v2416_v32  ;;  %v1787_v35 = vsub.f32 %v867_v37, %v1291_v54  ;;  %v868_v46 = vmul.f32 %v5489_v62, %v7023_v63 }
 0x244   :  { %7021 = vst [vmem:[#allocation25_spill] sm:$0xff] %v5542_v40  ;;  %v1786_v10 = vsub.f32 %v866_v18, %v1287_v24  ;;  %v4273_v45 = vpop.eup %4272  ;;  %4292 = vrcp.f32 %v2419_v51  ;;  %1564 = vbcast.lane.b32.xlu1 %v1550_v14, 280  ;;  %1560 = vbcast.lane.b32.xlu0 %v1550_v14, 272 }
 0x245   :  { %v4275_v52 = vpop.eup %4274  ;;  %v2418_v31 = vadd.f32 1.0, %v4273_v45  ;;  %4294 = vpow2.f32 %v3939_v60  ;;  %v3941_v40 = vmul.f32 -1.442695, %v1787_v35  ;;  %v7027_v35 = vld [vmem:[#allocation38_spill] sm:$0xff] }
 0x246   :  { %v5550_v32 = vpop.eup %4276  ;;  %v2421_v37 = vadd.f32 1.0, %v4275_v52  ;;  %4296 = vpow2.f32 %v3938_v12  ;;  %v3940_v18 = vmul.f32 -1.442695, %v1786_v10  ;;  %v1299_v54 = vpop.permute.xlu1 %1298  ;;  %v870_v45 = vmul.f32 %v5469_v22, %v7027_v35  ;;  %v7030_v35 = vld [vmem:[#allocation39_spill] sm:$0xff] }
 0x247   :  { %7024 = vst [vmem:[#allocation26_spill] sm:$0xff] %v5550_v32  ;;  %v1295_v24 = vpop.permute.xlu0 %1294  ;;  %v5552_v51 = vpop.eup %4278  ;;  %4298 = vrcp.f32 %v2418_v31  ;;  %v1789_v14 = vsub.f32 %v869_v6, %v1299_v54 }
 0x248   :  { %7025 = vst [vmem:[#allocation27_spill] sm:$0xff] %v5552_v51  ;;  %v1788_v53 = vsub.f32 %v868_v46, %v1295_v24  ;;  %v4281_v59 = vpop.eup %4280  ;;  %4300 = vrcp.f32 %v2421_v37  ;;  %1575 = vbcast.lane.b32.xlu1 %v1569_v49, 264  ;;  %1571 = vbcast.lane.b32.xlu0 %v1569_v49, 256  ;;  %v4708_v24 = vmov 0  }
 0x249   :  { %v4283_v60 = vpop.eup %4282  ;;  %v2420_v12 = vadd.f32 1.0, %v4281_v59  ;;  %4302 = vpow2.f32 %v3941_v40  ;;  %v3943_v10 = vmul.f32 -1.442695, %v1789_v14  ;;  %4039 = vset.pattern.permute.xlu1 %v4708_v24  ;;  %4038 = vset.pattern.permute.xlu0 %v4708_v24  ;;  %v873_v59 = vmul.f32 %v5482_v43, %v7030_v35  ;;  %v7034_v35 = vld [vmem:[#allocation41_spill] sm:$0xff] }
 0x24a   :  { %v5558_v52 = vpop.eup %4284  ;;  %v2423_v63 = vadd.f32 1.0, %v4283_v60  ;;  %4304 = vpow2.f32 %v3940_v18  ;;  %v1310_v31 = vpop.permute.xlu1 %1309  ;;  %v3942_v54 = vmul.f32 -1.442695, %v1788_v53  ;;  %v1588_v18 = vrot.slane %v5538_v48, %v4750_v5  ;;  %v7032_v53 = vld [vmem:[#allocation40_spill] sm:$0xff] }
 0x24b   :  { %7028 = vst [vmem:[#allocation28_spill] sm:$0xff] %v5558_v52  ;;  %v1306_v6 = vpop.permute.xlu0 %1305  ;;  %v4287_v46 = vpop.eup %4286  ;;  %4306 = vrcp.f32 %v2420_v12  ;;  %v1791_v57 = vsub.f32 %v871_v20, %v1310_v31  ;;  %v872_v20 = vmul.f32 %v5489_v62, %v7032_v53 }
 0x24c   :  { %v1790_v37 = vsub.f32 %v870_v45, %v1306_v6  ;;  %v5560_v32 = vpop.eup %4288  ;;  %4308 = vrcp.f32 %v2423_v63  ;;  %v2422_v40 = vadd.f32 1.0, %v4287_v46  ;;  %1583 = vbcast.lane.b32.xlu1 %v1569_v49, 280  ;;  %1579 = vbcast.lane.b32.xlu0 %v1569_v49, 272 }
 0x24d   :  { %7029 = vst [vmem:[#allocation29_spill] sm:$0xff] %v5560_v32  ;;  %v5566_v14 = vpop.eup %4290  ;;  %4310 = vpow2.f32 %v3943_v10  ;;  %v3945_v60 = vmul.f32 -1.442695, %v1791_v57  ;;  %v875_v32 = vmul.f32 %v5462_v42, %v7034_v35 }
 0x24e   :  { %7031 = vst [vmem:[#allocation30_spill] sm:$0xff] %v5566_v14  ;;  %v3944_v45 = vmul.f32 -1.442695, %v1790_v37  ;;  %v5570_v12 = vpop.eup %4292  ;;  %4312 = vrcp.f32 %v2422_v40  ;;  %v1318_v31 = vpop.permute.xlu1 %1317  ;;  %v7035_v14 = vld [vmem:[#allocation42_spill] sm:$0xff] }
 0x24f   :  { %7033 = vst [vmem:[#allocation31_spill] sm:$0xff] %v5570_v12  ;;  %v1314_v6 = vpop.permute.xlu0 %1313  ;;  %v4295_v63 = vpop.eup %4294  ;;  %4314 = vpow2.f32 %v3942_v54  ;;  %v1793_v46 = vsub.f32 %v873_v59, %v1318_v31  ;;  %v874_v52 = vmul.f32 %v5469_v22, %v7035_v14  ;;  %v7039_v12 = vld [vmem:[#allocation44_spill] sm:$0xff] }
 0x250   :  { %v1792_v49 = vsub.f32 %v872_v20, %v1314_v6  ;;  %v4297_v24 = vpop.eup %4296  ;;  %v2425_v53 = vadd.f32 1.0, %v4295_v63  ;;  %4316 = vpow2.f32 %v3945_v60  ;;  %1594 = vbcast.lane.b32.xlu1 %v1588_v18, 264  ;;  %1590 = vbcast.lane.b32.xlu0 %v1588_v18, 256  ;;  %v7038_v6 = vld [vmem:[#allocation43_spill] sm:$0xff] }
 0x251   :  { %v5576_v10 = vpop.eup %4298  ;;  %v2424_v57 = vadd.f32 1.0, %v4297_v24  ;;  %4318 = vpow2.f32 %v3944_v45  ;;  %v3947_v37 = vmul.f32 -1.442695, %v1793_v46  ;;  %v877_v35 = vmul.f32 %v5482_v43, %v7038_v6 }
 0x252   :  { %7036 = vst [vmem:[#allocation32_spill] sm:$0xff] %v5576_v10  ;;  %v3946_v40 = vmul.f32 -1.442695, %v1792_v49  ;;  %v5578_v54 = vpop.eup %4300  ;;  %4320 = vrcp.f32 %v2425_v53  ;;  %v1329_v59 = vpop.permute.xlu1 %1328  ;;  %v876_v10 = vmul.f32 %v5489_v62, %v7039_v12  ;;  %v1607_v45 = vrot.slane %v5538_v48, %v4753_v7 }
 0x253   :  { %7037 = vst [vmem:[#allocation33_spill] sm:$0xff] %v5578_v54  ;;  %v1325_v20 = vpop.permute.xlu0 %1324  ;;  %v4303_v31 = vpop.eup %4302  ;;  %4322 = vrcp.f32 %v2424_v57  ;;  %v1795_v14 = vsub.f32 %v875_v32, %v1329_v59 }
 0x254   :  { %v1794_v60 = vsub.f32 %v874_v52, %v1325_v20  ;;  %v4305_v63 = vpop.eup %4304  ;;  %v2427_v24 = vadd.f32 1.0, %v4303_v31  ;;  %4324 = vpow2.f32 %v3947_v37  ;;  %1602 = vbcast.lane.b32.xlu1 %v1588_v18, 280  ;;  %1598 = vbcast.lane.b32.xlu0 %v1588_v18, 272 }
 0x255   :  { %v5586_v46 = vpop.eup %4306  ;;  %v2426_v49 = vadd.f32 1.0, %v4305_v63  ;;  %4326 = vpow2.f32 %v3946_v40  ;;  %v3949_v53 = vmul.f32 -1.442695, %v1795_v14  ;;  %v7041_v63 = vld [vmem:[#allocation45_spill] sm:$0xff]  ;;  %v7042_v14 = vld [vmem:[#allocation46_spill] sm:$0xff] }
 0x256   :  { %7040 = vst [vmem:[#allocation34_spill] sm:$0xff] %v5586_v46  ;;  %v3948_v6 = vmul.f32 -1.442695, %v1794_v60  ;;  %v5588_v57 = vpop.eup %4308  ;;  %4328 = vrcp.f32 %v2427_v24  ;;  %v1337_v32 = vpop.permute.xlu1 %1336  ;;  %v879_v40 = vmul.f32 %v5462_v42, %v7041_v63  ;;  %v878_v60 = vmul.f32 %v5469_v22, %v7042_v14 }
 0x257   :  { %v1333_v52 = vpop.permute.xlu0 %1332  ;;  %v4311_v59 = vpop.eup %4310  ;;  %4330 = vrcp.f32 %v2426_v49  ;;  %v1797_v12 = vsub.f32 %v877_v35, %v1337_v32 }
 0x258   :  { %v1796_v37 = vsub.f32 %v876_v10, %v1333_v52  ;;  %v5590_v20 = vpop.eup %4312  ;;  %v2429_v18 = vadd.f32 1.0, %v4311_v59  ;;  %4332 = vpow2.f32 %v3949_v53  ;;  %1613 = vbcast.lane.b32.xlu1 %v1607_v45, 264  ;;  %1609 = vbcast.lane.b32.xlu0 %v1607_v45, 256 }
 0x259   :  { %v4315_v31 = vpop.eup %4314  ;;  %4334 = vpow2.f32 %v3948_v6  ;;  %v3951_v24 = vmul.f32 -1.442695, %v1797_v12  ;;  %v5600_v6 = vrot.slane %v5538_v48, %v4756_v9 }
 0x25a   :  { %v4317_v54 = vpop.eup %4316  ;;  %4336 = vrcp.f32 %v2429_v18  ;;  %v2428_v49 = vadd.f32 1.0, %v4315_v31  ;;  %v3950_v35 = vmul.f32 -1.442695, %v1796_v37  ;;  %v1348_v10 = vpop.permute.xlu1 %1347  ;;  %v7044_v37 = vld [vmem:[#allocation47_spill] sm:$0xff]  ;;  %v7045_v31 = vld [vmem:[#allocation48_spill] sm:$0xff] }
 0x25b   :  { %v1344_v32 = vpop.permute.xlu0 %1343  ;;  %v4319_v52 = vpop.eup %4318  ;;  %v2431_v59 = vadd.f32 1.0, %v4317_v54  ;;  %4338 = vpow2.f32 %v3951_v24  ;;  %v1799_v53 = vsub.f32 %v879_v40, %v1348_v10  ;;  %v881_v18 = vmul.f32 %v5482_v43, %v7044_v37 }
 0x25c   :  { %v1798_v46 = vsub.f32 %v878_v60, %v1344_v32  ;;  %v5596_v51 = vpop.eup %4320  ;;  %4340 = vrcp.f32 %v2428_v49  ;;  %v2430_v63 = vadd.f32 1.0, %v4319_v52  ;;  %1621 = vbcast.lane.b32.xlu1 %v1607_v45, 280  ;;  %1617 = vbcast.lane.b32.xlu0 %v1607_v45, 272  ;;  %v880_v54 = vmul.f32 %v5489_v62, %v7045_v31 }
 0x25d   :  { %7043 = vst [vmem:[#allocation35_spill] sm:$0xff] %v5596_v51  ;;  %v5602_v12 = vpop.eup %4322  ;;  %4342 = vrcp.f32 %v2431_v59  ;;  %v3953_v40 = vmul.f32 -1.442695, %v1799_v53  ;;  %v5614_v59 = vrot.slane %v5538_v48, %v4759_v11  ;;  %v7046_v53 = vld [vmem:[#allocation49_spill] sm:$0xff] }
 0x25e   :  { %v4325_v14 = vpop.eup %4324  ;;  %4344 = vrcp.f32 %v2430_v63  ;;  %v3952_v60 = vmul.f32 -1.442695, %v1798_v46  ;;  %v1356_v24 = vpop.permute.xlu1 %1355  ;;  %v883_v63 = vmul.f32 %v5462_v42, %v7046_v53  ;;  %v7050_v53 = vld [vmem:[#allocation52_spill] sm:$0xff] }
 0x25f   :  { %v1352_v49 = vpop.permute.xlu0 %1351  ;;  %v4327_v45 = vpop.eup %4326  ;;  %v2433_v10 = vadd.f32 1.0, %v4325_v14  ;;  %4346 = vpow2.f32 %v3950_v35  ;;  %v1801_v32 = vsub.f32 %v881_v18, %v1356_v24  ;;  %v7047_v35 = vld [vmem:[#allocation50_spill] sm:$0xff] }
 0x260   :  { %v1800_v52 = vsub.f32 %v880_v54, %v1352_v49  ;;  %v5608_v8 = vpop.eup %4328  ;;  %v2432_v56 = vadd.f32 1.0, %v4327_v45  ;;  %4348 = vpow2.f32 %v3953_v40  ;;  %1632 = vbcast.lane.b32.xlu1 %v5600_v6, 264  ;;  %1628 = vbcast.lane.b32.xlu0 %v5600_v6, 256  ;;  %v882_v37 = vmul.f32 %v5469_v22, %v7047_v35 }
 0x261   :  { %v5616_v46 = vpop.eup %4330  ;;  %4350 = vrcp.f32 %v2433_v10  ;;  %v3955_v18 = vmul.f32 -1.442695, %v1801_v32  ;;  %v5628_v10 = vrot.slane %v5538_v48, %v4762_v13  ;;  %v7049_v32 = vld [vmem:[#allocation51_spill] sm:$0xff] }
 0x262   :  { %v4333_v31 = vpop.eup %4332  ;;  %4352 = vrcp.f32 %v2432_v56  ;;  %v3954_v54 = vmul.f32 -1.442695, %v1800_v52  ;;  %v1367_v40 = vpop.permute.xlu1 %1366  ;;  %v885_v52 = vmul.f32 %v5482_v43, %v7049_v32 }
 0x263   :  { %v1363_v14 = vpop.permute.xlu0 %1362  ;;  %v4335_v24 = vpop.eup %4334  ;;  %v2435_v49 = vadd.f32 1.0, %v4333_v31  ;;  %4354 = vpow2.f32 %v3952_v60  ;;  %v1803_v45 = vsub.f32 %v883_v63, %v1367_v40  ;;  %v884_v60 = vmul.f32 %v5489_v62, %v7050_v53 }
 0x264   :  { %v1802_v51 = vsub.f32 %v882_v37, %v1363_v14  ;;  %v5622_v38 = vpop.eup %4336  ;;  %v2434_v25 = vadd.f32 1.0, %v4335_v24  ;;  %4356 = vpow2.f32 %v3955_v18  ;;  %1651 = vbcast.lane.b32.xlu1 %v5614_v59, 264  ;;  %1647 = vbcast.lane.b32.xlu0 %v5614_v59, 256 }
 0x265   :  { %7048 = vst [vmem:[#allocation36_spill] sm:$0xff] %v5622_v38  ;;  %v4339_v56 = vpop.eup %4338  ;;  %4358 = vrcp.f32 %v2435_v49  ;;  %v3957_v63 = vmul.f32 -1.442695, %v1803_v45  ;;  %v7051_v45 = vld [vmem:[#allocation53_spill] sm:$0xff] }
 0x266   :  { %v5634_v35 = vpop.eup %4340  ;;  %4360 = vrcp.f32 %v2434_v25  ;;  %v2437_v37 = vadd.f32 1.0, %v4339_v56  ;;  %v3956_v18 = vmul.f32 -1.442695, %v1802_v51  ;;  %v1375_v31 = vpop.permute.xlu1 %1374  ;;  %v887_v25 = vmul.f32 %v5462_v42, %v7051_v45  ;;  %v7052_v56 = vld [vmem:[#allocation54_spill] sm:$0xff] }
 0x267   :  { %v1371_v40 = vpop.permute.xlu0 %1370  ;;  %v5636_v14 = vpop.eup %4342  ;;  %4362 = vpow2.f32 %v3954_v54  ;;  %v1805_v24 = vsub.f32 %v885_v52, %v1375_v31  ;;  %v886_v51 = vmul.f32 %v5469_v22, %v7052_v56 }
 0x268   :  { %v1804_v38 = vsub.f32 %v884_v60, %v1371_v40  ;;  %v5638_v33 = vpop.eup %4344  ;;  %4364 = vrcp.f32 %v2437_v37  ;;  %1666 = vbcast.lane.b32.xlu1 %v5628_v10, 256  ;;  %1636 = vbcast.lane.b32.xlu0 %v5600_v6, 272 }
 0x269   :  { %v4347_v49 = vpop.eup %4346  ;;  %4366 = vpow2.f32 %v3957_v63  ;;  %v3959_v32 = vmul.f32 -1.442695, %v1805_v24  ;;  %v5654_v63 = vrot.slane %v5538_v48, %v4765_v15 }
 0x26a   :  { %v4349_v53 = vpop.eup %4348  ;;  %v2436_v54 = vadd.f32 1.0, %v4347_v49  ;;  %4368 = vpow2.f32 %v3956_v18  ;;  %v3958_v52 = vmul.f32 -1.442695, %v1804_v38  ;;  %v1386_v60 = vpop.permute.xlu1 %1385  ;;  %v7055_v18 = vld [vmem:[#allocation55_spill] sm:$0xff]  ;;  %v7056_v49 = vld [vmem:[#allocation56_spill] sm:$0xff] }
 0x26b   :  { %v1382_v31 = vpop.permute.xlu0 %1381  ;;  %v5646_v37 = vpop.eup %4350  ;;  %v2439_v40 = vadd.f32 1.0, %v4349_v53  ;;  %4370 = vpow2.f32 %v3959_v32  ;;  %v1807_v36 = vsub.f32 %v887_v25, %v1386_v60  ;;  %v889_v24 = vmul.f32 %v5482_v43, %v7055_v18  ;;  %v7059_v18 = vld [vmem:[#allocation57_spill] sm:$0xff] }
 0x26c   :  { %7053 = vst [vmem:[#allocation37_spill] sm:$0xff] %v5646_v37  ;;  %v1806_v0 = vsub.f32 %v886_v51, %v1382_v31  ;;  %v5648_v2 = vpop.eup %4352  ;;  %4372 = vrcp.f32 %v2436_v54  ;;  %1655 = vbcast.lane.b32.xlu1 %v5614_v59, 272  ;;  %1670 = vbcast.lane.b32.xlu0 %v5628_v10, 264  ;;  %v888_v45 = vmul.f32 %v5489_v62, %v7056_v49 }
 0x26d   :  { %7054 = vst [vmem:[#allocation38_spill] sm:$0xff] %v5648_v2  ;;  %v4355_v38 = vpop.eup %4354  ;;  %4374 = vrcp.f32 %v2439_v40  ;;  %v3961_v25 = vmul.f32 -1.442695, %v1807_v36  ;;  %v891_v34 = vmul.f32 %v5462_v42, %v7059_v18  ;;  %v7062_v18 = vld [vmem:[#allocation59_spill] sm:$0xff] }
 0x26e   :  { %v4357_v56 = vpop.eup %4356  ;;  %v2438_v51 = vadd.f32 1.0, %v4355_v38  ;;  %4376 = vpow2.f32 %v3958_v52  ;;  %v3960_v32 = vmul.f32 -1.442695, %v1806_v0  ;;  %v1394_v53 = vpop.permute.xlu1 %1393  ;;  %v7060_v0 = vld [vmem:[#allocation58_spill] sm:$0xff] }
 0x26f   :  { %v1390_v54 = vpop.permute.xlu0 %1389  ;;  %v5660_v60 = vpop.eup %4358  ;;  %v2441_v31 = vadd.f32 1.0, %v4357_v56  ;;  %4378 = vpow2.f32 %v3961_v25  ;;  %v1809_v37 = vsub.f32 %v889_v24, %v1394_v53  ;;  %v890_v52 = vmul.f32 %v5469_v22, %v7060_v0 }
 0x270   :  { %7057 = vst [vmem:[#allocation39_spill] sm:$0xff] %v5660_v60  ;;  %v1808_v2 = vsub.f32 %v888_v45, %v1390_v54  ;;  %v5662_v41 = vpop.eup %4360  ;;  %4380 = vrcp.f32 %v2438_v51  ;;  %1689 = vbcast.lane.b32.xlu1 %v5654_v63, 264  ;;  %1685 = vbcast.lane.b32.xlu0 %v5654_v63, 256 }
 0x271   :  { %7058 = vst [vmem:[#allocation40_spill] sm:$0xff] %v5662_v41  ;;  %v4363_v36 = vpop.eup %4362  ;;  %4382 = vrcp.f32 %v2441_v31  ;;  %v3963_v40 = vmul.f32 -1.442695, %v1809_v37  ;;  %v893_v41 = vmul.f32 %v5482_v43, %v7062_v18  ;;  %v7066_v18 = vld [vmem:[#allocation61_spill] sm:$0xff] }
 0x272   :  { %v3962_v38 = vmul.f32 -1.442695, %v1808_v2  ;;  %v5670_v49 = vpop.eup %4364  ;;  %v2440_v24 = vadd.f32 1.0, %v4363_v36  ;;  %4384 = vpow2.f32 %v3960_v32  ;;  %v1405_v45 = vpop.permute.xlu1 %1404  ;;  %v5678_v2 = vrot.slane %v5538_v48, %v4768_v17  ;;  %v7063_v32 = vld [vmem:[#allocation60_spill] sm:$0xff] }
 0x273   :  { %7061 = vst [vmem:[#allocation41_spill] sm:$0xff] %v5670_v49  ;;  %v1401_v25 = vpop.permute.xlu0 %1400  ;;  %v4367_v56 = vpop.eup %4366  ;;  %4386 = vpow2.f32 %v3963_v40  ;;  %v1811_v51 = vsub.f32 %v891_v34, %v1405_v45  ;;  %v892_v31 = vmul.f32 %v5489_v62, %v7063_v32  ;;  %v895_v49 = vmul.f32 %v5462_v42, %v7066_v18 }
 0x274   :  { %v1810_v53 = vsub.f32 %v890_v52, %v1401_v25  ;;  %v4369_v54 = vpop.eup %4368  ;;  %4388 = vrcp.f32 %v2440_v24  ;;  %v2443_v60 = vadd.f32 1.0, %v4367_v56  ;;  %1674 = vbcast.lane.b32.xlu1 %v5628_v10, 272  ;;  %1640 = vbcast.lane.b32.xlu0 %v5600_v6, 280 }
 0x275   :  { %v4371_v37 = vpop.eup %4370  ;;  %v2442_v34 = vadd.f32 1.0, %v4369_v54  ;;  %4390 = vpow2.f32 %v3962_v38  ;;  %v3965_v36 = vmul.f32 -1.442695, %v1811_v51 }
 0x276   :  { %v5682_v0 = vpop.eup %4372  ;;  %4392 = vrcp.f32 %v2443_v60  ;;  %v2445_v52 = vadd.f32 1.0, %v4371_v37  ;;  %v3964_v40 = vmul.f32 -1.442695, %v1810_v53  ;;  %v1413_v24 = vpop.permute.xlu1 %1412  ;;  %v7067_v60 = vld [vmem:[#allocation62_spill] sm:$0xff] }
 0x277   :  { %7064 = vst [vmem:[#allocation42_spill] sm:$0xff] %v5682_v0  ;;  %v1409_v45 = vpop.permute.xlu0 %1408  ;;  %v5684_v25 = vpop.eup %4374  ;;  %4394 = vrcp.f32 %v2442_v34  ;;  %v1813_v6 = vsub.f32 %v893_v41, %v1413_v24  ;;  %v894_v51 = vmul.f32 %v5469_v22, %v7067_v60  ;;  %v7070_v0 = vld [vmem:[#allocation63_spill] sm:$0xff] }
 0x278   :  { %7065 = vst [vmem:[#allocation43_spill] sm:$0xff] %v5684_v25  ;;  %v1812_v48 = vsub.f32 %v892_v31, %v1409_v45  ;;  %v4377_v56 = vpop.eup %4376  ;;  %4396 = vrcp.f32 %v2445_v52  ;;  %1708 = vbcast.lane.b32.xlu1 %v5678_v2, 264  ;;  %1704 = vbcast.lane.b32.xlu0 %v5678_v2, 256  ;;  %v897_v25 = vmul.f32 %v5482_v43, %v7070_v0 }
 0x279   :  { %v4379_v38 = vpop.eup %4378  ;;  %v2444_v53 = vadd.f32 1.0, %v4377_v56  ;;  %4398 = vpow2.f32 %v3965_v36  ;;  %v3967_v54 = vmul.f32 -1.442695, %v1813_v6  ;;  %v7071_v6 = vld [vmem:[#allocation64_spill] sm:$0xff] }
 0x27a   :  { %v5692_v37 = vpop.eup %4380  ;;  %v2447_v41 = vadd.f32 1.0, %v4379_v38  ;;  %4400 = vpow2.f32 %v3964_v40  ;;  %v3966_v32 = vmul.f32 -1.442695, %v1812_v48  ;;  %v1424_v31 = vpop.permute.xlu1 %1423  ;;  %v896_v40 = vmul.f32 %v5489_v62, %v7071_v6 }
 0x27b   :  { %7068 = vst [vmem:[#allocation44_spill] sm:$0xff] %v5692_v37  ;;  %v1420_v34 = vpop.permute.xlu0 %1419  ;;  %v5694_v24 = vpop.eup %4382  ;;  %4402 = vrcp.f32 %v2444_v53  ;;  %v1815_v52 = vsub.f32 %v895_v49, %v1424_v31 }
 0x27c   :  { %7069 = vst [vmem:[#allocation45_spill] sm:$0xff] %v5694_v24  ;;  %v1814_v45 = vsub.f32 %v894_v51, %v1420_v34  ;;  %v4385_v18 = vpop.eup %4384  ;;  %4404 = vrcp.f32 %v2447_v41  ;;  %1693 = vbcast.lane.b32.xlu1 %v5654_v63, 272  ;;  %1659 = vbcast.lane.b32.xlu0 %v5614_v59, 280  ;;  %v7074_v59 = vld [vmem:[#allocation65_spill] sm:$0xff] }
 0x27d   :  { %v4387_v36 = vpop.eup %4386  ;;  %v2446_v48 = vadd.f32 1.0, %v4385_v18  ;;  %4406 = vpow2.f32 %v3967_v54  ;;  %v3969_v56 = vmul.f32 -1.442695, %v1815_v52  ;;  %v899_v24 = vmul.f32 %v5462_v42, %v7074_v59 }
 0x27e   :  { %v5702_v38 = vpop.eup %4388  ;;  %v2449_v49 = vadd.f32 1.0, %v4387_v36  ;;  %4408 = vpow2.f32 %v3966_v32  ;;  %v1432_v60 = vpop.permute.xlu1 %1431  ;;  %v3968_v0 = vmul.f32 -1.442695, %v1814_v45  ;;  %v7076_v32 = vld [vmem:[#allocation66_spill] sm:$0xff] }
 0x27f   :  { %7072 = vst [vmem:[#allocation46_spill] sm:$0xff] %v5702_v38  ;;  %v1428_v51 = vpop.permute.xlu0 %1427  ;;  %v4391_v53 = vpop.eup %4390  ;;  %4410 = vrcp.f32 %v2446_v48  ;;  %v1817_v41 = vsub.f32 %v897_v25, %v1432_v60  ;;  %v898_v52 = vmul.f32 %v5469_v22, %v7076_v32  ;;  %v5717_v36 = vld [vmem:[%s6821_s3] sm:$0xff] }
 0x280   :  { %v1816_v31 = vsub.f32 %v896_v40, %v1428_v51  ;;  %v5704_v34 = vpop.eup %4392  ;;  %4412 = vrcp.f32 %v2449_v49  ;;  %v2448_v18 = vadd.f32 1.0, %v4391_v53  ;;  %1712 = vbcast.lane.b32.xlu1 %v5678_v2, 272  ;;  %1678 = vbcast.lane.b32.xlu0 %v5628_v10, 280  ;;  %v7078_v10 = vld [vmem:[#allocation67_spill] sm:$0xff] }
 0x281   :  { %7073 = vst [vmem:[#allocation47_spill] sm:$0xff] %v5704_v34  ;;  %v5710_v54 = vpop.eup %4394  ;;  %4414 = vpow2.f32 %v3969_v56  ;;  %v3971_v45 = vmul.f32 -1.442695, %v1817_v41  ;;  %v901_v60 = vmul.f32 %v5482_v43, %v7078_v10  ;;  %v7079_v41 = vld [vmem:[#allocation68_spill] sm:$0xff] }
 0x282   :  { %7075 = vst [vmem:[#allocation48_spill] sm:$0xff] %v5710_v54  ;;  %v3970_v25 = vmul.f32 -1.442695, %v1816_v31  ;;  %v5719_v6 = vpop.eup %4396  ;;  %4416 = vrcp.f32 %v2448_v18  ;;  %v1443_v40 = vpop.permute.xlu1 %1442  ;;  %v900_v31 = vmul.f32 %v5489_v62, %v7079_v41  ;;  %v5729_v18 = vrot.slane %v5717_v36, %v4747_v3 }
 0x283   :  { %7077 = vst [vmem:[#allocation49_spill] sm:$0xff] %v5719_v6  ;;  %v1439_v48 = vpop.permute.xlu0 %1438  ;;  %v4399_v49 = vpop.eup %4398  ;;  %4418 = vpow2.f32 %v3968_v0  ;;  %v1819_v51 = vsub.f32 %v899_v24, %v1443_v40  ;;  %v7083_v6 = vld [vmem:[#allocation70_spill] sm:$0xff] }
 0x284   :  { %v1818_v53 = vsub.f32 %v898_v52, %v1439_v48  ;;  %v4401_v56 = vpop.eup %4400  ;;  %v2451_v59 = vadd.f32 1.0, %v4399_v49  ;;  %4420 = vpow2.f32 %v3971_v45  ;;  %1716 = vbcast.lane.b32.xlu1 %v5678_v2, 280  ;;  %1697 = vbcast.lane.b32.xlu0 %v5654_v63, 280  ;;  %v7082_v49 = vld [vmem:[#allocation69_spill] sm:$0xff] }
 0x285   :  { %v5731_v32 = vpop.eup %4402  ;;  %v2450_v10 = vadd.f32 1.0, %v4401_v56  ;;  %4422 = vpow2.f32 %v3970_v25  ;;  %v3973_v24 = vmul.f32 -1.442695, %v1819_v51  ;;  %v903_v2 = vmul.f32 %v5462_v42, %v7082_v49 }
 0x286   :  { %7080 = vst [vmem:[#allocation50_spill] sm:$0xff] %v5731_v32  ;;  %v3972_v0 = vmul.f32 -1.442695, %v1818_v53  ;;  %v5733_v52 = vpop.eup %4404  ;;  %4424 = vrcp.f32 %v2451_v59  ;;  %v1451_v40 = vpop.permute.xlu1 %1450  ;;  %v902_v32 = vmul.f32 %v5469_v22, %v7083_v6  ;;  %v5743_v25 = vrot.slane %v5717_v36, %v4750_v5 }
 0x287   :  { %7081 = vst [vmem:[#allocation51_spill] sm:$0xff] %v5733_v52  ;;  %v1447_v48 = vpop.permute.xlu0 %1446  ;;  %v4407_v45 = vpop.eup %4406  ;;  %4426 = vrcp.f32 %v2450_v10  ;;  %v1821_v63 = vsub.f32 %v901_v60, %v1451_v40  ;;  %v5755_v5 = vrot.slane %v5717_v36, %v4753_v7 }
 0x288   :  { %v1820_v41 = vsub.f32 %v900_v31, %v1447_v48  ;;  %v4409_v3 = vpop.eup %4408  ;;  %v2453_v56 = vadd.f32 1.0, %v4407_v45  ;;  %4428 = vpow2.f32 %v3973_v24  ;;  %2847 = vbcast.lane.b32.xlu1 %v5729_v18, 264  ;;  %2843 = vbcast.lane.b32.xlu0 %v5729_v18, 256  ;;  %v7087_v45 = vld [vmem:[#allocation71_spill] sm:$0xff] }
 0x289   :  { %v5745_v51 = vpop.eup %4410  ;;  %v2452_v42 = vadd.f32 1.0, %v4409_v3  ;;  %4430 = vpow2.f32 %v3972_v0  ;;  %v3975_v60 = vmul.f32 -1.442695, %v1821_v63  ;;  %v905_v49 = vmul.f32 %v5482_v43, %v7087_v45  ;;  %v7088_v63 = vld [vmem:[#allocation72_spill] sm:$0xff] }
 0x28a   :  { %7084 = vst [vmem:[#allocation52_spill] sm:$0xff] %v5745_v51  ;;  %v3974_v53 = vmul.f32 -1.442695, %v1820_v41  ;;  %v5747_v31 = vpop.eup %4412  ;;  %4432 = vrcp.f32 %v2453_v56  ;;  %v1462_v22 = vpop.permute.xlu1 %1461 }
 0x28b   :  { %7085 = vst [vmem:[#allocation53_spill] sm:$0xff] %v5747_v31  ;;  %v1458_v6 = vpop.permute.xlu0 %1457  ;;  %v4415_v59 = vpop.eup %4414  ;;  %4434 = vrcp.f32 %v2452_v42  ;;  %v1823_v10 = vsub.f32 %v903_v2, %v1462_v22  ;;  %v904_v2 = vmul.f32 %v5489_v62, %v7088_v63 }
 0x28c   :  { %v1822_v24 = vsub.f32 %v902_v32, %v1458_v6  ;;  %v5749_v40 = vpop.eup %4416  ;;  %v2455_v48 = vadd.f32 1.0, %v4415_v59  ;;  %4436 = vpow2.f32 %v3975_v60  ;;  %2866 = vbcast.lane.b32.xlu1 %v5743_v25, 264  ;;  %2862 = vbcast.lane.b32.xlu0 %v5743_v25, 256 }
 0x28d   :  { %7086 = vst [vmem:[#allocation54_spill] sm:$0xff] %v5749_v40  ;;  %v4419_v0 = vpop.eup %4418  ;;  %4438 = vpow2.f32 %v3974_v53  ;;  %v3977_v32 = vmul.f32 -1.442695, %v1823_v10  ;;  %v5770_v53 = vld [vmem:[%s6820_s0 + $0x8] sm:$0xff]  ;;  %v7091_v10 = vld [vmem:[#allocation73_spill] sm:$0xff] }
 0x28e   :  { %v4421_v41 = vpop.eup %4420  ;;  %4440 = vrcp.f32 %v2455_v48  ;;  %v2454_v3 = vadd.f32 1.0, %v4419_v0  ;;  %v3976_v56 = vmul.f32 -1.442695, %v1822_v24  ;;  %v1470_v42 = vpop.permute.xlu1 %1469  ;;  %v907_v24 = vmul.f32 %v5770_v53, %v7091_v10  ;;  %v5777_v48 = vld [vmem:[%s6820_s0] sm:$0xff] }
 0x28f   :  { %v1466_v60 = vpop.permute.xlu0 %1465  ;;  %v4423_v22 = vpop.eup %4422  ;;  %v2457_v6 = vadd.f32 1.0, %v4421_v41  ;;  %4442 = vpow2.f32 %v3977_v32  ;;  %v1825_v7 = vsub.f32 %v905_v49, %v1470_v42  ;;  %v7092_v0 = vld [vmem:[#allocation74_spill] sm:$0xff] }
 0x290   :  { %v1824_v59 = vsub.f32 %v904_v2, %v1466_v60  ;;  %v5761_v31 = vpop.eup %4424  ;;  %4444 = vrcp.f32 %v2454_v3  ;;  %v2456_v43 = vadd.f32 1.0, %v4423_v22  ;;  %2885 = vbcast.lane.b32.xlu1 %v5755_v5, 264  ;;  %2881 = vbcast.lane.b32.xlu0 %v5755_v5, 256  ;;  %v906_v45 = vmul.f32 %v5777_v48, %v7092_v0  ;;  %v7096_v0 = vld [vmem:[#allocation76_spill] sm:$0xff] }
 0x291   :  { %7089 = vst [vmem:[#allocation55_spill] sm:$0xff] %v5761_v31  ;;  %v5765_v62 = vpop.eup %4426  ;;  %4446 = vrcp.f32 %v2457_v6  ;;  %v3979_v49 = vmul.f32 -1.442695, %v1825_v7  ;;  %v5787_v6 = vrot.slane %v5717_v36, %v4756_v9 }
 0x292   :  { %7090 = vst [vmem:[#allocation56_spill] sm:$0xff] %v5765_v62  ;;  %v4429_v63 = vpop.eup %4428  ;;  %4448 = vrcp.f32 %v2456_v43  ;;  %v3978_v2 = vmul.f32 -1.442695, %v1824_v59  ;;  %v1481_v32 = vpop.permute.xlu1 %1480  ;;  %v7095_v59 = vld [vmem:[#allocation75_spill] sm:$0xff] }
 0x293   :  { %v1477_v41 = vpop.permute.xlu0 %1476  ;;  %v4431_v3 = vpop.eup %4430  ;;  %v2459_v42 = vadd.f32 1.0, %v4429_v63  ;;  %4450 = vpow2.f32 %v3976_v56  ;;  %v1827_v60 = vsub.f32 %v907_v24, %v1481_v32  ;;  %v5794_v56 = vld [vmem:[%s6820_s0 + $0x18] sm:$0xff]  ;;  %v5801_v24 = vld [vmem:[%s6820_s0 + $0x10] sm:$0xff] }
 0x294   :  { %v1826_v22 = vsub.f32 %v906_v45, %v1477_v41  ;;  %v5781_v10 = vpop.eup %4432  ;;  %v2458_v40 = vadd.f32 1.0, %v4431_v3  ;;  %4452 = vpow2.f32 %v3979_v49  ;;  %2870 = vbcast.lane.b32.xlu1 %v5743_v25, 272  ;;  %2851 = vbcast.lane.b32.xlu0 %v5729_v18, 272  ;;  %v909_v43 = vmul.f32 %v5794_v56, %v7095_v59 }
 0x295   :  { %7093 = vst [vmem:[#allocation57_spill] sm:$0xff] %v5781_v10  ;;  %v5789_v7 = vpop.eup %4434  ;;  %v908_v45 = vmul.f32 %v5801_v24, %v7096_v0  ;;  %4454 = vrcp.f32 %v2459_v42  ;;  %v3981_v9 = vmul.f32 -1.442695, %v1827_v60  ;;  %v5811_v42 = vrot.slane %v5717_v36, %v4759_v11  ;;  %v7097_v60 = vld [vmem:[#allocation77_spill] sm:$0xff]  ;;  %v7098_v0 = vld [vmem:[#allocation78_spill] sm:$0xff] }
 0x296   :  { %7094 = vst [vmem:[#allocation58_spill] sm:$0xff] %v5789_v7  ;;  %v4437_v49 = vpop.eup %4436  ;;  %4456 = vrcp.f32 %v2458_v40  ;;  %v3980_v63 = vmul.f32 -1.442695, %v1826_v22  ;;  %v1489_v32 = vpop.permute.xlu1 %1488  ;;  %v911_v22 = vmul.f32 %v5770_v53, %v7097_v60  ;;  %v921_v27 = vmul.f32 %v5794_v56, %v7110_v16 }
 0x297   :  { %v1485_v41 = vpop.permute.xlu0 %1484  ;;  %v4439_v3 = vpop.eup %4438  ;;  %v2461_v10 = vadd.f32 1.0, %v4437_v49  ;;  %4458 = vpow2.f32 %v3978_v2  ;;  %v1829_v7 = vsub.f32 %v909_v43, %v1489_v32  ;;  %v910_v2 = vmul.f32 %v5777_v48, %v7098_v0 }
 0x298   :  { %v1828_v59 = vsub.f32 %v908_v45, %v1485_v41  ;;  %v5805_v62 = vpop.eup %4440  ;;  %v2460_v31 = vadd.f32 1.0, %v4439_v3  ;;  %4460 = vpow2.f32 %v3981_v9  ;;  %2904 = vbcast.lane.b32.xlu1 %v5787_v6, 264  ;;  %2900 = vbcast.lane.b32.xlu0 %v5787_v6, 256 }
 0x299   :  { %v4443_v40 = vpop.eup %4442  ;;  %4462 = vrcp.f32 %v2461_v10  ;;  %v3983_v43 = vmul.f32 -1.442695, %v1829_v7  ;;  %v7100_v7 = vld [vmem:[#allocation79_spill] sm:$0xff] }
 0x29a   :  { %v5817_v45 = vpop.eup %4444  ;;  %4464 = vrcp.f32 %v2460_v31  ;;  %v2463_v9 = vadd.f32 1.0, %v4443_v40  ;;  %v3982_v49 = vmul.f32 -1.442695, %v1828_v59  ;;  %v1500_v32 = vpop.permute.xlu1 %1499  ;;  %v913_v31 = vmul.f32 %v5794_v56, %v7100_v7  ;;  %v7101_v40 = vld [vmem:[#allocation80_spill] sm:$0xff] }
 0x29b   :  { %v1496_v41 = vpop.permute.xlu0 %1495  ;;  %v5819_v3 = vpop.eup %4446  ;;  %4466 = vpow2.f32 %v3980_v63  ;;  %v1831_v11 = vsub.f32 %v911_v22, %v1500_v32  ;;  %v912_v59 = vmul.f32 %v5801_v24, %v7101_v40 }
 0x29c   :  { %7099 = vst [vmem:[#allocation59_spill] sm:$0xff] %v5819_v3  ;;  %v1830_v51 = vsub.f32 %v910_v2, %v1496_v41  ;;  %v5821_v52 = vpop.eup %4448  ;;  %4468 = vrcp.f32 %v2463_v9  ;;  %2919 = vbcast.lane.b32.xlu1 %v5811_v42, 256  ;;  %2889 = vbcast.lane.b32.xlu0 %v5755_v5, 272 }
 0x29d   :  { %v4451_v10 = vpop.eup %4450  ;;  %4470 = vpow2.f32 %v3983_v43  ;;  %v3985_v60 = vmul.f32 -1.442695, %v1831_v11  ;;  %v7102_v11 = vld [vmem:[#allocation81_spill] sm:$0xff] }
 0x29e   :  { %v4453_v0 = vpop.eup %4452  ;;  %v2462_v63 = vadd.f32 1.0, %v4451_v10  ;;  %4472 = vpow2.f32 %v3982_v49  ;;  %v3984_v22 = vmul.f32 -1.442695, %v1830_v51  ;;  %v1508_v2 = vpop.permute.xlu1 %1507  ;;  %v915_v49 = vmul.f32 %v5770_v53, %v7102_v11  ;;  %v7103_v51 = vld [vmem:[#allocation82_spill] sm:$0xff]  ;;  %v7105_v11 = vld [vmem:[#allocation83_spill] sm:$0xff] }
 0x29f   :  { %v1504_v32 = vpop.permute.xlu0 %1503  ;;  %v5829_v9 = vpop.eup %4454  ;;  %v2465_v41 = vadd.f32 1.0, %v4453_v0  ;;  %4474 = vpow2.f32 %v3985_v60  ;;  %v1833_v38 = vsub.f32 %v913_v31, %v1508_v2  ;;  %v914_v10 = vmul.f32 %v5777_v48, %v7103_v51 }
 0x2a0   :  { %v1832_v54 = vsub.f32 %v912_v59, %v1504_v32  ;;  %v5831_v34 = vpop.eup %4456  ;;  %4476 = vrcp.f32 %v2462_v63  ;;  %2855 = vbcast.lane.b32.xlu1 %v5729_v18, 280  ;;  %2923 = vbcast.lane.b32.xlu0 %v5811_v42, 264  ;;  %v917_v37 = vmul.f32 %v5794_v56, %v7105_v11 }
 0x2a1   :  { %v4459_v43 = vpop.eup %4458  ;;  %4478 = vrcp.f32 %v2465_v41  ;;  %v3987_v7 = vmul.f32 -1.442695, %v1833_v38  ;;  %v5849_v38 = vrot.slane %v5717_v36, %v4762_v13  ;;  %v7107_v13 = vld [vmem:[#allocation85_spill] sm:$0xff] }
 0x2a2   :  { %v4461_v40 = vpop.eup %4460  ;;  %v2464_v60 = vadd.f32 1.0, %v4459_v43  ;;  %4480 = vpow2.f32 %v3984_v22  ;;  %v3986_v31 = vmul.f32 -1.442695, %v1832_v54  ;;  %v1519_v59 = vpop.permute.xlu1 %1518  ;;  %v7106_v22 = vld [vmem:[#allocation84_spill] sm:$0xff]  ;;  %v919_v11 = vmul.f32 %v5770_v53, %v7107_v13 }
 0x2a3   :  { %v1515_v0 = vpop.permute.xlu0 %1514  ;;  %v5839_v63 = vpop.eup %4462  ;;  %v2467_v18 = vadd.f32 1.0, %v4461_v40  ;;  %4482 = vpow2.f32 %v3987_v7  ;;  %v1835_v2 = vsub.f32 %v915_v49, %v1519_v59  ;;  %v916_v41 = vmul.f32 %v5801_v24, %v7106_v22 }
 0x2a4   :  { %7104 = vst [vmem:[#allocation60_spill] sm:$0xff] %v5839_v63  ;;  %v1834_v32 = vsub.f32 %v914_v10, %v1515_v0  ;;  %v5841_v3 = vpop.eup %4464  ;;  %4484 = vrcp.f32 %v2464_v60  ;;  %2908 = vbcast.lane.b32.xlu1 %v5787_v6, 272  ;;  %2874 = vbcast.lane.b32.xlu0 %v5743_v25, 280 }
 0x2a5   :  { %v4467_v54 = vpop.eup %4466  ;;  %4486 = vrcp.f32 %v2467_v18  ;;  %v3989_v43 = vmul.f32 -1.442695, %v1835_v2  ;;  %v7108_v2 = vld [vmem:[#allocation86_spill] sm:$0xff] }
 0x2a6   :  { %v3988_v49 = vmul.f32 -1.442695, %v1834_v32  ;;  %v5853_v51 = vpop.eup %4468  ;;  %v2466_v10 = vadd.f32 1.0, %v4467_v54  ;;  %4488 = vpow2.f32 %v3986_v31  ;;  %v1527_v7 = vpop.permute.xlu1 %1526  ;;  %v918_v31 = vmul.f32 %v5777_v48, %v7108_v2 }
 0x2a7   :  { %v1523_v40 = vpop.permute.xlu0 %1522  ;;  %v4471_v60 = vpop.eup %4470  ;;  %4490 = vpow2.f32 %v3989_v43  ;;  %v1837_v25 = vsub.f32 %v917_v37, %v1527_v7 }
 0x2a8   :  { %v1836_v59 = vsub.f32 %v916_v41, %v1523_v40  ;;  %v4473_v0 = vpop.eup %4472  ;;  %4492 = vrcp.f32 %v2466_v10  ;;  %v2469_v63 = vadd.f32 1.0, %v4471_v60  ;;  %2942 = vbcast.lane.b32.xlu1 %v5849_v38, 264  ;;  %2938 = vbcast.lane.b32.xlu0 %v5849_v38, 256 }
 0x2a9   :  { %v4475_v18 = vpop.eup %4474  ;;  %v2468_v32 = vadd.f32 1.0, %v4473_v0  ;;  %4494 = vpow2.f32 %v3988_v49  ;;  %v3991_v54 = vmul.f32 -1.442695, %v1837_v25  ;;  %v7111_v25 = vld [vmem:[#allocation88_spill] sm:$0xff] }
 0x2aa   :  { %v5861_v22 = vpop.eup %4476  ;;  %4496 = vrcp.f32 %v2469_v63  ;;  %v2471_v37 = vadd.f32 1.0, %v4475_v18  ;;  %v3990_v41 = vmul.f32 -1.442695, %v1836_v59  ;;  %v1538_v43 = vpop.permute.xlu1 %1537  ;;  %v5871_v63 = vrot.slane %v5717_v36, %v4765_v15 }
 0x2ab   :  { %v1534_v7 = vpop.permute.xlu0 %1533  ;;  %v5863_v10 = vpop.eup %4478  ;;  %4498 = vrcp.f32 %v2468_v32  ;;  %v1839_v40 = vsub.f32 %v919_v11, %v1538_v43  ;;  %v920_v59 = vmul.f32 %v5801_v24, %v7111_v25 }
 0x2ac   :  { %7109 = vst [vmem:[#allocation61_spill] sm:$0xff] %v5863_v10  ;;  %v1838_v60 = vsub.f32 %v918_v31, %v1534_v7  ;;  %v4481_v13 = vpop.eup %4480  ;;  %4500 = vrcp.f32 %v2471_v37  ;;  %2927 = vbcast.lane.b32.xlu1 %v5811_v42, 272  ;;  %2893 = vbcast.lane.b32.xlu0 %v5755_v5, 280  ;;  %v7114_v7 = vld [vmem:[#allocation89_spill] sm:$0xff] }
 0x2ad   :  { %v4483_v49 = vpop.eup %4482  ;;  %v2470_v0 = vadd.f32 1.0, %v4481_v13  ;;  %4502 = vpow2.f32 %v3991_v54  ;;  %v3993_v11 = vmul.f32 -1.442695, %v1839_v40  ;;  %v923_v10 = vmul.f32 %v5770_v53, %v7114_v7  ;;  %v7115_v40 = vld [vmem:[#allocation90_spill] sm:$0xff] }
 0x2ae   :  { %v5875_v18 = vpop.eup %4484  ;;  %v2473_v2 = vadd.f32 1.0, %v4483_v49  ;;  %4504 = vpow2.f32 %v3990_v41  ;;  %v3992_v16 = vmul.f32 -1.442695, %v1838_v60  ;;  %v1546_v31 = vpop.permute.xlu1 %1545  ;;  %v922_v41 = vmul.f32 %v5777_v48, %v7115_v40 }
 0x2af   :  { %7112 = vst [vmem:[#allocation62_spill] sm:$0xff] %v5875_v18  ;;  %v1542_v32 = vpop.permute.xlu0 %1541  ;;  %v5877_v37 = vpop.eup %4486  ;;  %4506 = vrcp.f32 %v2470_v0  ;;  %v1841_v5 = vsub.f32 %v921_v27, %v1546_v31  ;;  %v7118_v18 = vld [vmem:[#allocation91_spill] sm:$0xff] }
 0x2b0   :  { %7113 = vst [vmem:[#allocation63_spill] sm:$0xff] %v5877_v37  ;;  %v1840_v15 = vsub.f32 %v920_v59, %v1542_v32  ;;  %v4489_v43 = vpop.eup %4488  ;;  %4508 = vrcp.f32 %v2473_v2  ;;  %2961 = vbcast.lane.b32.xlu1 %v5871_v63, 264  ;;  %2957 = vbcast.lane.b32.xlu0 %v5871_v63, 256  ;;  %v925_v37 = vmul.f32 %v5794_v56, %v7118_v18 }
 0x2b1   :  { %v4491_v54 = vpop.eup %4490  ;;  %v2472_v60 = vadd.f32 1.0, %v4489_v43  ;;  %4510 = vpow2.f32 %v3993_v11  ;;  %v3995_v13 = vmul.f32 -1.442695, %v1841_v5  ;;  %v5895_v11 = vrot.slane %v5717_v36, %v4768_v17  ;;  %v7120_v5 = vld [vmem:[#allocation92_spill] sm:$0xff]  ;;  %v7122_v17 = vld [vmem:[#allocation93_spill] sm:$0xff] }
 0x2b2   :  { %v5885_v49 = vpop.eup %4492  ;;  %v2475_v27 = vadd.f32 1.0, %v4491_v54  ;;  %4512 = vpow2.f32 %v3992_v16  ;;  %v1557_v25 = vpop.permute.xlu1 %1556  ;;  %v3994_v2 = vmul.f32 -1.442695, %v1840_v15  ;;  %v927_v36 = vmul.f32 %v5770_v53, %v7122_v17  ;;  %v7126_v17 = vld [vmem:[#allocation95_spill] sm:$0xff] }
 0x2b3   :  { %7116 = vst [vmem:[#allocation64_spill] sm:$0xff] %v5885_v49  ;;  %v1553_v59 = vpop.permute.xlu0 %1552  ;;  %v4495_v0 = vpop.eup %4494  ;;  %4514 = vrcp.f32 %v2472_v60  ;;  %v1843_v31 = vsub.f32 %v923_v10, %v1557_v25  ;;  %v924_v10 = vmul.f32 %v5801_v24, %v7120_v5 }
 0x2b4   :  { %v1842_v32 = vsub.f32 %v922_v41, %v1553_v59  ;;  %v5887_v7 = vpop.eup %4496  ;;  %4516 = vrcp.f32 %v2475_v27  ;;  %v2474_v43 = vadd.f32 1.0, %v4495_v0  ;;  %2946 = vbcast.lane.b32.xlu1 %v5849_v38, 272  ;;  %2912 = vbcast.lane.b32.xlu0 %v5787_v6, 280  ;;  %v7123_v59 = vld [vmem:[#allocation94_spill] sm:$0xff] }
 0x2b5   :  { %7117 = vst [vmem:[#allocation65_spill] sm:$0xff] %v5887_v7  ;;  %v5897_v16 = vpop.eup %4498  ;;  %4518 = vpow2.f32 %v3995_v13  ;;  %v3997_v15 = vmul.f32 -1.442695, %v1843_v31  ;;  %v926_v0 = vmul.f32 %v5777_v48, %v7123_v59  ;;  %v929_v59 = vmul.f32 %v5794_v56, %v7126_v17  ;;  %v7127_v7 = vld [vmem:[#allocation96_spill] sm:$0xff] }
 0x2b6   :  { %7119 = vst [vmem:[#allocation66_spill] sm:$0xff] %v5897_v16  ;;  %v3996_v54 = vmul.f32 -1.442695, %v1842_v32  ;;  %v5901_v40 = vpop.eup %4500  ;;  %4520 = vrcp.f32 %v2474_v43  ;;  %v1565_v18 = vpop.permute.xlu1 %1564  ;;  %v928_v16 = vmul.f32 %v5801_v24, %v7127_v7 }
 0x2b7   :  { %7121 = vst [vmem:[#allocation67_spill] sm:$0xff] %v5901_v40  ;;  %v1561_v41 = vpop.permute.xlu0 %1560  ;;  %v4503_v60 = vpop.eup %4502  ;;  %4522 = vpow2.f32 %v3994_v2  ;;  %v1845_v6 = vsub.f32 %v925_v37, %v1565_v18 }
 0x2b8   :  { %v1844_v27 = vsub.f32 %v924_v10, %v1561_v41  ;;  %v4505_v25 = vpop.eup %4504  ;;  %v2477_v5 = vadd.f32 1.0, %v4503_v60  ;;  %4524 = vpow2.f32 %v3997_v15  ;;  %2980 = vbcast.lane.b32.xlu1 %v5895_v11, 264  ;;  %2976 = vbcast.lane.b32.xlu0 %v5895_v11, 256 }
 0x2b9   :  { %v5909_v13 = vpop.eup %4506  ;;  %v2476_v31 = vadd.f32 1.0, %v4505_v25  ;;  %4526 = vpow2.f32 %v3996_v54  ;;  %v3999_v2 = vmul.f32 -1.442695, %v1845_v6 }
 0x2ba   :  { %7124 = vst [vmem:[#allocation68_spill] sm:$0xff] %v5909_v13  ;;  %v3998_v37 = vmul.f32 -1.442695, %v1844_v27  ;;  %v5911_v32 = vpop.eup %4508  ;;  %4528 = vrcp.f32 %v2477_v5  ;;  %v1576_v43 = vpop.permute.xlu1 %1575 }
 0x2bb   :  { %7125 = vst [vmem:[#allocation69_spill] sm:$0xff] %v5911_v32  ;;  %v1572_v10 = vpop.permute.xlu0 %1571  ;;  %v4511_v18 = vpop.eup %4510  ;;  %4530 = vrcp.f32 %v2476_v31  ;;  %v1847_v41 = vsub.f32 %v927_v36, %v1576_v43 }
 0x2bc   :  { %v1846_v60 = vsub.f32 %v926_v0, %v1572_v10  ;;  %v4513_v15 = vpop.eup %4512  ;;  %v2479_v25 = vadd.f32 1.0, %v4511_v18  ;;  %4532 = vpow2.f32 %v3999_v2  ;;  %2965 = vbcast.lane.b32.xlu1 %v5871_v63, 272  ;;  %2931 = vbcast.lane.b32.xlu0 %v5811_v42, 280 }
 0x2bd   :  { %v5919_v54 = vpop.eup %4514  ;;  %v2478_v6 = vadd.f32 1.0, %v4513_v15  ;;  %4534 = vpow2.f32 %v3998_v37  ;;  %v4001_v27 = vmul.f32 -1.442695, %v1847_v41  ;;  %v7131_v37 = vld [vmem:[#allocation97_spill] sm:$0xff] }
 0x2be   :  { %7128 = vst [vmem:[#allocation70_spill] sm:$0xff] %v5919_v54  ;;  %v4000_v36 = vmul.f32 -1.442695, %v1846_v60  ;;  %v5921_v0 = vpop.eup %4516  ;;  %4536 = vrcp.f32 %v2479_v25  ;;  %v1584_v5 = vpop.permute.xlu1 %1583  ;;  %v931_v41 = vmul.f32 %v5770_v53, %v7131_v37  ;;  %v7132_v60 = vld [vmem:[#allocation98_spill] sm:$0xff] }
 0x2bf   :  { %7129 = vst [vmem:[#allocation71_spill] sm:$0xff] %v5921_v0  ;;  %v1580_v31 = vpop.permute.xlu0 %1579  ;;  %v4519_v43 = vpop.eup %4518  ;;  %4538 = vrcp.f32 %v2478_v6  ;;  %v1849_v7 = vsub.f32 %v929_v59, %v1584_v5  ;;  %v930_v15 = vmul.f32 %v5777_v48, %v7132_v60 }
 0x2c0   :  { %v1848_v10 = vsub.f32 %v928_v16, %v1580_v31  ;;  %v5923_v2 = vpop.eup %4520  ;;  %v2481_v18 = vadd.f32 1.0, %v4519_v43  ;;  %4540 = vpow2.f32 %v4001_v27  ;;  %2984 = vbcast.lane.b32.xlu1 %v5895_v11, 272  ;;  %2950 = vbcast.lane.b32.xlu0 %v5849_v38, 280 }
 0x2c1   :  { %7130 = vst [vmem:[#allocation72_spill] sm:$0xff] %v5923_v2  ;;  %v4523_v42 = vpop.eup %4522  ;;  %4542 = vpow2.f32 %v4000_v36  ;;  %v4003_v17 = vmul.f32 -1.442695, %v1849_v7  ;;  %v7135_v7 = vld [vmem:[#allocation99_spill] sm:$0xff] }
 0x2c2   :  { %v4525_v25 = vpop.eup %4524  ;;  %4544 = vrcp.f32 %v2481_v18  ;;  %v2480_v16 = vadd.f32 1.0, %v4523_v42  ;;  %v4002_v59 = vmul.f32 -1.442695, %v1848_v10  ;;  %v1595_v6 = vpop.permute.xlu1 %1594  ;;  %v933_v10 = vmul.f32 %v5794_v56, %v7135_v7  ;;  %v7136_v18 = vld [vmem:[#allocation100_spill] sm:$0xff] }
 0x2c3   :  { %v1591_v5 = vpop.permute.xlu0 %1590  ;;  %v4527_v27 = vpop.eup %4526  ;;  %v2483_v31 = vadd.f32 1.0, %v4525_v25  ;;  %4546 = vpow2.f32 %v4003_v17  ;;  %v1851_v43 = vsub.f32 %v931_v41, %v1595_v6  ;;  %v932_v42 = vmul.f32 %v5801_v24, %v7136_v18  ;;  %v3672_v41 = vld [vmem:[%s6822_s4 + $0x8] sm:$0xff]  ;;  %v7139_v18 = vld [vmem:[#allocation101_spill] sm:$0xff] }
 0x2c4   :  { %v1850_v38 = vsub.f32 %v930_v15, %v1591_v5  ;;  %v5931_v32 = vpop.eup %4528  ;;  %4548 = vrcp.f32 %v2480_v16  ;;  %v2482_v37 = vadd.f32 1.0, %v4527_v27  ;;  %2988 = vbcast.lane.b32.xlu1 %v5895_v11, 280  ;;  %2969 = vbcast.lane.b32.xlu0 %v5871_v63, 280  ;;  %v3671_v11 = vld [vmem:[%s6822_s4] sm:$0xff] }
 0x2c5   :  { %7133 = vst [vmem:[#allocation73_spill] sm:$0xff] %v5931_v32  ;;  %v5935_v36 = vpop.eup %4530  ;;  %4550 = vrcp.f32 %v2483_v31  ;;  %v4005_v60 = vmul.f32 -1.442695, %v1851_v43  ;;  %v935_v32 = vmul.f32 %v5770_v53, %v7139_v18 }
 0x2c6   :  { %7134 = vst [vmem:[#allocation74_spill] sm:$0xff] %v5935_v36  ;;  %v4533_v15 = vpop.eup %4532  ;;  %4552 = vrcp.f32 %v2482_v37  ;;  %v4004_v63 = vmul.f32 -1.442695, %v1850_v38  ;;  %v1603_v17 = vpop.permute.xlu1 %1602  ;;  %v7140_v37 = vld [vmem:[#allocation102_spill] sm:$0xff] }
 0x2c7   :  { %v1599_v25 = vpop.permute.xlu0 %1598  ;;  %v4535_v16 = vpop.eup %4534  ;;  %v2485_v6 = vadd.f32 1.0, %v4533_v15  ;;  %4554 = vpow2.f32 %v4002_v59  ;;  %v1853_v5 = vsub.f32 %v933_v10, %v1603_v17  ;;  %v934_v38 = vmul.f32 %v5777_v48, %v7140_v37  ;;  %v3673_v59 = vld [vmem:[%s6822_s4 + $0x10] sm:$0xff]  ;;  %v3793_v10 = vld [vmem:[%s6823_s5] sm:$0xff]  ;;  %v7142_v37 = vld [vmem:[#allocation103_spill] sm:$0xff] }
 0x2c8   :  { %v1852_v27 = vsub.f32 %v932_v42, %v1599_v25  ;;  %v5947_v31 = vpop.eup %4536  ;;  %v2484_v43 = vadd.f32 1.0, %v4535_v16  ;;  %4556 = vpow2.f32 %v4005_v60  ;;  %3683 = vperm.xlu1 %4039, %v3672_v41   ;;  %3678 = vperm.xlu0 %4038, %v3671_v11  }
 0x2c9   :  { %7137 = vst [vmem:[#allocation75_spill] sm:$0xff] %v5947_v31  ;;  %v5949_v7 = vpop.eup %4538  ;;  %4558 = vrcp.f32 %v2485_v6  ;;  %v4007_v36 = vmul.f32 -1.442695, %v1853_v5  ;;  %v7143_v31 = vld [vmem:[#allocation104_spill] sm:$0xff] }
 0x2ca   :  { %7138 = vst [vmem:[#allocation76_spill] sm:$0xff] %v5949_v7  ;;  %v4541_v42 = vpop.eup %4540  ;;  %4560 = vrcp.f32 %v2484_v43  ;;  %v4006_v60 = vmul.f32 -1.442695, %v1852_v27  ;;  %v1614_v41 = vpop.permute.xlu1 %1613  ;;  %v937_v7 = vmul.f32 %v5794_v56, %v7142_v37  ;;  %v936_v27 = vmul.f32 %v5801_v24, %v7143_v31 }
 0x2cb   :  { %v1610_v11 = vpop.permute.xlu0 %1609  ;;  %v4543_v15 = vpop.eup %4542  ;;  %v2487_v17 = vadd.f32 1.0, %v4541_v42  ;;  %4562 = vpow2.f32 %v4004_v63  ;;  %v1855_v25 = vsub.f32 %v935_v32, %v1614_v41  ;;  %v3794_v32 = vld [vmem:[%s6823_s5 + $0x8] sm:$0xff]  ;;  %v3674_v63 = vld [vmem:[%s6822_s4 + $0x18] sm:$0xff] }
 0x2cc   :  { %v1854_v16 = vsub.f32 %v934_v38, %v1610_v11  ;;  %v5961_v6 = vpop.eup %4544  ;;  %v2486_v5 = vadd.f32 1.0, %v4543_v15  ;;  %4564 = vpow2.f32 %v4007_v36  ;;  %3688 = vperm.xlu1 %4039, %v3673_v59   ;;  %3800 = vperm.xlu0 %4038, %v3793_v10  }
 0x2cd   :  { %7141 = vst [vmem:[#allocation77_spill] sm:$0xff] %v5961_v6  ;;  %v4547_v18 = vpop.eup %4546  ;;  %4566 = vrcp.f32 %v2487_v17  ;;  %v4009_v43 = vmul.f32 -1.442695, %v1855_v25  ;;  %v7147_v25 = vld [vmem:[#allocation105_spill] sm:$0xff]  ;;  %v7148_v6 = vld [vmem:[#allocation106_spill] sm:$0xff] }
 0x2ce   :  { %v5973_v36 = vpop.eup %4548  ;;  %4568 = vrcp.f32 %v2486_v5  ;;  %v2489_v38 = vadd.f32 1.0, %v4547_v18  ;;  %v4008_v59 = vmul.f32 -1.442695, %v1854_v16  ;;  %v1622_v10 = vpop.permute.xlu1 %1621  ;;  %v939_v37 = vmul.f32 %v5770_v53, %v7147_v25 }
 0x2cf   :  { %7144 = vst [vmem:[#allocation78_spill] sm:$0xff] %v5973_v36  ;;  %v1618_v42 = vpop.permute.xlu0 %1617  ;;  %v5975_v41 = vpop.eup %4550  ;;  %4570 = vpow2.f32 %v4006_v60  ;;  %v1857_v31 = vsub.f32 %v937_v7, %v1622_v10  ;;  %v938_v5 = vmul.f32 %v5777_v48, %v7148_v6  ;;  %v3795_v60 = vld [vmem:[%s6823_s5 + $0x10] sm:$0xff]  ;;  %v3675_v7 = vld [vmem:[%s6822_s4 + $0x20] sm:$0xff]  ;;  %v7151_v36 = vld [vmem:[#allocation109_spill] sm:$0xff] }
 0x2d0   :  { %7145 = vst [vmem:[#allocation79_spill] sm:$0xff] %v5975_v41  ;;  %v1856_v11 = vsub.f32 %v936_v27, %v1618_v42  ;;  %v5977_v15 = vpop.eup %4552  ;;  %4572 = vrcp.f32 %v2489_v38  ;;  %3805 = vperm.xlu1 %4039, %v3794_v32   ;;  %3693 = vperm.xlu0 %4038, %v3674_v63  }
 0x2d1   :  { %7146 = vst [vmem:[#allocation80_spill] sm:$0xff] %v5977_v15  ;;  %v4555_v17 = vpop.eup %4554  ;;  %4574 = vpow2.f32 %v4009_v43  ;;  %v4011_v16 = vmul.f32 -1.442695, %v1857_v31  ;;  %v943_v15 = vmul.f32 %v5770_v53, %v7151_v36 }
 0x2d2   :  { %v4557_v18 = vpop.eup %4556  ;;  %v2488_v27 = vadd.f32 1.0, %v4555_v17  ;;  %4576 = vpow2.f32 %v4008_v59  ;;  %v4010_v32 = vmul.f32 -1.442695, %v1856_v11  ;;  %v1633_v63 = vpop.permute.xlu1 %1632  ;;  %v7152_v17 = vld [vmem:[#allocation110_spill] sm:$0xff] }
 0x2d3   :  { %v1629_v38 = vpop.permute.xlu0 %1628  ;;  %v5989_v10 = vpop.eup %4558  ;;  %v2491_v42 = vadd.f32 1.0, %v4557_v18  ;;  %4578 = vpow2.f32 %v4011_v16  ;;  %v1859_v6 = vsub.f32 %v939_v37, %v1633_v63  ;;  %v942_v59 = vmul.f32 %v5777_v48, %v7152_v17  ;;  %v3796_v16 = vld [vmem:[%s6823_s5 + $0x18] sm:$0xff]  ;;  %v3797_v37 = vld [vmem:[%s6823_s5 + $0x20] sm:$0xff]  ;;  %v7153_v17 = vld [vmem:[#allocation108_spill] sm:$0xff] }
 0x2d4   :  { %7149 = vst [vmem:[#allocation81_spill] sm:$0xff] %v5989_v10  ;;  %v1858_v43 = vsub.f32 %v938_v5, %v1629_v38  ;;  %v5991_v31 = vpop.eup %4560  ;;  %4580 = vrcp.f32 %v2488_v27  ;;  %3810 = vperm.xlu1 %4039, %v3795_v60   ;;  %3698 = vperm.xlu0 %4038, %v3675_v7   ;;  %v940_v10 = vmul.f32 %v5801_v24, %v7153_v17 }
 0x2d5   :  { %7150 = vst [vmem:[#allocation82_spill] sm:$0xff] %v5991_v31  ;;  %v4563_v25 = vpop.eup %4562  ;;  %4582 = vrcp.f32 %v2491_v42  ;;  %v4013_v11 = vmul.f32 -1.442695, %v1859_v6 }
 0x2d6   :  { %v4565_v5 = vpop.eup %4564  ;;  %v2490_v60 = vadd.f32 1.0, %v4563_v25  ;;  %4584 = vpow2.f32 %v4010_v32  ;;  %v4012_v7 = vmul.f32 -1.442695, %v1858_v43  ;;  %v1652_v18 = vpop.permute.xlu1 %1651  ;;  %v7154_v25 = vld [vmem:[#allocation114_spill] sm:$0xff] }
 0x2d7   :  { %v1648_v27 = vpop.permute.xlu0 %1647  ;;  %v6003_v36 = vpop.eup %4566  ;;  %v2493_v63 = vadd.f32 1.0, %v4565_v5  ;;  %4586 = vpow2.f32 %v4013_v11  ;;  %v1863_v38 = vsub.f32 %v943_v15, %v1652_v18  ;;  %v946_v32 = vmul.f32 %v5777_v48, %v7154_v25 }
 0x2d8   :  { %v1862_v42 = vsub.f32 %v942_v59, %v1648_v27  ;;  %v6005_v6 = vpop.eup %4568  ;;  %4588 = vrcp.f32 %v2490_v60  ;;  %3815 = vperm.xlu1 %4039, %v3796_v16   ;;  %3820 = vperm.xlu0 %4038, %v3797_v37   ;;  %v7156_v16 = vld [vmem:[#allocation112_spill] sm:$0xff] }
 0x2d9   :  { %v4571_v31 = vpop.eup %4570  ;;  %4590 = vrcp.f32 %v2493_v63  ;;  %v4017_v43 = vmul.f32 -1.442695, %v1863_v38  ;;  %v944_v37 = vmul.f32 %v5801_v24, %v7156_v16  ;;  %v7157_v63 = vld [vmem:[#allocation113_spill] sm:$0xff] }
 0x2da   :  { %v4016_v41 = vmul.f32 -1.442695, %v1862_v42  ;;  %v6011_v54 = vpop.eup %4572  ;;  %v2492_v11 = vadd.f32 1.0, %v4571_v31  ;;  %4592 = vpow2.f32 %v4012_v7  ;;  %v1667_v15 = vpop.permute.xlu1 %1666  ;;  %v947_v38 = vmul.f32 %v5770_v53, %v7157_v63  ;;  %v7158_v16 = vld [vmem:[#allocation117_spill] sm:$0xff] }
 0x2db   :  { %7155 = vst [vmem:[#allocation83_spill] sm:$0xff] %v6011_v54  ;;  %v1637_v59 = vpop.permute.xlu0 %1636  ;;  %v4575_v5 = vpop.eup %4574  ;;  %4594 = vpow2.f32 %v4017_v43  ;;  %v1866_v18 = vsub.f32 %v946_v32, %v1667_v15  ;;  %v951_v0 = vmul.f32 %v5770_v53, %v7158_v16  ;;  %v7161_v16 = vld [vmem:[#allocation107_spill] sm:$0xff] }
 0x2dc   :  { %v1860_v27 = vsub.f32 %v940_v10, %v1637_v59  ;;  %v4577_v60 = vpop.eup %4576  ;;  %4596 = vrcp.f32 %v2492_v11  ;;  %v2495_v17 = vadd.f32 1.0, %v4575_v5  ;;  %v941_v54 = vmul.f32 %v5794_v56, %v7161_v16 }
 0x2dd   :  { %v4579_v25 = vpop.eup %4578  ;;  %v2494_v42 = vadd.f32 1.0, %v4577_v60  ;;  %4598 = vpow2.f32 %v4016_v41  ;;  %v4020_v31 = vmul.f32 -1.442695, %v1866_v18  ;;  %v7159_v41 = vld [vmem:[#allocation118_spill] sm:$0xff] }
 0x2de   :  { %v6017_v7 = vpop.eup %4580  ;;  %4600 = vrcp.f32 %v2495_v17  ;;  %v2497_v2 = vadd.f32 1.0, %v4579_v25  ;;  %v4014_v43 = vmul.f32 -1.442695, %v1860_v27  ;;  %v1656_v32 = vpop.permute.xlu1 %1655  ;;  %v950_v18 = vmul.f32 %v5777_v48, %v7159_v41 }
 0x2df   :  { %v1671_v10 = vpop.permute.xlu0 %1670  ;;  %v6019_v15 = vpop.eup %4582  ;;  %4602 = vrcp.f32 %v2494_v42  ;;  %v1864_v59 = vsub.f32 %v944_v37, %v1656_v32 }
 0x2e0   :  { %v1867_v11 = vsub.f32 %v947_v38, %v1671_v10  ;;  %v4585_v5 = vpop.eup %4584  ;;  %4604 = vrcp.f32 %v2497_v2 }
 0x2e1   :  { %v4587_v60 = vpop.eup %4586  ;;  %v2496_v63 = vadd.f32 1.0, %v4585_v5  ;;  %4606 = vpow2.f32 %v4020_v31  ;;  %v4018_v17 = vmul.f32 -1.442695, %v1864_v59  ;;  %v7162_v31 = vld [vmem:[#allocation116_spill] sm:$0xff] }
 0x2e2   :  { %v6025_v27 = vpop.eup %4588  ;;  %v2499_v25 = vadd.f32 1.0, %v4587_v60  ;;  %4608 = vpow2.f32 %v4014_v43  ;;  %v4021_v40 = vmul.f32 -1.442695, %v1867_v11  ;;  %v1690_v42 = vpop.permute.xlu1 %1689  ;;  %v948_v59 = vmul.f32 %v5801_v24, %v7162_v31 }
 0x2e3   :  { %v1686_v37 = vpop.permute.xlu0 %1685  ;;  %v6027_v38 = vpop.eup %4590  ;;  %4610 = vrcp.f32 %v2496_v63  ;;  %v1871_v32 = vsub.f32 %v951_v0, %v1690_v42 }
 0x2e4   :  { %7160 = vst [vmem:[#allocation84_spill] sm:$0xff] %v6027_v38  ;;  %v1870_v10 = vsub.f32 %v950_v18, %v1686_v37  ;;  %v4593_v2 = vpop.eup %4592  ;;  %4612 = vrcp.f32 %v2499_v25  ;;  %v7163_v25 = vld [vmem:[#allocation121_spill] sm:$0xff] }
 0x2e5   :  { %v4595_v5 = vpop.eup %4594  ;;  %v2498_v41 = vadd.f32 1.0, %v4593_v2  ;;  %4614 = vpow2.f32 %v4018_v17  ;;  %v4025_v43 = vmul.f32 -1.442695, %v1871_v32  ;;  %v955_v13 = vmul.f32 %v5770_v53, %v7163_v25  ;;  %v7164_v32 = vld [vmem:[#allocation122_spill] sm:$0xff] }
 0x2e6   :  { %v6033_v11 = vpop.eup %4596  ;;  %v2503_v60 = vadd.f32 1.0, %v4595_v5  ;;  %4616 = vpow2.f32 %v4021_v40  ;;  %v1675_v38 = vpop.permute.xlu1 %1674  ;;  %v4024_v18 = vmul.f32 -1.442695, %v1870_v10  ;;  %v954_v5 = vmul.f32 %v5777_v48, %v7164_v32 }
 0x2e7   :  { %v1641_v63 = vpop.permute.xlu0 %1640  ;;  %v4599_v0 = vpop.eup %4598  ;;  %4618 = vrcp.f32 %v2498_v41  ;;  %v1868_v42 = vsub.f32 %v948_v59, %v1675_v38 }
 0x2e8   :  { %v1861_v37 = vsub.f32 %v941_v54, %v1641_v63  ;;  %v6035_v16 = vpop.eup %4600  ;;  %4620 = vrcp.f32 %v2503_v60  ;;  %v2502_v2 = vadd.f32 1.0, %v4599_v0  ;;  %v7166_v60 = vld [vmem:[#allocation111_spill] sm:$0xff]  ;;  %v7167_v0 = vld [vmem:[#allocation120_spill] sm:$0xff] }
 0x2e9   :  { %v6039_v17 = vpop.eup %4602  ;;  %4622 = vpow2.f32 %v4025_v43  ;;  %v4022_v40 = vmul.f32 -1.442695, %v1868_v42  ;;  %v945_v63 = vmul.f32 %v5794_v56, %v7166_v60  ;;  %v952_v25 = vmul.f32 %v5801_v24, %v7167_v0 }
 0x2ea   :  { %v4015_v31 = vmul.f32 -1.442695, %v1861_v37  ;;  %v6043_v49 = vpop.eup %4604  ;;  %4624 = vrcp.f32 %v2502_v2  ;;  %v1709_v38 = vpop.permute.xlu1 %1708 }
 0x2eb   :  { %7165 = vst [vmem:[#allocation85_spill] sm:$0xff] %v6043_v49  ;;  %v1705_v54 = vpop.permute.xlu0 %1704  ;;  %v4607_v10 = vpop.eup %4606  ;;  %4626 = vpow2.f32 %v4024_v18  ;;  %v1875_v59 = vsub.f32 %v955_v13, %v1709_v38  ;;  %v7169_v49 = vld [vmem:[#allocation115_spill] sm:$0xff] }
 0x2ec   :  { %v1874_v41 = vsub.f32 %v954_v5, %v1705_v54  ;;  %v4609_v53 = vpop.eup %4608  ;;  %v2506_v48 = vadd.f32 1.0, %v4607_v10  ;;  %4628 = vpow2.f32 %v4022_v40  ;;  %v949_v10 = vmul.f32 %v5794_v56, %v7169_v49  ;;  %v7170_v40 = vld [vmem:[#allocation124_spill] sm:$0xff] }
 0x2ed   :  { %v6049_v43 = vpop.eup %4610  ;;  %v2500_v42 = vadd.f32 1.0, %v4609_v53  ;;  %4630 = vpow2.f32 %v4015_v31  ;;  %v4029_v37 = vmul.f32 -1.442695, %v1875_v59  ;;  %v956_v0 = vmul.f32 %v5801_v24, %v7170_v40 }
 0x2ee   :  { %7168 = vst [vmem:[#allocation86_spill] sm:$0xff] %v6049_v43  ;;  %v4028_v2 = vmul.f32 -1.442695, %v1874_v41  ;;  %v6051_v32 = vpop.eup %4612  ;;  %4632 = vrcp.f32 %v2506_v48  ;;  %v1694_v13 = vpop.permute.xlu1 %1693 }
 0x2ef   :  { %v1660_v18 = vpop.permute.xlu0 %1659  ;;  %v4615_v5 = vpop.eup %4614  ;;  %4634 = vrcp.f32 %v2500_v42  ;;  %v1872_v38 = vsub.f32 %v952_v25, %v1694_v13 }
 0x2f0   :  { %v1865_v54 = vsub.f32 %v945_v63, %v1660_v18  ;;  %v4617_v60 = vpop.eup %4616  ;;  %v2504_v53 = vadd.f32 1.0, %v4615_v5  ;;  %4636 = vpow2.f32 %v4029_v37  ;;  %v7173_v5 = vld [vmem:[#allocation119_spill] sm:$0xff] }
 0x2f1   :  { %v6057_v31 = vpop.eup %4618  ;;  %v2507_v59 = vadd.f32 1.0, %v4617_v60  ;;  %4638 = vpow2.f32 %v4028_v2  ;;  %v4026_v41 = vmul.f32 -1.442695, %v1872_v38  ;;  %v953_v60 = vmul.f32 %v5794_v56, %v7173_v5  ;;  %v7174_v2 = vld [vmem:[#allocation123_spill] sm:$0xff] }
 0x2f2   :  { %v4019_v48 = vmul.f32 -1.442695, %v1865_v54  ;;  %v6059_v43 = vpop.eup %4620  ;;  %4640 = vrcp.f32 %v2504_v53  ;;  %v1713_v25 = vpop.permute.xlu1 %1712  ;;  %v957_v38 = vmul.f32 %v5794_v56, %v7174_v2 }
 0x2f3   :  { %7171 = vst [vmem:[#allocation87_spill] sm:$0xff] %v6059_v43  ;;  %v1679_v63 = vpop.permute.xlu0 %1678  ;;  %v4623_v42 = vpop.eup %4622  ;;  %4642 = vrcp.f32 %v2507_v59  ;;  %v1876_v13 = vsub.f32 %v956_v0, %v1713_v25 }
 0x2f4   :  { %v1869_v49 = vsub.f32 %v949_v10, %v1679_v63  ;;  %v6061_v18 = vpop.eup %4624  ;;  %v2511_v24 = vadd.f32 1.0, %v4623_v42  ;;  %4644 = vpow2.f32 %v4026_v41 }
 0x2f5   :  { %7172 = vst [vmem:[#allocation88_spill] sm:$0xff] %v6061_v18  ;;  %v4627_v37 = vpop.eup %4626  ;;  %4646 = vpow2.f32 %v4019_v48  ;;  %v4030_v54 = vmul.f32 -1.442695, %v1876_v13 }
 0x2f6   :  { %v4629_v40 = vpop.eup %4628  ;;  %4648 = vrcp.f32 %v2511_v24  ;;  %v2510_v53 = vadd.f32 1.0, %v4627_v37  ;;  %v4023_v43 = vmul.f32 -1.442695, %v1869_v49  ;;  %v1717_v59 = vpop.permute.xlu1 %1716 }
 0x2f7   :  { %v1698_v0 = vpop.permute.xlu0 %1697  ;;  %v4631_v10 = vpop.eup %4630  ;;  %v2508_v25 = vadd.f32 1.0, %v4629_v40  ;;  %4650 = vpow2.f32 %v4030_v54  ;;  %v1877_v63 = vsub.f32 %v957_v38, %v1717_v59 }
 0x2f8   :  { %v1873_v41 = vsub.f32 %v953_v60, %v1698_v0  ;;  %v6067_v42 = vpop.eup %4632  ;;  %4652 = vrcp.f32 %v2510_v53  ;;  %v2501_v5 = vadd.f32 1.0, %v4631_v10 }
 0x2f9   :  { %v6069_v18 = vpop.eup %4634  ;;  %4654 = vrcp.f32 %v2508_v25  ;;  %v4031_v56 = vmul.f32 -1.442695, %v1877_v63 }
 0x2fa   :  { %v4637_v48 = vpop.eup %4636  ;;  %4656 = vrcp.f32 %v2501_v5  ;;  %v2848_v13 = vpop.permute.xlu1 %2847  ;;  %v4027_v37 = vmul.f32 -1.442695, %v1873_v41 }
 0x2fb   :  { %v4639_v24 = vpop.eup %4638  ;;  %v2515_v49 = vadd.f32 1.0, %v4637_v48  ;;  %4658 = vpow2.f32 %v4023_v43  ;;  %v2844_v2 = vpop.permute.xlu0 %2843  ;;  %v2991_v54 = vmul.f32 %v5270_v29, %v2848_v13  ;;  %v3023_v53 = vmul.f32 %v5419_v23, %v2848_v13 }
 0x2fc   :  { %v6071_v40 = vpop.eup %4640  ;;  %4660 = vpow2.f32 %v4031_v56  ;;  %v2514_v38 = vadd.f32 1.0, %v4639_v24  ;;  %v3119_v59 = vmul.f32 %v6003_v36, %v2848_v13  ;;  %v3055_v10 = vmul.f32 %v5588_v57, %v2848_v13 }
 0x2fd   :  { %v6073_v60 = vpop.eup %4642  ;;  %4662 = vrcp.f32 %v2515_v49  ;;  %v3087_v43 = vmul.f32 %v5805_v62, %v2848_v13  ;;  %v2990_v25 = vmul.f32 %v5276_v28, %v2844_v2  ;;  %v3022_v5 = vmul.f32 %v5423_v58, %v2844_v2 }
 0x2fe   :  { %v4645_v0 = vpop.eup %4644  ;;  %4664 = vpow2.f32 %v4027_v37  ;;  %v3054_v23 = vmul.f32 %v5590_v20, %v2844_v2  ;;  %v3086_v36 = vmul.f32 %v5817_v45, %v2844_v2  ;;  %v3118_v48 = vmul.f32 %v6005_v6, %v2844_v2  ;;  %v2867_v24 = vpop.permute.xlu1 %2866 }
 0x2ff   :  { %v4647_v63 = vpop.eup %4646  ;;  %v2512_v41 = vadd.f32 1.0, %v4645_v0  ;;  %4666 = vrcp.f32 %v2514_v38  ;;  %v3152_v62 = vsel %vm3150_vm0, %v2991_v54, 0.0  ;;  %v3256_v28 = vsel %vm3150_vm0, %v3023_v53, 0.0  ;;  %v2863_v53 = vpop.permute.xlu0 %2862 }
 0x300   :  { %v6082_v56 = vpop.eup %4648  ;;  %v2505_v29 = vadd.f32 1.0, %v4647_v63  ;;  %v3568_v13 = vsel %vm3150_vm0, %v3119_v59, 0.0  ;;  %v3360_v58 = vsel %vm3150_vm0, %v3055_v10, 0.0  ;;  %v3464_v20 = vsel %vm3150_vm0, %v3087_v43, 0.0 }
 0x301   :  { %v4651_v57 = vpop.eup %4650  ;;  %4668 = vrcp.f32 %v2512_v41  ;;  %v3151_v45 = vsel %vm3150_vm0, %v2990_v25, 0.0  ;;  %v3255_v2 = vsel %vm3150_vm0, %v3022_v5, 0.0  ;;  %v3567_v38 = vsel %vm3150_vm0, %v3118_v48, 0.0 }
 0x302   :  { %v6090_v49 = vpop.eup %4652  ;;  %v2516_v6 = vadd.f32 1.0, %v4651_v57  ;;  %v2995_v54 = vmul.f32 %v5288_v19, %v2867_v24  ;;  %4670 = vrcp.f32 %v2505_v29  ;;  %v3359_v0 = vsel %vm3150_vm0, %v3054_v23, 0.0 }
 0x303   :  { %v6095_v37 = vpop.eup %4654  ;;  %v3463_v10 = vsel %vm3150_vm0, %v3086_v36, 0.0  ;;  %v6104_v43 = vadd.f32 %v3568_v13, %v3567_v38  ;;  %v3027_v63 = vmul.f32 %v5437_v30, %v2867_v24  ;;  %v3059_v41 = vmul.f32 %v5608_v8, %v2867_v24 }
 0x304   :  { %7175 = vst [vmem:[#allocation89_spill] sm:$0xff] %v6095_v37  ;;  %v6100_v59 = vpop.eup %4656  ;;  %v3091_v5 = vmul.f32 %v5829_v9, %v2867_v24  ;;  %v3123_v48 = vmul.f32 %v6019_v15, %v2867_v24  ;;  %v6110_v37 = vadd.f32 %v3152_v62, %v3151_v45  ;;  %v2994_v29 = vmul.f32 %v5294_v47, %v2863_v53  ;;  %v2886_v62 = vpop.permute.xlu1 %2885 }
 0x305   :  { %v4659_v25 = vpop.eup %4658  ;;  %v3026_v23 = vmul.f32 %v5443_v4, %v2863_v53  ;;  %4672 = vrcp.f32 %v2516_v6  ;;  %v6114_v13 = vadd.f32 %v3256_v28, %v3255_v2  ;;  %v6116_v38 = vadd.f32 %v3360_v58, %v3359_v0 }
 0x306   :  { %v4661_v19 = vpop.eup %4660  ;;  %v2509_v57 = vadd.f32 1.0, %v4659_v25  ;;  %v6120_v8 = vadd.f32 %v3464_v20, %v3463_v10  ;;  %v3165_v9 = vsel %vm3150_vm0, %v2995_v54, 0.0  ;;  %v3058_v15 = vmul.f32 %v5616_v46, %v2863_v53  ;;  %v2882_v10 = vpop.permute.xlu0 %2881 }
 0x307   :  { %v2517_v36 = vadd.f32 1.0, %v4661_v19  ;;  %v6118_v30 = vpop.eup %4662  ;;  %v3122_v24 = vmul.f32 %v6025_v27, %v2863_v53  ;;  %v3269_v4 = vsel %vm3150_vm0, %v3027_v63, 0.0  ;;  %v3373_v45 = vsel %vm3150_vm0, %v3059_v41, 0.0 }
 0x308   :  { %v4665_v47 = vpop.eup %4664  ;;  %v3477_v28 = vsel %vm3150_vm0, %v3091_v5, 0.0  ;;  %v3581_v58 = vsel %vm3150_vm0, %v3123_v48, 0.0  ;;  %4674 = vrcp.f32 %v2509_v57  ;;  %v3090_v20 = vmul.f32 %v5831_v34, %v2863_v53 }
 0x309   :  { %v3164_v6 = vsel %vm3150_vm0, %v2994_v29, 0.0  ;;  %v3268_v2 = vsel %vm3150_vm0, %v3026_v23, 0.0  ;;  %v6132_v46 = vpop.eup %4666  ;;  %4676 = vrcp.f32 %v2517_v36  ;;  %v3372_v27 = vsel %vm3150_vm0, %v3058_v15, 0.0 }
 0x30a   :  { %v3580_v54 = vsel %vm3150_vm0, %v3122_v24, 0.0  ;;  %v2999_v0 = vmul.f32 %v5306_v26, %v2886_v62  ;;  %v2513_v63 = vadd.f32 1.0, %v4665_v47  ;;  %v3031_v34 = vmul.f32 %v5455_v39, %v2886_v62  ;;  %v2871_v24 = vpop.permute.xlu1 %2870 }
 0x30b   :  { %v6137_v25 = vpop.eup %4668  ;;  %v3582_v41 = vadd.f32 %v3581_v58, %v3580_v54  ;;  %v3063_v53 = vmul.f32 %v5636_v14, %v2886_v62  ;;  %v3166_v5 = vadd.f32 %v3165_v9, %v3164_v6  ;;  %v3270_v48 = vadd.f32 %v3269_v4, %v3268_v2  ;;  %v2852_v58 = vpop.permute.xlu0 %2851 }
 0x30c   :  { %v3095_v19 = vmul.f32 %v5853_v51, %v2886_v62  ;;  %v3127_v57 = vmul.f32 %v6035_v16, %v2886_v62  ;;  %v6143_v29 = vpop.eup %4670  ;;  %v3374_v23 = vadd.f32 %v3373_v45, %v3372_v27  ;;  %v3476_v26 = vsel %vm3150_vm0, %v3090_v20, 0.0 }
 0x30d   :  { %v2998_v36 = vmul.f32 %v5312_v21, %v2882_v10  ;;  %v3030_v15 = vmul.f32 %v5457_v50, %v2882_v10  ;;  %v3062_v14 = vmul.f32 %v5638_v33, %v2882_v10  ;;  %v3094_v9 = vmul.f32 %v5861_v22, %v2882_v10 }
 0x30e   :  { %v3490_v39 = vsel %vm3150_vm0, %v3095_v19, 0.0  ;;  %v3126_v51 = vmul.f32 %v6039_v17, %v2882_v10  ;;  %v3178_v16 = vsel %vm3150_vm0, %v2999_v0, 0.0  ;;  %v3282_v62 = vsel %vm3150_vm0, %v3031_v34, 0.0 }
 0x30f   :  { %v3386_v47 = vsel %vm3150_vm0, %v3063_v53, 0.0  ;;  %v3594_v4 = vsel %vm3150_vm0, %v3127_v57, 0.0  ;;  %v6156_v21 = vpop.eup %4672  ;;  %v3177_v50 = vsel %vm3150_vm0, %v2998_v36, 0.0  ;;  %v3281_v45 = vsel %vm3150_vm0, %v3030_v15, 0.0  ;;  %v2905_v15 = vpop.permute.xlu1 %2904 }
 0x310   :  { %7176 = vst [vmem:[#allocation90_spill] sm:$0xff] %v6156_v21  ;;  %v3489_v33 = vsel %vm3150_vm0, %v3094_v9, 0.0  ;;  %v2996_v22 = vmul.f32 %v5302_v1, %v2871_v24  ;;  %v3593_v20 = vsel %vm3150_vm0, %v3126_v51, 0.0  ;;  %v3028_v6 = vmul.f32 %v5447_v55, %v2871_v24 }
 0x311   :  { %v6162_v17 = vadd.f32 %v3490_v39, %v3489_v33  ;;  %v3060_v2 = vmul.f32 %v5634_v35, %v2871_v24  ;;  %v3385_v27 = vsel %vm3150_vm0, %v3062_v14, 0.0  ;;  %v6168_v54 = vadd.f32 %v3594_v4, %v3593_v20  ;;  %v2901_v4 = vpop.permute.xlu0 %2900 }
 0x312   :  { %v3092_v0 = vmul.f32 %v5841_v3, %v2871_v24  ;;  %v3124_v10 = vmul.f32 %v6033_v11, %v2871_v24  ;;  %v6172_v34 = vpop.eup %4674  ;;  %4678 = vrcp.f32 %v2513_v63  ;;  %v3478_v1 = vadd.f32 %v3477_v28, %v3476_v26 }
 0x313   :  { %7177 = vst [vmem:[#allocation91_spill] sm:$0xff] %v6172_v34  ;;  %v6174_v53 = vadd.f32 %v3178_v16, %v3177_v50  ;;  %v2992_v19 = vmul.f32 %v5286_v44, %v2852_v58  ;;  %v6177_v57 = vpop.eup %4676  ;;  %v6179_v55 = vadd.f32 %v3282_v62, %v3281_v45  ;;  %v3167_v35 = vsel %vm3150_vm0, %v2996_v22, 0.0  ;;  %v7179_v62 = vld [vmem:[#allocation129_spill] sm:$0xff]  ;;  %v7181_v45 = vld [vmem:[#allocation39_spill] sm:$0xff] }
 0x314   :  { %7178 = vst [vmem:[#allocation92_spill] sm:$0xff] %v6177_v57  ;;  %v3271_v36 = vsel %vm3150_vm0, %v3028_v6, 0.0  ;;  %v3583_v3 = vsel %vm3150_vm0, %v3124_v10, 0.0  ;;  %v6184_v11 = vadd.f32 %v3386_v47, %v3385_v27  ;;  %v3375_v63 = vsel %vm3150_vm0, %v3060_v2, 0.0  ;;  %v7183_v6 = vld [vmem:[#allocation130_spill] sm:$0xff]  ;;  %v2920_v2 = vpop.permute.xlu1 %2919 }
 0x315   :  { %v3479_v28 = vsel %vm3150_vm0, %v3092_v0, 0.0  ;;  %v6188_v26 = vadd.f32 %v3583_v3, %v3582_v41  ;;  %v3024_v44 = vmul.f32 %v5435_v61, %v2852_v58  ;;  %v3056_v24 = vmul.f32 %v5602_v12, %v2852_v58  ;;  %v7184_v0 = vld [vmem:[#allocation16_spill] sm:$0xff] }
 0x316   :  { %v3120_v39 = vmul.f32 %v6017_v7, %v2852_v58  ;;  %v3154_v14 = vsel %vm3150_vm0, %v2992_v19, 0.0  ;;  %v6194_v9 = vadd.f32 %v3167_v35, %v3166_v5  ;;  %v6196_v51 = vadd.f32 %v3271_v36, %v3270_v48  ;;  %v7180_v5 = vld [vmem:[#allocation15_spill] sm:$0xff]  ;;  %v7186_v3 = vld [vmem:[#allocation64_spill] sm:$0xff] }
 0x317   :  { %v3088_v16 = vmul.f32 %v5821_v52, %v2852_v58  ;;  %v3003_v47 = vmul.f32 %v7179_v62, %v2905_v15  ;;  %v6200_v50 = vadd.f32 %v3375_v63, %v3374_v23  ;;  %v6202_v41 = vadd.f32 %v3479_v28, %v3478_v1  ;;  %v7182_v52 = vld [vmem:[#allocation63_spill] sm:$0xff]  ;;  %v7185_v1 = vld [vmem:[#allocation40_spill] sm:$0xff] }
 0x318   :  { %v6205_v61 = vadd.f32 %v3154_v14, %v6110_v37  ;;  %v3570_v12 = vsel %vm3150_vm0, %v3120_v39, 0.0  ;;  %v3035_v48 = vmul.f32 %v7180_v5, %v2905_v15  ;;  %v3067_v33 = vmul.f32 %v7181_v45, %v2905_v15  ;;  %v7190_v45 = vld [vmem:[#allocation44_spill] sm:$0xff] }
 0x319   :  { %v6209_v7 = vadd.f32 %v3570_v12, %v6104_v43  ;;  %v3099_v22 = vmul.f32 %v7182_v52, %v2905_v15  ;;  %v3258_v58 = vsel %vm3150_vm0, %v3024_v44, 0.0  ;;  %v3362_v23 = vsel %vm3150_vm0, %v3056_v24, 0.0  ;;  %v2890_v52 = vpop.permute.xlu0 %2889 }
 0x31a   :  { %v3131_v20 = vmul.f32 %v6051_v32, %v2905_v15  ;;  %v3002_v37 = vmul.f32 %v7183_v6, %v2901_v4  ;;  %v3466_v27 = vsel %vm3150_vm0, %v3088_v16, 0.0  ;;  %v3191_v43 = vsel %vm3150_vm0, %v3003_v47, 0.0  ;;  %v7188_v47 = vld [vmem:[#allocation134_spill] sm:$0xff]  ;;  %v7191_v6 = vld [vmem:[#allocation68_spill] sm:$0xff] }
 0x31b   :  { %v3034_v10 = vmul.f32 %v7184_v0, %v2901_v4  ;;  %v3066_v19 = vmul.f32 %v7185_v1, %v2901_v4  ;;  %v3503_v35 = vsel %vm3150_vm0, %v3099_v22, 0.0  ;;  %v3098_v63 = vmul.f32 %v7186_v3, %v2901_v4  ;;  %v7192_v0 = vld [vmem:[#allocation88_spill] sm:$0xff]  ;;  %v2856_v1 = vpop.permute.xlu1 %2855 }
 0x31c   :  { %v3607_v36 = vsel %vm3150_vm0, %v3131_v20, 0.0  ;;  %v3130_v28 = vmul.f32 %v6057_v31, %v2901_v4  ;;  %v6226_v32 = vpop.eup %4678  ;;  %v3295_v15 = vsel %vm3150_vm0, %v3035_v48, 0.0  ;;  %v3399_v44 = vsel %vm3150_vm0, %v3067_v33, 0.0  ;;  %v7189_v4 = vld [vmem:[#allocation20_spill] sm:$0xff] }
 0x31d   :  { %7187 = vst [vmem:[#allocation93_spill] sm:$0xff] %v6226_v32  ;;  %v3190_v24 = vsel %vm3150_vm0, %v3002_v37, 0.0  ;;  %v3294_v39 = vsel %vm3150_vm0, %v3034_v10, 0.0  ;;  %v3398_v14 = vsel %vm3150_vm0, %v3066_v19, 0.0  ;;  %v3502_v16 = vsel %vm3150_vm0, %v3098_v63, 0.0 }
 0x31e   :  { %v3606_v62 = vsel %vm3150_vm0, %v3130_v28, 0.0  ;;  %v3006_v12 = vmul.f32 %v7188_v47, %v2920_v2  ;;  %v6236_v5 = vadd.f32 %v3503_v35, %v3502_v16  ;;  %v3038_v48 = vmul.f32 %v7189_v4, %v2920_v2  ;;  %v7193_v28 = vld [vmem:[#allocation128_spill] sm:$0xff] }
 0x31f   :  { %v6238_v31 = vadd.f32 %v3607_v36, %v3606_v62  ;;  %v3070_v33 = vmul.f32 %v7190_v45, %v2920_v2  ;;  %v3259_v22 = vadd.f32 %v3258_v58, %v6114_v13  ;;  %v3363_v20 = vadd.f32 %v3362_v23, %v6116_v38  ;;  %v7194_v58 = vld [vmem:[#allocation62_spill] sm:$0xff] }
 0x320   :  { %v3102_v37 = vmul.f32 %v7191_v6, %v2920_v2  ;;  %v3134_v10 = vmul.f32 %v7192_v0, %v2920_v2  ;;  %v3467_v19 = vadd.f32 %v3466_v27, %v6120_v8  ;;  %v6247_v35 = vadd.f32 %v3191_v43, %v3190_v24  ;;  %v7195_v23 = vld [vmem:[#allocation86_spill] sm:$0xff] }
 0x321   :  { %v6249_v36 = vadd.f32 %v3295_v15, %v3294_v39  ;;  %v6251_v3 = vadd.f32 %v3399_v44, %v3398_v14  ;;  %v6254_v63 = vsel %vm3150_vm0, %v3006_v12, 0.0  ;;  %v3000_v13 = vmul.f32 %v7193_v28, %v2890_v52  ;;  %v7196_v27 = vld [vmem:[#allocation14_spill] sm:$0xff]  ;;  %v7197_v15 = vld [vmem:[#allocation125_spill] sm:$0xff]  ;;  %v7201_v28 = vld [vmem:[#allocation59_spill] sm:$0xff] }
 0x322   :  { %v3096_v38 = vmul.f32 %v7194_v58, %v2890_v52  ;;  %v3128_v16 = vmul.f32 %v7195_v23, %v2890_v52  ;;  %v6260_v2 = vsel %vm3150_vm0, %v3038_v48, 0.0  ;;  %v6263_v8 = vsel %vm3150_vm0, %v3070_v33, 0.0  ;;  %v7198_v14 = vld [vmem:[#allocation38_spill] sm:$0xff]  ;;  %v7199_v48 = vld [vmem:[#allocation11_spill] sm:$0xff] }
 0x323   :  { %v3032_v43 = vmul.f32 %v7196_v27, %v2890_v52  ;;  %v2993_v44 = vmul.f32 %v7197_v15, %v2856_v1  ;;  %v3515_v24 = vsel %vm3150_vm0, %v3102_v37, 0.0  ;;  %v3619_v39 = vsel %vm3150_vm0, %v3134_v10, 0.0  ;;  %v7200_v33 = vld [vmem:[#allocation35_spill] sm:$0xff]  ;;  %v2924_v27 = vpop.permute.xlu0 %2923 }
 0x324   :  { %v3064_v62 = vmul.f32 %v7198_v14, %v2890_v52  ;;  %v3492_v47 = vsel %vm3150_vm0, %v3096_v38, 0.0  ;;  %v3596_v4 = vsel %vm3150_vm0, %v3128_v16, 0.0  ;;  %v3025_v45 = vmul.f32 %v7199_v48, %v2856_v1  ;;  %v7202_v58 = vld [vmem:[#allocation83_spill] sm:$0xff] }
 0x325   :  { %v6272_v12 = vadd.f32 %v3492_v47, %v6162_v17  ;;  %v3057_v6 = vmul.f32 %v7200_v33, %v2856_v1  ;;  %v6278_v0 = vadd.f32 %v3596_v4, %v6168_v54  ;;  %v3089_v37 = vmul.f32 %v7201_v28, %v2856_v1 }
 0x326   :  { %v3121_v10 = vmul.f32 %v7202_v58, %v2856_v1  ;;  %v3156_v52 = vsel %vm3150_vm0, %v2993_v44, 0.0  ;;  %v3180_v38 = vsel %vm3150_vm0, %v3000_v13, 0.0  ;;  %v3260_v23 = vsel %vm3150_vm0, %v3025_v45, 0.0  ;;  %v7204_v45 = vld [vmem:[#allocation19_spill] sm:$0xff] }
 0x327   :  { %v3157_v17 = vadd.f32 %v3156_v52, %v6205_v61  ;;  %v3364_v16 = vsel %vm3150_vm0, %v3057_v6, 0.0  ;;  %v3261_v15 = vadd.f32 %v3260_v23, %v3259_v22  ;;  %v3468_v54 = vsel %vm3150_vm0, %v3089_v37, 0.0  ;;  %v7203_v61 = vld [vmem:[#allocation133_spill] sm:$0xff] }
 0x328   :  { %v3365_v14 = vadd.f32 %v3364_v16, %v3363_v20  ;;  %v3572_v47 = vsel %vm3150_vm0, %v3121_v10, 0.0  ;;  %v3284_v4 = vsel %vm3150_vm0, %v3032_v43, 0.0  ;;  %v3469_v48 = vadd.f32 %v3468_v54, %v3467_v19  ;;  %v7205_v20 = vld [vmem:[#allocation43_spill] sm:$0xff] }
 0x329   :  { %v3158_v1 = vrot.slane %v3157_v17, 4  ;;  %v3573_v44 = vadd.f32 %v3572_v47, %v6209_v7  ;;  %v3262_v13 = vrot.slane %v3261_v15, 4  ;;  %v3007_v28 = vmul.f32 %v7203_v61, %v2924_v27  ;;  %v7206_v10 = vld [vmem:[#allocation67_spill] sm:$0xff] }
 0x32a   :  { %v3366_v33 = vrot.slane %v3365_v14, 4  ;;  %v3039_v58 = vmul.f32 %v7204_v45, %v2924_v27  ;;  %v3470_v52 = vrot.slane %v3469_v48, 4  ;;  %v3071_v23 = vmul.f32 %v7205_v20, %v2924_v27  ;;  %v7207_v43 = vld [vmem:[#allocation87_spill] sm:$0xff] }
 0x32b   :  { %v3159_v6 = vadd.f32 %v3158_v1, %v3157_v17  ;;  %v3574_v22 = vrot.slane %v3573_v44, 4  ;;  %v3263_v37 = vadd.f32 %v3262_v13, %v3261_v15  ;;  %v3103_v32 = vmul.f32 %v7206_v10, %v2924_v27 }
 0x32c   :  { %v3367_v16 = vadd.f32 %v3366_v33, %v3365_v14  ;;  %v3135_v57 = vmul.f32 %v7207_v43, %v2924_v27  ;;  %v3388_v19 = vsel %vm3150_vm0, %v3064_v62, 0.0  ;;  %v3471_v54 = vadd.f32 %v3470_v52, %v3469_v48  ;;  %v2909_v33 = vpop.permute.xlu1 %2908 }
 0x32d   :  { %v3160_v7 = vrot.slane %v3159_v6, 2  ;;  %v3575_v47 = vadd.f32 %v3574_v22, %v3573_v44  ;;  %v3264_v34 = vrot.slane %v3263_v37, 2  ;;  %v3204_v45 = vsel %vm3150_vm0, %v3007_v28, 0.0 }
 0x32e   :  { %v3368_v61 = vrot.slane %v3367_v16, 2  ;;  %v3308_v17 = vsel %vm3150_vm0, %v3039_v58, 0.0  ;;  %v3472_v21 = vrot.slane %v3471_v54, 2  ;;  %v3412_v15 = vsel %vm3150_vm0, %v3071_v23, 0.0  ;;  %v7208_v23 = vld [vmem:[#allocation132_spill] sm:$0xff] }
 0x32f   :  { %v3161_v1 = vadd.f32 %v3160_v7, %v3159_v6  ;;  %v3576_v20 = vrot.slane %v3575_v47, 2  ;;  %v3265_v14 = vadd.f32 %v3264_v34, %v3263_v37  ;;  %v3516_v27 = vsel %vm3150_vm0, %v3103_v32, 0.0 }
 0x330   :  { %v3369_v13 = vadd.f32 %v3368_v61, %v3367_v16  ;;  %v3620_v62 = vsel %vm3150_vm0, %v3135_v57, 0.0  ;;  %v3473_v44 = vadd.f32 %v3472_v21, %v3471_v54  ;;  %v6302_v22 = vadd.f32 %v3516_v27, %v3515_v24  ;;  %v7211_v54 = vld [vmem:[#allocation42_spill] sm:$0xff] }
 0x331   :  { %v3162_v48 = vrot.slane %v3161_v1, 1  ;;  %v3577_v52 = vadd.f32 %v3576_v20, %v3575_v47  ;;  %v6305_v28 = vadd.f32 %v3180_v38, %v6174_v53  ;;  %v3266_v58 = vrot.slane %v3265_v14, 1 }
 0x332   :  { %v3370_v6 = vrot.slane %v3369_v13, 1  ;;  %v6307_v10 = vadd.f32 %v3620_v62, %v3619_v39  ;;  %v6310_v34 = vadd.f32 %v3284_v4, %v6179_v55  ;;  %v6313_v32 = vadd.f32 %v3388_v19, %v6184_v11  ;;  %v7209_v39 = vld [vmem:[#allocation66_spill] sm:$0xff]  ;;  %v2875_v19 = vpop.permute.xlu0 %2874 }
 0x333   :  { %v3474_v57 = vrot.slane %v3473_v44, 1  ;;  %v3004_v37 = vmul.f32 %v7208_v23, %v2909_v33  ;;  %v6317_v21 = vadd.f32 %v3204_v45, %v6254_v63  ;;  %v6320_v24 = vadd.f32 %v3308_v17, %v6260_v2  ;;  %v7210_v4 = vld [vmem:[#allocation18_spill] sm:$0xff] }
 0x334   :  { %v6323_v53 = vadd.f32 %v3412_v15, %v6263_v8  ;;  %v3100_v38 = vmul.f32 %v7209_v39, %v2909_v33  ;;  %v6326_v16 = vadd.f32 %v3162_v48, %v3161_v1  ;;  %v3578_v55 = vrot.slane %v3577_v52, 1  ;;  %v7212_v1 = vld [vmem:[#allocation126_spill] sm:$0xff]  ;;  %v7213_v15 = vld [vmem:[#allocation12_spill] sm:$0xff] }
 0x335   :  { %v3036_v11 = vmul.f32 %v7210_v4, %v2909_v33  ;;  %v3132_v43 = vmul.f32 %v6069_v18, %v2909_v33  ;;  %v6330_v7 = vadd.f32 %v3266_v58, %v3265_v14  ;;  %v6332_v63 = vadd.f32 %v3370_v6, %v3369_v13  ;;  %v7214_v13 = vld [vmem:[#allocation36_spill] sm:$0xff] }
 0x336   :  { %v3068_v2 = vmul.f32 %v7211_v54, %v2909_v33  ;;  %v3505_v47 = vsel %vm3150_vm0, %v3100_v38, 0.0  ;;  %v6336_v8 = vadd.f32 %v3474_v57, %v3473_v44  ;;  %v3193_v61 = vsel %vm3150_vm0, %v3004_v37, 0.0  ;;  %v7216_v48 = vld [vmem:[#allocation60_spill] sm:$0xff] }
 0x337   :  { %v6340_v45 = vadd.f32 %v3505_v47, %v6236_v5  ;;  %v3609_v17 = vsel %vm3150_vm0, %v3132_v43, 0.0  ;;  %v2997_v20 = vmul.f32 %v7212_v1, %v2875_v19  ;;  %v3029_v14 = vmul.f32 %v7213_v15, %v2875_v19  ;;  %v7217_v58 = vld [vmem:[#allocation84_spill] sm:$0xff]  ;;  %v7219_v1 = vld [vmem:[#allocation23_spill] sm:$0xff] }
 0x338   :  { %v6344_v18 = vadd.f32 %v3609_v17, %v6238_v31  ;;  %v3061_v27 = vmul.f32 %v7214_v13, %v2875_v19  ;;  %v6349_v62 = vadd.f32 %v3578_v55, %v3577_v52  ;;  %v3297_v33 = vsel %vm3150_vm0, %v3036_v11, 0.0  ;;  %v2943_v55 = vpop.permute.xlu1 %2942  ;;  %v7220_v15 = vld [vmem:[#allocation47_spill] sm:$0xff] }
 0x339   :  { %v3093_v44 = vmul.f32 %v7216_v48, %v2875_v19  ;;  %v3125_v5 = vmul.f32 %v7217_v58, %v2875_v19  ;;  %v6355_v6 = vadd.f32 %v3193_v61, %v6247_v35  ;;  %v3169_v31 = vsel %vm3150_vm0, %v2997_v20, 0.0  ;;  %v7222_v58 = vld [vmem:[#allocation138_spill] sm:$0xff] }
 0x33a   :  { %7215 = vst [vmem:[#allocation94_spill] sm:$0xff] %v6349_v62  ;;  %v3273_v57 = vsel %vm3150_vm0, %v3029_v14, 0.0  ;;  %v3377_v23 = vsel %vm3150_vm0, %v3061_v27, 0.0  ;;  %v3170_v37 = vadd.f32 %v3169_v31, %v6194_v9  ;;  %v6365_v4 = vadd.f32 %v3297_v33, %v6249_v36  ;;  %v7221_v33 = vld [vmem:[#allocation71_spill] sm:$0xff] }
 0x33b   :  { %v3274_v52 = vadd.f32 %v3273_v57, %v6196_v51  ;;  %v3378_v39 = vadd.f32 %v3377_v23, %v6200_v50  ;;  %v3481_v38 = vsel %vm3150_vm0, %v3093_v44, 0.0  ;;  %v3401_v35 = vsel %vm3150_vm0, %v3068_v2, 0.0  ;;  %v2939_v51 = vpop.permute.xlu0 %2938  ;;  %v7218_v50 = vld [vmem:[#allocation137_spill] sm:$0xff] }
 0x33c   :  { %v3482_v11 = vadd.f32 %v3481_v38, %v6202_v41  ;;  %v3585_v43 = vsel %vm3150_vm0, %v3125_v5, 0.0  ;;  %v3171_v19 = vrot.slane %v3170_v37, 4  ;;  %v3011_v17 = vmul.f32 %v7218_v50, %v2943_v55 }
 0x33d   :  { %v3275_v54 = vrot.slane %v3274_v52, 4  ;;  %v3379_v47 = vrot.slane %v3378_v39, 4  ;;  %v3586_v9 = vadd.f32 %v3585_v43, %v6188_v26  ;;  %v3043_v20 = vmul.f32 %v7219_v1, %v2943_v55 }
 0x33e   :  { %v3483_v61 = vrot.slane %v3482_v11, 4  ;;  %v3075_v36 = vmul.f32 %v7220_v15, %v2943_v55  ;;  %v3172_v14 = vadd.f32 %v3171_v19, %v3170_v37  ;;  %v3107_v48 = vmul.f32 %v7221_v33, %v2943_v55  ;;  %v7223_v37 = vld [vmem:[#allocation24_spill] sm:$0xff] }
 0x33f   :  { %v3276_v13 = vadd.f32 %v3275_v54, %v3274_v52  ;;  %v3380_v2 = vadd.f32 %v3379_v47, %v3378_v39  ;;  %v3587_v27 = vrot.slane %v3586_v9, 4  ;;  %v3139_v44 = vmul.f32 %v6073_v60, %v2943_v55  ;;  %v7225_v55 = vld [vmem:[#allocation72_spill] sm:$0xff] }
 0x340   :  { %v3484_v41 = vadd.f32 %v3483_v61, %v3482_v11  ;;  %v3010_v5 = vmul.f32 %v7222_v58, %v2939_v51  ;;  %v3173_v26 = vrot.slane %v3172_v14, 2  ;;  %v3217_v43 = vsel %vm3150_vm0, %v3011_v17, 0.0  ;;  %v7224_v61 = vld [vmem:[#allocation48_spill] sm:$0xff] }
 0x341   :  { %v3277_v31 = vrot.slane %v3276_v13, 2  ;;  %v3381_v57 = vrot.slane %v3380_v2, 2  ;;  %v3588_v23 = vadd.f32 %v3587_v27, %v3586_v9  ;;  %v3321_v50 = vsel %vm3150_vm0, %v3043_v20, 0.0 }
 0x342   :  { %v3485_v38 = vrot.slane %v3484_v41, 2  ;;  %v3042_v52 = vmul.f32 %v7223_v37, %v2939_v51  ;;  %v3174_v39 = vadd.f32 %v3173_v26, %v3172_v14  ;;  %v3074_v60 = vmul.f32 %v7224_v61, %v2939_v51 }
 0x343   :  { %v3278_v19 = vadd.f32 %v3277_v31, %v3276_v13  ;;  %v3382_v11 = vadd.f32 %v3381_v57, %v3380_v2  ;;  %v3589_v54 = vrot.slane %v3588_v23, 2  ;;  %v3106_v1 = vmul.f32 %v7225_v55, %v2939_v51  ;;  %v2928_v2 = vpop.permute.xlu1 %2927 }
 0x344   :  { %v3486_v47 = vadd.f32 %v3485_v38, %v3484_v41  ;;  %v3216_v15 = vsel %vm3150_vm0, %v3010_v5, 0.0  ;;  %v3175_v33 = vrot.slane %v3174_v39, 1  ;;  %v3320_v17 = vsel %vm3150_vm0, %v3042_v52, 0.0 }
 0x345   :  { %v3279_v9 = vrot.slane %v3278_v19, 1  ;;  %v3590_v27 = vadd.f32 %v3589_v54, %v3588_v23  ;;  %v6385_v20 = vadd.f32 %v3401_v35, %v6251_v3  ;;  %v3383_v58 = vrot.slane %v3382_v11, 1  ;;  %v2894_v35 = vpop.permute.xlu0 %2893  ;;  %v7228_v54 = vld [vmem:[#allocation70_spill] sm:$0xff] }
 0x346   :  { %v3529_v14 = vsel %vm3150_vm0, %v3107_v48, 0.0  ;;  %v3138_v13 = vmul.f32 %v6067_v42, %v2939_v51  ;;  %v3487_v41 = vrot.slane %v3486_v47, 1  ;;  %v3425_v26 = vsel %vm3150_vm0, %v3075_v36, 0.0  ;;  %v7226_v51 = vld [vmem:[#allocation136_spill] sm:$0xff] }
 0x347   :  { %v3633_v31 = vsel %vm3150_vm0, %v3139_v44, 0.0  ;;  %v6391_v5 = vadd.f32 %v3217_v43, %v3216_v15  ;;  %v3591_v57 = vrot.slane %v3590_v27, 1  ;;  %v6393_v23 = vadd.f32 %v3321_v50, %v3320_v17  ;;  %v7227_v43 = vld [vmem:[#allocation22_spill] sm:$0xff] }
 0x348   :  { %v3424_v38 = vsel %vm3150_vm0, %v3074_v60, 0.0  ;;  %v3528_v3 = vsel %vm3150_vm0, %v3106_v1, 0.0  ;;  %v6397_v37 = vadd.f32 %v3175_v33, %v3174_v39  ;;  %v6399_v48 = vadd.f32 %v3279_v9, %v3278_v19  ;;  %v7229_v60 = vld [vmem:[#allocation46_spill] sm:$0xff]  ;;  %v7230_v1 = vld [vmem:[#allocation127_spill] sm:$0xff]  ;;  %v7231_v39 = vld [vmem:[#allocation13_spill] sm:$0xff] }
 0x349   :  { %v6401_v42 = vadd.f32 %v3529_v14, %v3528_v3  ;;  %v3008_v36 = vmul.f32 %v7226_v51, %v2928_v2  ;;  %v6404_v52 = vadd.f32 %v3383_v58, %v3382_v11  ;;  %v3632_v44 = vsel %vm3150_vm0, %v3138_v13, 0.0  ;;  %v7232_v19 = vld [vmem:[#allocation37_spill] sm:$0xff] }
 0x34a   :  { %v3040_v50 = vmul.f32 %v7227_v43, %v2928_v2  ;;  %v3104_v61 = vmul.f32 %v7228_v54, %v2928_v2  ;;  %v3072_v55 = vmul.f32 %v7229_v60, %v2928_v2  ;;  %v3001_v15 = vmul.f32 %v7230_v1, %v2894_v35  ;;  %v7235_v60 = vld [vmem:[#allocation61_spill] sm:$0xff] }
 0x34b   :  { %v3033_v33 = vmul.f32 %v7231_v39, %v2894_v35  ;;  %v3065_v9 = vmul.f32 %v7232_v19, %v2894_v35  ;;  %v6413_v17 = vadd.f32 %v3487_v41, %v3486_v47  ;;  %v6415_v14 = vadd.f32 %v3591_v57, %v3590_v27  ;;  %v7236_v41 = vld [vmem:[#allocation85_spill] sm:$0xff] }
 0x34c   :  { %v6417_v11 = vadd.f32 %v3425_v26, %v3424_v38  ;;  %v3518_v58 = vsel %vm3150_vm0, %v3104_v61, 0.0  ;;  %v6420_v13 = vadd.f32 %v3633_v31, %v3632_v44  ;;  %v3136_v3 = vmul.f32 %v6071_v40, %v2928_v2 }
 0x34d   :  { %7233 = vst [vmem:[#allocation95_spill] sm:$0xff] %v6413_v17  ;;  %7234 = vst [vmem:[#allocation96_spill] sm:$0xff] %v6415_v14  ;;  %v3206_v51 = vsel %vm3150_vm0, %v3008_v36, 0.0  ;;  %v6425_v43 = vadd.f32 %v3518_v58, %v6302_v22  ;;  %v3310_v54 = vsel %vm3150_vm0, %v3040_v50, 0.0  ;;  %v3097_v47 = vmul.f32 %v7235_v60, %v2894_v35  ;;  %v7267_v17 = vld [vmem:[#allocation135_spill] sm:$0xff] }
 0x34e   :  { %v3129_v27 = vmul.f32 %v7236_v41, %v2894_v35  ;;  %v3182_v26 = vsel %vm3150_vm0, %v3001_v15, 0.0  ;;  %v3414_v57 = vsel %vm3150_vm0, %v3072_v55, 0.0  ;;  %v3286_v38 = vsel %vm3150_vm0, %v3033_v33, 0.0  ;;  %v2958_v41 = vpop.permute.xlu0 %2957 }
 0x34f   :  { %v3183_v31 = vadd.f32 %v3182_v26, %v6305_v28  ;;  %v3390_v40 = vsel %vm3150_vm0, %v3065_v9, 0.0  ;;  %v3287_v2 = vadd.f32 %v3286_v38, %v6310_v34  ;;  %v3494_v36 = vsel %vm3150_vm0, %v3097_v47, 0.0  ;;  %v2962_v28 = vpop.permute.xlu1 %2961 }
 0x350   :  { %v3391_v22 = vadd.f32 %v3390_v40, %v6313_v32  ;;  %v3598_v44 = vsel %vm3150_vm0, %v3129_v27, 0.0  ;;  %v3622_v35 = vsel %vm3150_vm0, %v3136_v3, 0.0  ;;  %v3495_v61 = vadd.f32 %v3494_v36, %v6272_v12  ;;  %v7237_v3 = vld [vmem:[#allocation3_spill] sm:$0xff] }
 0x351   :  { %v3184_v50 = vrot.slane %v3183_v31, 4  ;;  %v3599_v55 = vadd.f32 %v3598_v44, %v6278_v0  ;;  %v6443_v1 = vadd.f32 %v3206_v51, %v6317_v21  ;;  %v6446_v15 = vadd.f32 %v3310_v54, %v6320_v24  ;;  %v7238_v24 = vld [vmem:[#allocation27_spill] sm:$0xff] }
 0x352   :  { %v3288_v34 = vrot.slane %v3287_v2, 4  ;;  %v3392_v32 = vrot.slane %v3391_v22, 4  ;;  %v6449_v39 = vadd.f32 %v3414_v57, %v6323_v53  ;;  %v3496_v19 = vrot.slane %v3495_v61, 4  ;;  %v7239_v53 = vld [vmem:[#allocation51_spill] sm:$0xff] }
 0x353   :  { %v3185_v33 = vadd.f32 %v3184_v50, %v3183_v31  ;;  %v3600_v9 = vrot.slane %v3599_v55, 4  ;;  %v6452_v58 = vadd.f32 %v3622_v35, %v6307_v10  ;;  %v3015_v60 = vmul.f32 %v7237_v3, %v2962_v28  ;;  %v7240_v31 = vld [vmem:[#allocation75_spill] sm:$0xff]  ;;  %v7241_v50 = vld [vmem:[#allocation4_spill] sm:$0xff] }
 0x354   :  { %v3289_v12 = vadd.f32 %v3288_v34, %v3287_v2  ;;  %v3393_v0 = vadd.f32 %v3392_v32, %v3391_v22  ;;  %v3497_v51 = vadd.f32 %v3496_v19, %v3495_v61  ;;  %v3047_v54 = vmul.f32 %v7238_v24, %v2962_v28  ;;  %v7242_v34 = vld [vmem:[#allocation28_spill] sm:$0xff] }
 0x355   :  { %v3186_v21 = vrot.slane %v3185_v33, 2  ;;  %v3601_v47 = vadd.f32 %v3600_v9, %v3599_v55  ;;  %v3079_v57 = vmul.f32 %v7239_v53, %v2962_v28  ;;  %v3111_v38 = vmul.f32 %v7240_v31, %v2962_v28  ;;  %v7243_v19 = vld [vmem:[#allocation52_spill] sm:$0xff]  ;;  %v2913_v31 = vpop.permute.xlu0 %2912 }
 0x356   :  { %v3290_v27 = vrot.slane %v3289_v12, 2  ;;  %v3394_v26 = vrot.slane %v3393_v0, 2  ;;  %v3498_v10 = vrot.slane %v3497_v51, 2  ;;  %v3143_v2 = vmul.f32 %v6082_v56, %v2962_v28 }
 0x357   :  { %v6458_v40 = vadd.f32 %v3186_v21, %v3185_v33  ;;  %v3602_v36 = vrot.slane %v3601_v47, 2  ;;  %v3230_v35 = vsel %vm3150_vm0, %v3015_v60, 0.0  ;;  %v3014_v61 = vmul.f32 %v7241_v50, %v2958_v41  ;;  %v7244_v33 = vld [vmem:[#allocation76_spill] sm:$0xff]  ;;  %v7247_v50 = vld [vmem:[#allocation26_spill] sm:$0xff]  ;;  %v7251_v60 = vld [vmem:[#allocation17_spill] sm:$0xff] }
 0x358   :  { %v6461_v22 = vadd.f32 %v3290_v27, %v3289_v12  ;;  %v6463_v44 = vadd.f32 %v3394_v26, %v3393_v0  ;;  %v6467_v55 = vadd.f32 %v3498_v10, %v3497_v51  ;;  %v3046_v32 = vmul.f32 %v7242_v34, %v2958_v41  ;;  %v2947_v0 = vpop.permute.xlu1 %2946  ;;  %v7246_v10 = vld [vmem:[#allocation139_spill] sm:$0xff]  ;;  %v7252_v51 = vld [vmem:[#allocation41_spill] sm:$0xff] }
 0x359   :  { %v3078_v9 = vmul.f32 %v7243_v19, %v2958_v41  ;;  %v3110_v3 = vmul.f32 %v7244_v33, %v2958_v41  ;;  %v6472_v21 = vadd.f32 %v3602_v36, %v3601_v47  ;;  %v3334_v56 = vsel %vm3150_vm0, %v3047_v54, 0.0  ;;  %v7248_v19 = vld [vmem:[#allocation74_spill] sm:$0xff] }
 0x35a   :  { %v3542_v28 = vsel %vm3150_vm0, %v3111_v38, 0.0  ;;  %v3142_v12 = vmul.f32 %v6090_v49, %v2958_v41  ;;  %v3438_v24 = vsel %vm3150_vm0, %v3079_v57, 0.0  ;;  %v3646_v27 = vsel %vm3150_vm0, %v3143_v2, 0.0 }
 0x35b   :  { %7245 = vst [vmem:[#allocation97_spill] sm:$0xff] %v6472_v21  ;;  %v3229_v53 = vsel %vm3150_vm0, %v3014_v61, 0.0  ;;  %v3541_v54 = vsel %vm3150_vm0, %v3110_v3, 0.0  ;;  %v3333_v49 = vsel %vm3150_vm0, %v3046_v32, 0.0  ;;  %v3437_v41 = vsel %vm3150_vm0, %v3078_v9, 0.0  ;;  %v7249_v61 = vld [vmem:[#allocation50_spill] sm:$0xff] }
 0x35c   :  { %v6487_v38 = vadd.f32 %v3542_v28, %v3541_v54  ;;  %v3012_v36 = vmul.f32 %v7246_v10, %v2947_v0  ;;  %v3645_v2 = vsel %vm3150_vm0, %v3142_v12, 0.0  ;;  %v3044_v34 = vmul.f32 %v7247_v50, %v2947_v0  ;;  %v7250_v3 = vld [vmem:[#allocation131_spill] sm:$0xff]  ;;  %v7253_v50 = vld [vmem:[#allocation89_spill] sm:$0xff] }
 0x35d   :  { %v3108_v33 = vmul.f32 %v7248_v19, %v2947_v0  ;;  %v3076_v47 = vmul.f32 %v7249_v61, %v2947_v0  ;;  %v3005_v26 = vmul.f32 %v7250_v3, %v2913_v31  ;;  %v3037_v32 = vmul.f32 %v7251_v60, %v2913_v31 }
 0x35e   :  { %v3069_v9 = vmul.f32 %v7252_v51, %v2913_v31  ;;  %v6498_v28 = vadd.f32 %v3230_v35, %v3229_v53  ;;  %v6500_v54 = vadd.f32 %v3334_v56, %v3333_v49  ;;  %v6502_v10 = vadd.f32 %v3438_v24, %v3437_v41  ;;  %v7254_v51 = vld [vmem:[#allocation65_spill] sm:$0xff]  ;;  %v2981_v41 = vpop.permute.xlu1 %2980 }
 0x35f   :  { %v3531_v12 = vsel %vm3150_vm0, %v3108_v33, 0.0  ;;  %v6505_v57 = vadd.f32 %v3646_v27, %v3645_v2  ;;  %v3140_v19 = vmul.f32 %v7253_v50, %v2947_v0  ;;  %v3219_v61 = vsel %vm3150_vm0, %v3012_v36, 0.0 }
 0x360   :  { %v6510_v3 = vadd.f32 %v3531_v12, %v6401_v42  ;;  %v3323_v60 = vsel %vm3150_vm0, %v3044_v34, 0.0  ;;  %v3101_v35 = vmul.f32 %v7254_v51, %v2913_v31  ;;  %v3133_v56 = vmul.f32 %v6100_v59, %v2913_v31  ;;  %v7256_v12 = vld [vmem:[#allocation31_spill] sm:$0xff] }
 0x361   :  { %v3195_v24 = vsel %vm3150_vm0, %v3005_v26, 0.0  ;;  %v3427_v53 = vsel %vm3150_vm0, %v3076_v47, 0.0  ;;  %v3299_v49 = vsel %vm3150_vm0, %v3037_v32, 0.0  ;;  %v3403_v0 = vsel %vm3150_vm0, %v3069_v9, 0.0  ;;  %v7255_v32 = vld [vmem:[#allocation7_spill] sm:$0xff] }
 0x362   :  { %v3196_v27 = vadd.f32 %v3195_v24, %v6355_v6  ;;  %v3300_v42 = vadd.f32 %v3299_v49, %v6365_v4  ;;  %v3404_v36 = vadd.f32 %v3403_v0, %v6385_v20  ;;  %v3507_v2 = vsel %vm3150_vm0, %v3101_v35, 0.0  ;;  %v7257_v24 = vld [vmem:[#allocation55_spill] sm:$0xff] }
 0x363   :  { %v3611_v34 = vsel %vm3150_vm0, %v3133_v56, 0.0  ;;  %v3635_v59 = vsel %vm3150_vm0, %v3140_v19, 0.0  ;;  %v3508_v47 = vadd.f32 %v3507_v2, %v6340_v45  ;;  %v3019_v9 = vmul.f32 %v7255_v32, %v2981_v41  ;;  %v7258_v0 = vld [vmem:[#allocation79_spill] sm:$0xff]  ;;  %v2977_v2 = vpop.permute.xlu0 %2976 }
 0x364   :  { %v3197_v26 = vrot.slane %v3196_v27, 4  ;;  %v3612_v6 = vadd.f32 %v3611_v34, %v6344_v18  ;;  %v3301_v31 = vrot.slane %v3300_v42, 4  ;;  %v3405_v33 = vrot.slane %v3404_v36, 4 }
 0x365   :  { %v3051_v50 = vmul.f32 %v7256_v12, %v2981_v41  ;;  %v3509_v51 = vrot.slane %v3508_v47, 4  ;;  %v3083_v35 = vmul.f32 %v7257_v24, %v2981_v41  ;;  %v6531_v56 = vadd.f32 %v3219_v61, %v6391_v5 }
 0x366   :  { %v3198_v4 = vadd.f32 %v3197_v26, %v3196_v27  ;;  %v3613_v20 = vrot.slane %v3612_v6, 4  ;;  %v3302_v19 = vadd.f32 %v3301_v31, %v3300_v42  ;;  %v3406_v49 = vadd.f32 %v3405_v33, %v3404_v36 }
 0x367   :  { %v3115_v45 = vmul.f32 %v7258_v0, %v2981_v41  ;;  %v6535_v18 = vadd.f32 %v3323_v60, %v6393_v23  ;;  %v6538_v34 = vadd.f32 %v3427_v53, %v6417_v11  ;;  %v3510_v32 = vadd.f32 %v3509_v51, %v3508_v47  ;;  %v7259_v23 = vld [vmem:[#allocation8_spill] sm:$0xff]  ;;  %v2932_v62 = vpop.permute.xlu0 %2931 }
 0x368   :  { %v3614_v27 = vadd.f32 %v3613_v20, %v3612_v6  ;;  %v6541_v26 = vadd.f32 %v3635_v59, %v6420_v13  ;;  %v3199_v12 = vrot.slane %v3198_v4, 2  ;;  %v3303_v24 = vrot.slane %v3302_v19, 2  ;;  %v7260_v53 = vld [vmem:[#allocation32_spill] sm:$0xff]  ;;  %v2966_v59 = vpop.permute.xlu1 %2965 }
 0x369   :  { %v3147_v5 = vmul.f32 %v6118_v30, %v2981_v41  ;;  %v3243_v61 = vsel %vm3150_vm0, %v3019_v9, 0.0  ;;  %v3347_v42 = vsel %vm3150_vm0, %v3051_v50, 0.0  ;;  %v3451_v36 = vsel %vm3150_vm0, %v3083_v35, 0.0  ;;  %v7261_v6 = vld [vmem:[#allocation56_spill] sm:$0xff] }
 0x36a   :  { %v3018_v60 = vmul.f32 %v7259_v23, %v2977_v2  ;;  %v3407_v31 = vrot.slane %v3406_v49, 2  ;;  %v3555_v11 = vsel %vm3150_vm0, %v3115_v45, 0.0  ;;  %v3050_v47 = vmul.f32 %v7260_v53, %v2977_v2  ;;  %v7262_v20 = vld [vmem:[#allocation80_spill] sm:$0xff] }
 0x36b   :  { %v3082_v13 = vmul.f32 %v7261_v6, %v2977_v2  ;;  %v3511_v33 = vrot.slane %v3510_v32, 2  ;;  %v3615_v51 = vrot.slane %v3614_v27, 2  ;;  %v3114_v30 = vmul.f32 %v7262_v20, %v2977_v2  ;;  %v7263_v6 = vld [vmem:[#allocation6_spill] sm:$0xff] }
 0x36c   :  { %v3146_v41 = vmul.f32 %v6132_v46, %v2977_v2  ;;  %v6553_v9 = vadd.f32 %v3199_v12, %v3198_v4  ;;  %v6555_v50 = vadd.f32 %v3303_v24, %v3302_v19  ;;  %v3659_v35 = vsel %vm3150_vm0, %v3147_v5, 0.0  ;;  %v7264_v19 = vld [vmem:[#allocation30_spill] sm:$0xff] }
 0x36d   :  { %v3242_v0 = vsel %vm3150_vm0, %v3018_v60, 0.0  ;;  %v3346_v45 = vsel %vm3150_vm0, %v3050_v47, 0.0  ;;  %v3450_v23 = vsel %vm3150_vm0, %v3082_v13, 0.0  ;;  %v3554_v53 = vsel %vm3150_vm0, %v3114_v30, 0.0  ;;  %v7265_v60 = vld [vmem:[#allocation78_spill] sm:$0xff] }
 0x36e   :  { %v3016_v14 = vmul.f32 %v7263_v6, %v2966_v59  ;;  %v6563_v20 = vadd.f32 %v3407_v31, %v3406_v49  ;;  %v3556_v46 = vadd.f32 %v3555_v11, %v3554_v53  ;;  %v3658_v4 = vsel %vm3150_vm0, %v3146_v41, 0.0  ;;  %v7266_v30 = vld [vmem:[#allocation54_spill] sm:$0xff]  ;;  %v2985_v31 = vpop.permute.xlu1 %2984 }
 0x36f   :  { %v3048_v2 = vmul.f32 %v7264_v19, %v2966_v59  ;;  %v6567_v12 = vadd.f32 %v3511_v33, %v3510_v32  ;;  %v6569_v24 = vadd.f32 %v3615_v51, %v3614_v27  ;;  %v3244_v5 = vadd.f32 %v3243_v61, %v3242_v0  ;;  %v7269_v51 = vld [vmem:[#allocation45_spill] sm:$0xff] }
 0x370   :  { %v3112_v47 = vmul.f32 %v7265_v60, %v2966_v59  ;;  %v3348_v13 = vadd.f32 %v3347_v42, %v3346_v45  ;;  %v6572_v21 = vadd.f32 %v3451_v36, %v3450_v23  ;;  %v3080_v6 = vmul.f32 %v7266_v30, %v2966_v59  ;;  %v7268_v42 = vld [vmem:[#allocation21_spill] sm:$0xff] }
 0x371   :  { %v3009_v49 = vmul.f32 %v7267_v17, %v2932_v62  ;;  %v6576_v11 = vadd.f32 %v3659_v35, %v3658_v4  ;;  %v3144_v41 = vmul.f32 %v6137_v25, %v2966_v59  ;;  %v3232_v32 = vsel %vm3150_vm0, %v3016_v14, 0.0  ;;  %v7270_v45 = vld [vmem:[#allocation69_spill] sm:$0xff]  ;;  %v7271_v25 = vld [vmem:[#allocation10_spill] sm:$0xff] }
 0x372   :  { %v3544_v27 = vsel %vm3150_vm0, %v3112_v47, 0.0  ;;  %v3336_v61 = vsel %vm3150_vm0, %v3048_v2, 0.0  ;;  %v3041_v36 = vmul.f32 %v7268_v42, %v2932_v62  ;;  %v3073_v0 = vmul.f32 %v7269_v51, %v2932_v62  ;;  %v7273_v51 = vld [vmem:[#allocation82_spill] sm:$0xff] }
 0x373   :  { %v6583_v33 = vadd.f32 %v3544_v27, %v6487_v38  ;;  %v3105_v17 = vmul.f32 %v7270_v45, %v2932_v62  ;;  %v3137_v35 = vmul.f32 %v6143_v29, %v2932_v62  ;;  %v3208_v23 = vsel %vm3150_vm0, %v3009_v49, 0.0  ;;  %v7272_v38 = vld [vmem:[#allocation34_spill] sm:$0xff] }
 0x374   :  { %v3020_v59 = vmul.f32 %v7271_v25, %v2985_v31  ;;  %v3209_v14 = vadd.f32 %v3208_v23, %v6443_v1  ;;  %v3312_v53 = vsel %vm3150_vm0, %v3041_v36, 0.0  ;;  %v3416_v4 = vsel %vm3150_vm0, %v3073_v0, 0.0  ;;  %v7274_v25 = vld [vmem:[#allocation58_spill] sm:$0xff] }
 0x375   :  { %v3052_v19 = vmul.f32 %v7272_v38, %v2985_v31  ;;  %v3313_v2 = vadd.f32 %v3312_v53, %v6446_v15  ;;  %v3417_v60 = vadd.f32 %v3416_v4, %v6449_v39  ;;  %v3520_v47 = vsel %vm3150_vm0, %v3105_v17, 0.0  ;;  %v7275_v53 = vld [vmem:[#allocation90_spill] sm:$0xff]  ;;  %v2951_v4 = vpop.permute.xlu0 %2950 }
 0x376   :  { %v3624_v29 = vsel %vm3150_vm0, %v3137_v35, 0.0  ;;  %v3440_v62 = vsel %vm3150_vm0, %v3080_v6, 0.0  ;;  %v3210_v30 = vrot.slane %v3209_v14, 4  ;;  %v3521_v49 = vadd.f32 %v3520_v47, %v6425_v43 }
 0x377   :  { %v3625_v1 = vadd.f32 %v3624_v29, %v6452_v58  ;;  %v3648_v27 = vsel %vm3150_vm0, %v3144_v41, 0.0  ;;  %v3314_v42 = vrot.slane %v3313_v2, 4  ;;  %v3418_v36 = vrot.slane %v3417_v60, 4  ;;  %v7276_v29 = vld [vmem:[#allocation2_spill] sm:$0xff] }
 0x378   :  { %v3116_v0 = vmul.f32 %v7273_v51, %v2985_v31  ;;  %v6604_v15 = vadd.f32 %v3210_v30, %v3209_v14  ;;  %v3522_v39 = vrot.slane %v3521_v49, 4  ;;  %v3245_v17 = vsel %vm3150_vm0, %v3020_v59, 0.0  ;;  %v7280_v51 = vld [vmem:[#allocation91_spill] sm:$0xff] }
 0x379   :  { %v3626_v45 = vrot.slane %v3625_v1, 4  ;;  %v6608_v35 = vadd.f32 %v3232_v32, %v6498_v28  ;;  %v6611_v6 = vadd.f32 %v3336_v61, %v6500_v54  ;;  %v6613_v43 = vadd.f32 %v3314_v42, %v3313_v2 }
 0x37a   :  { %v3349_v58 = vsel %vm3150_vm0, %v3052_v19, 0.0  ;;  %v6617_v41 = vadd.f32 %v3440_v62, %v6502_v10  ;;  %v6620_v23 = vadd.f32 %v3648_v27, %v6505_v57  ;;  %v3084_v14 = vmul.f32 %v7274_v25, %v2985_v31  ;;  %v2989_v57 = vpop.permute.xlu1 %2988  ;;  %v7278_v27 = vld [vmem:[#allocation49_spill] sm:$0xff] }
 0x37b   :  { %v3148_v59 = vmul.f32 %v7275_v53, %v2985_v31  ;;  %v3212_v28 = vrot.slane %v6604_v15, 2  ;;  %v6625_v32 = vadd.f32 %v3418_v36, %v3417_v60  ;;  %v3246_v54 = vadd.f32 %v3245_v17, %v3244_v5  ;;  %v7277_v31 = vld [vmem:[#allocation25_spill] sm:$0xff] }
 0x37c   :  { %v3557_v61 = vsel %vm3150_vm0, %v3116_v0, 0.0  ;;  %v6628_v38 = vadd.f32 %v3522_v39, %v3521_v49  ;;  %v6630_v19 = vadd.f32 %v3626_v45, %v3625_v1  ;;  %v3350_v10 = vadd.f32 %v3349_v58, %v3348_v13  ;;  %v7279_v36 = vld [vmem:[#allocation73_spill] sm:$0xff] }
 0x37d   :  { %v3558_v2 = vadd.f32 %v3557_v61, %v3556_v46  ;;  %v3316_v47 = vrot.slane %v6613_v43, 2  ;;  %v3013_v62 = vmul.f32 %v7276_v29, %v2951_v4  ;;  %v3045_v30 = vmul.f32 %v7277_v31, %v2951_v4  ;;  %v7281_v39 = vld [vmem:[#allocation9_spill] sm:$0xff] }
 0x37e   :  { %v3077_v42 = vmul.f32 %v7278_v27, %v2951_v4  ;;  %v3453_v60 = vsel %vm3150_vm0, %v3084_v14, 0.0  ;;  %v3661_v5 = vsel %vm3150_vm0, %v3148_v59, 0.0  ;;  %v3109_v49 = vmul.f32 %v7279_v36, %v2951_v4  ;;  %v7283_v29 = vld [vmem:[#allocation81_spill] sm:$0xff] }
 0x37f   :  { %v3141_v1 = vmul.f32 %v7280_v51, %v2951_v4  ;;  %v3221_v13 = vsel %vm3150_vm0, %v3013_v62, 0.0  ;;  %v3325_v46 = vsel %vm3150_vm0, %v3045_v30, 0.0  ;;  %v3021_v45 = vmul.f32 %v7281_v39, %v2989_v57  ;;  %v7282_v4 = vld [vmem:[#allocation33_spill] sm:$0xff] }
 0x380   :  { %v3429_v0 = vsel %vm3150_vm0, %v3077_v42, 0.0  ;;  %v3222_v17 = vadd.f32 %v3221_v13, %v6531_v56  ;;  %v3326_v58 = vadd.f32 %v3325_v46, %v6535_v18  ;;  %v3533_v14 = vsel %vm3150_vm0, %v3109_v49, 0.0  ;;  %v7284_v51 = vld [vmem:[#allocation57_spill] sm:$0xff]  ;;  %v2970_v46 = vpop.permute.xlu0 %2969 }
 0x381   :  { %v3430_v25 = vadd.f32 %v3429_v0, %v6538_v34  ;;  %v3534_v53 = vadd.f32 %v3533_v14, %v6510_v3  ;;  %v3637_v59 = vsel %vm3150_vm0, %v3141_v1, 0.0  ;;  %v3053_v61 = vmul.f32 %v7282_v4, %v2989_v57 }
 0x382   :  { %v3117_v62 = vmul.f32 %v7283_v29, %v2989_v57  ;;  %v3223_v31 = vrot.slane %v3222_v17, 4  ;;  %v3327_v30 = vrot.slane %v3326_v58, 4  ;;  %v3638_v42 = vadd.f32 %v3637_v59, %v6541_v26  ;;  %v7285_v26 = vld [vmem:[#allocation92_spill] sm:$0xff] }
 0x383   :  { %v3431_v27 = vrot.slane %v3430_v25, 4  ;;  %v3420_v56 = vrot.slane %v6625_v32, 2  ;;  %v3524_v18 = vrot.slane %v6628_v38, 2  ;;  %v3535_v36 = vrot.slane %v3534_v53, 4 }
 0x384   :  { %v3454_v3 = vadd.f32 %v3453_v60, %v6572_v21  ;;  %v3662_v49 = vadd.f32 %v3661_v5, %v6576_v11  ;;  %v3085_v1 = vmul.f32 %v7284_v51, %v2989_v57  ;;  %v3247_v13 = vsel %vm3150_vm0, %v3021_v45, 0.0  ;;  %v7286_v5 = vld [vmem:[#allocation5_spill] sm:$0xff] }
 0x385   :  { %v6660_v0 = vadd.f32 %v3223_v31, %v3222_v17  ;;  %v3328_v39 = vadd.f32 %v3327_v30, %v3326_v58  ;;  %v3149_v14 = vmul.f32 %v7285_v26, %v2989_v57  ;;  %v3351_v59 = vsel %vm3150_vm0, %v3053_v61, 0.0  ;;  %v7287_v17 = vld [vmem:[#allocation29_spill] sm:$0xff] }
 0x386   :  { %v6664_v4 = vadd.f32 %v3431_v27, %v3430_v25  ;;  %v6666_v29 = vadd.f32 %v3535_v36, %v3534_v53  ;;  %v3639_v34 = vrot.slane %v3638_v42, 4  ;;  %v3559_v21 = vsel %vm3150_vm0, %v3117_v62, 0.0  ;;  %v7288_v30 = vld [vmem:[#allocation53_spill] sm:$0xff] }
 0x387   :  { %v6669_v11 = vadd.f32 %v3247_v13, %v3246_v54  ;;  %v6671_v60 = vadd.f32 %v3559_v21, %v3558_v2  ;;  %v3017_v45 = vmul.f32 %v7286_v5, %v2970_v46  ;;  %v3049_v31 = vmul.f32 %v7287_v17, %v2970_v46  ;;  %v7289_v25 = vld [vmem:[#allocation77_spill] sm:$0xff] }
 0x388   :  { %v3352_v58 = vadd.f32 %v3351_v59, %v3350_v10  ;;  %v3455_v57 = vsel %vm3150_vm0, %v3085_v1, 0.0  ;;  %v3081_v61 = vmul.f32 %v7288_v30, %v2970_v46  ;;  %v3113_v27 = vmul.f32 %v7289_v25, %v2970_v46  ;;  %v7290_v36 = vld [vmem:[#allocation93_spill] sm:$0xff] }
 0x389   :  { %v3663_v53 = vsel %vm3150_vm0, %v3149_v14, 0.0  ;;  %v3145_v51 = vmul.f32 %v7290_v36, %v2970_v46  ;;  %v3234_v54 = vsel %vm3150_vm0, %v3017_v45, 0.0  ;;  %v3338_v2 = vsel %vm3150_vm0, %v3049_v31, 0.0 }
 0x38a   :  { %v3235_v62 = vadd.f32 %v3234_v54, %v6608_v35  ;;  %v3339_v13 = vadd.f32 %v3338_v2, %v6611_v6  ;;  %v3442_v10 = vsel %vm3150_vm0, %v3081_v61, 0.0  ;;  %v3546_v1 = vsel %vm3150_vm0, %v3113_v27, 0.0 }
 0x38b   :  { %v6686_v26 = vadd.f32 %v3639_v34, %v3638_v42  ;;  %v6688_v59 = vadd.f32 %v3455_v57, %v3454_v3  ;;  %v6691_v14 = vadd.f32 %v3442_v10, %v6617_v41  ;;  %v6694_v46 = vadd.f32 %v3546_v1, %v6583_v33 }
 0x38c   :  { %v6696_v21 = vadd.f32 %v3663_v53, %v3662_v49  ;;  %v3340_v5 = vrot.slane %v3339_v13, 4  ;;  %v3236_v35 = vrot.slane %v3235_v62, 4  ;;  %v3650_v6 = vsel %vm3150_vm0, %v3145_v51, 0.0 }
 0x38d   :  { %v7291_v42 = vrot.slane %v6461_v22, 1  ;;  %v3305_v41 = vrot.slane %v6555_v50, 1  ;;  %v3317_v33 = vadd.f32 %v3316_v47, %v6613_v43  ;;  %v3444_v3 = vrot.slane %v6691_v14, 4 }
 0x38e   :  { %v3329_v49 = vrot.slane %v3328_v39, 2  ;;  %v3341_v45 = vadd.f32 %v3340_v5, %v3339_v13  ;;  %v3353_v17 = vrot.slane %v3352_v58, 4  ;;  %v3755_v30 = vsel %vm3741_vm1, %v6399_v48, %v6330_v7 }
 0x38f   :  { %v3293_v34 = vadd.f32 %v7291_v42, %v6461_v22  ;;  %v3306_v31 = vadd.f32 %v3305_v41, %v6555_v50  ;;  %v3318_v57 = vrot.slane %v3317_v33, 1  ;;  %v3201_v47 = vrot.slane %v6553_v9, 1 }
 0x390   :  { %v3330_v22 = vadd.f32 %v3329_v49, %v3328_v39  ;;  %v3342_v61 = vrot.slane %v3341_v45, 2  ;;  %v3354_v25 = vadd.f32 %v3353_v17, %v3352_v58  ;;  %v3213_v53 = vadd.f32 %v3212_v28, %v6604_v15 }
 0x391   :  { %v3756_v27 = vsel %vm3743_vm2, %v3293_v34, %v3755_v30  ;;  %v3319_v43 = vadd.f32 %v3318_v57, %v3317_v33  ;;  %v3225_v50 = vrot.slane %v6660_v0, 2  ;;  %v7292_v7 = vrot.slane %v6458_v40, 1  ;;  %v3684_v33 = vpop.permute.xlu1 %3683 }
 0x392   :  { %v3331_v36 = vrot.slane %v3330_v22, 1  ;;  %v3343_v51 = vadd.f32 %v3342_v61, %v3341_v45  ;;  %v3355_v54 = vrot.slane %v3354_v25, 2  ;;  %v3757_v39 = vsel %vm3745_vm3, %v3306_v31, %v3756_v27 }
 0x393   :  { %v3189_v48 = vadd.f32 %v7292_v7, %v6458_v40  ;;  %v3214_v58 = vrot.slane %v3213_v53, 1  ;;  %v3226_v2 = vadd.f32 %v3225_v50, %v6660_v0  ;;  %v3237_v13 = vadd.f32 %v3236_v35, %v3235_v62 }
 0x394   :  { %v3332_v10 = vadd.f32 %v3331_v36, %v3330_v22  ;;  %v3344_v1 = vrot.slane %v3343_v51, 1  ;;  %v3356_v5 = vadd.f32 %v3355_v54, %v3354_v25  ;;  %v3249_v15 = vrot.slane %v6669_v11, 4 }
 0x395   :  { %v3758_v28 = vsel %vm3747_vm4, %v3319_v43, %v3757_v39  ;;  %v3202_v42 = vadd.f32 %v3201_v47, %v6553_v9  ;;  %v3227_v34 = vrot.slane %v3226_v2, 1  ;;  %v3238_v41 = vrot.slane %v3237_v13, 2  ;;  %v3689_v7 = vpop.permute.xlu1 %3688 }
 0x396   :  { %v3345_v49 = vadd.f32 %v3344_v1, %v3343_v51  ;;  %v3357_v40 = vrot.slane %v3356_v5, 1  ;;  %v3215_v45 = vadd.f32 %v3214_v58, %v3213_v53  ;;  %v3250_v17 = vadd.f32 %v3249_v15, %v6669_v11 }
 0x397   :  { %v3759_v0 = vsel %vm3749_vm5, %v3332_v10, %v3758_v28  ;;  %v3228_v62 = vadd.f32 %v3227_v34, %v3226_v2  ;;  %v3239_v35 = vadd.f32 %v3238_v41, %v3237_v13  ;;  %v3742_v31 = vsel %vm3741_vm1, %v6397_v37, %v6326_v16 }
 0x398   :  { %v3358_v57 = vadd.f32 %v3357_v40, %v3356_v5  ;;  %v3760_v30 = vsel %vm3751_vm6, %v3345_v49, %v3759_v0  ;;  %v3251_v9 = vrot.slane %v3250_v17, 2  ;;  %v3744_v22 = vsel %vm3743_vm2, %v3189_v48, %v3742_v31 }
 0x399   :  { %v3240_v61 = vrot.slane %v3239_v35, 1  ;;  %v3746_v25 = vsel %vm3745_vm3, %v3202_v42, %v3744_v22  ;;  %v3409_v27 = vrot.slane %v6563_v20, 1  ;;  %v3421_v11 = vadd.f32 %v3420_v56, %v6625_v32 }
 0x39a   :  { %v6738_v43 = vadd.f32 %v3650_v6, %v6620_v23  ;;  %v3252_v47 = vadd.f32 %v3251_v9, %v3250_v17  ;;  %v3748_v16 = vsel %vm3747_vm4, %v3215_v45, %v3746_v25  ;;  %v3433_v37 = vrot.slane %v6664_v4, 2 }
 0x39b   :  { %v3761_v53 = vsel %vm3753_vm7, %v3358_v57, %v3760_v30  ;;  %v3241_v50 = vadd.f32 %v3240_v61, %v3239_v35  ;;  %v3750_v36 = vsel %vm3749_vm5, %v3228_v62, %v3748_v16  ;;  %v3422_v51 = vrot.slane %v3421_v11, 1  ;;  %v3806_v62 = vpop.permute.xlu1 %3805 }
 0x39c   :  { %v3253_v54 = vrot.slane %v3252_v47, 1  ;;  %v3434_v48 = vadd.f32 %v3433_v37, %v6664_v4  ;;  %v3445_v32 = vadd.f32 %v3444_v3, %v6691_v14  ;;  %v3457_v23 = vrot.slane %v6688_v59, 4  ;;  %v3679_v3 = vpop.permute.xlu0 %3678 }
 0x39d   :  { %v3548_v56 = vrot.slane %v6694_v46, 4  ;;  %v3752_v6 = vsel %vm3751_vm6, %v3241_v50, %v3750_v36  ;;  %v7293_v39 = vrot.slane %v6463_v44, 1  ;;  %v3410_v2 = vadd.f32 %v3409_v27, %v6563_v20 }
 0x39e   :  { %v3254_v13 = vadd.f32 %v3253_v54, %v3252_v47  ;;  %v3435_v10 = vrot.slane %v3434_v48, 1  ;;  %v3446_v1 = vrot.slane %v3445_v32, 2  ;;  %v3458_v5 = vadd.f32 %v3457_v23, %v6688_v59 }
 0x39f   :  { %v3397_v58 = vadd.f32 %v7293_v39, %v6463_v44  ;;  %v3652_v4 = vrot.slane %v6738_v43, 4  ;;  %v3789_v14 = vmul.f32 %v3761_v53, %v3684_v33  ;;  %v3423_v15 = vadd.f32 %v3422_v51, %v3421_v11 }
 0x3a0   :  { %v3513_v28 = vrot.slane %v6567_v12, 1  ;;  %v3754_v42 = vsel %vm3753_vm7, %v3254_v13, %v3752_v6  ;;  %v3447_v34 = vadd.f32 %v3446_v1, %v3445_v32  ;;  %v3459_v41 = vrot.slane %v3458_v5, 2  ;;  %v3801_v25 = vpop.permute.xlu0 %3800  ;;  %v3811_v32 = vpop.permute.xlu1 %3810 }
 0x3a1   :  { %v3762_v44 = vsel %vm3741_vm1, %v6404_v52, %v6332_v63  ;;  %v3788_v20 = vmul.f32 %v3754_v42, %v3679_v3  ;;  %v3436_v49 = vadd.f32 %v3435_v10, %v3434_v48  ;;  %v7294_v59 = vrot.slane %v6467_v55, 1 }
 0x3a2   :  { %v3763_v40 = vsel %vm3743_vm2, %v3397_v58, %v3762_v44  ;;  %v3448_v45 = vrot.slane %v3447_v34, 1  ;;  %v3460_v17 = vadd.f32 %v3459_v41, %v3458_v5  ;;  %v3525_v35 = vadd.f32 %v3524_v18, %v6628_v38  ;;  %v7295_v38 = vld [vmem:[#allocation95_spill] sm:$0xff] }
 0x3a3   :  { %v3501_v33 = vadd.f32 %v7294_v59, %v6467_v55  ;;  %v3764_v0 = vsel %vm3745_vm3, %v3410_v2, %v3763_v40  ;;  %v3514_v63 = vadd.f32 %v3513_v28, %v6567_v12  ;;  %v3537_v52 = vrot.slane %v6666_v29, 2 }
 0x3a4   :  { %v3765_v31 = vsel %vm3747_vm4, %v3423_v15, %v3764_v0  ;;  %v3549_v57 = vadd.f32 %v3548_v56, %v6694_v46  ;;  %v3449_v30 = vadd.f32 %v3448_v45, %v3447_v34  ;;  %v3461_v9 = vrot.slane %v3460_v17, 1  ;;  %v7297_v15 = vld [vmem:[#allocation97_spill] sm:$0xff]  ;;  %v3694_v40 = vpop.permute.xlu0 %3693  ;;  %v7299_v0 = vld [vmem:[#allocation94_spill] sm:$0xff] }
 0x3a5   :  { %v3526_v55 = vrot.slane %v3525_v35, 1  ;;  %v3561_v22 = vrot.slane %v6671_v60, 4  ;;  %v3766_v61 = vsel %vm3749_vm5, %v3436_v49, %v3765_v31  ;;  %v3538_v27 = vadd.f32 %v3537_v52, %v6666_v29 }
 0x3a6   :  { %v3550_v11 = vrot.slane %v3549_v57, 2  ;;  %v3769_v18 = vsel %vm3741_vm1, %v7295_v38, %v6336_v8  ;;  %v3462_v12 = vadd.f32 %v3461_v9, %v3460_v17  ;;  %v3767_v47 = vsel %vm3751_vm6, %v3449_v30, %v3766_v61 }
 0x3a7   :  { %v3527_v16 = vadd.f32 %v3526_v55, %v3525_v35  ;;  %v3562_v46 = vadd.f32 %v3561_v22, %v6671_v60  ;;  %v3824_v37 = vsub.f32 %v3789_v14, %v3806_v62  ;;  %v3539_v53 = vrot.slane %v3538_v27, 1  ;;  %v7300_v62 = vld [vmem:[#allocation96_spill] sm:$0xff] }
 0x3a8   :  { %v3551_v50 = vadd.f32 %v3550_v11, %v3549_v57  ;;  %v3770_v36 = vsel %vm3743_vm2, %v3501_v33, %v3769_v18  ;;  %v3768_v51 = vsel %vm3753_vm7, %v3462_v12, %v3767_v47  ;;  %v3823_v54 = vsub.f32 %v3788_v20, %v3801_v25  ;;  %v3699_v11 = vpop.permute.xlu0 %3698 }
 0x3a9   :  { %v3563_v29 = vrot.slane %v3562_v46, 2  ;;  %v3771_v48 = vsel %vm3745_vm3, %v3514_v63, %v3770_v36  ;;  %v3790_v23 = vmul.f32 %v3768_v51, %v3689_v7  ;;  %v3540_v8 = vadd.f32 %v3539_v53, %v3538_v27  ;;  %v3816_v63 = vpop.permute.xlu1 %3815 }
 0x3aa   :  { %v3552_v56 = vrot.slane %v3551_v50, 1  ;;  %v3772_v6 = vsel %vm3747_vm4, %v3527_v16, %v3771_v48  ;;  %v3617_v60 = vrot.slane %v6569_v24, 1  ;;  %v7296_v58 = vrot.slane %v6630_v19, 2 }
 0x3ab   :  { %v3564_v39 = vadd.f32 %v3563_v29, %v3562_v46  ;;  %v3641_v13 = vrot.slane %v6686_v26, 2  ;;  %v3773_v1 = vsel %vm3749_vm5, %v3540_v8, %v3772_v6  ;;  %v3825_v5 = vsub.f32 %v3790_v23, %v3811_v32 }
 0x3ac   :  { %v3629_v2 = vadd.f32 %v7296_v58, %v6630_v19  ;;  %v3553_v10 = vadd.f32 %v3552_v56, %v3551_v50  ;;  %v3653_v14 = vadd.f32 %v3652_v4, %v6738_v43  ;;  %v4033_v7 = vmul.f32 -1.442695, %v3824_v37  ;;  %v3821_v37 = vpop.permute.xlu0 %3820 }
 0x3ad   :  { %v3565_v3 = vrot.slane %v3564_v39, 1  ;;  %v7298_v28 = vrot.slane %v7297_v15, 1  ;;  %v3618_v44 = vadd.f32 %v3617_v60, %v6569_v24  ;;  %v3642_v19 = vadd.f32 %v3641_v13, %v6686_v26 }
 0x3ae   :  { %v3630_v34 = vrot.slane %v3629_v2, 1  ;;  %v3774_v41 = vsel %vm3751_vm6, %v3553_v10, %v3773_v1  ;;  %v3654_v20 = vrot.slane %v3653_v14, 2  ;;  %v4032_v49 = vmul.f32 -1.442695, %v3823_v54 }
 0x3af   :  { %v3605_v42 = vadd.f32 %v7298_v28, %v7297_v15  ;;  %v3566_v59 = vadd.f32 %v3565_v3, %v3564_v39  ;;  %v3665_v43 = vrot.slane %v6696_v21, 4  ;;  %v4034_v4 = vmul.f32 -1.442695, %v3825_v5 }
 0x3b0   :  { %v3631_v33 = vadd.f32 %v3630_v34, %v3629_v2  ;;  %v3643_v45 = vrot.slane %v3642_v19, 1  ;;  %v3655_v17 = vadd.f32 %v3654_v20, %v3653_v14  ;;  %v3776_v35 = vsel %vm3741_vm1, %v7300_v62, %v7299_v0 }
 0x3b1   :  { %4680 = vpow2.f32 %v4033_v7  ;;  %v3775_v31 = vsel %vm3753_vm7, %v3566_v59, %v3774_v41  ;;  %v3666_v24 = vadd.f32 %v3665_v43, %v6696_v21  ;;  %v3777_v26 = vsel %vm3743_vm2, %v3605_v42, %v3776_v35 }
 0x3b2   :  { %v3791_v52 = vmul.f32 %v3775_v31, %v3694_v40  ;;  %v3644_v57 = vadd.f32 %v3643_v45, %v3642_v19  ;;  %v3656_v30 = vrot.slane %v3655_v17, 1  ;;  %v3778_v9 = vsel %vm3745_vm3, %v3618_v44, %v3777_v26 }
 0x3b3   :  { %4682 = vpow2.f32 %v4032_v49  ;;  %v3667_v55 = vrot.slane %v3666_v24, 2  ;;  %v3779_v22 = vsel %vm3747_vm4, %v3631_v33, %v3778_v9 }
 0x3b4   :  { %4684 = vpow2.f32 %v4034_v4  ;;  %v3657_v61 = vadd.f32 %v3656_v30, %v3655_v17  ;;  %v3780_v25 = vsel %vm3749_vm5, %v3644_v57, %v3779_v22  ;;  %v3826_v27 = vsub.f32 %v3791_v52, %v3816_v63 }
 0x3b5   :  { %v3668_v38 = vadd.f32 %v3667_v55, %v3666_v24 }
 0x3b6   :  { %v4035_v21 = vmul.f32 -1.442695, %v3826_v27  ;;  %v3781_v12 = vsel %vm3751_vm6, %v3657_v61, %v3780_v25 }
 0x3b7   :  { %v3669_v18 = vrot.slane %v3668_v38, 1 }
 0x3b8   :  { %4686 = vpow2.f32 %v4035_v21 }
 0x3b9   :  { %v3670_v47 = vadd.f32 %v3669_v18, %v3668_v38 }
 0x3bb   :  { %v4681_v16 = vpop.eup %4680  ;;  %v3782_v46 = vsel %vm3753_vm7, %v3670_v47, %v3781_v12 }
 0x3bc   :  { %v3792_v53 = vmul.f32 %v3782_v46, %v3699_v11  ;;  %v3844_v54 = vadd.f32 1.0, %v4681_v16 }
 0x3bd   :  { %v4683_v50 = vpop.eup %4682 }
 0x3be   :  { %v4685_v36 = vpop.eup %4684  ;;  %v3827_v51 = vsub.f32 %v3792_v53, %v3821_v37  ;;  %v3843_v29 = vadd.f32 1.0, %v4683_v50 }
 0x3bf   :  { %v3845_v32 = vadd.f32 1.0, %v4685_v36 }
 0x3c0   :  { %v4036_v48 = vmul.f32 -1.442695, %v3827_v51 }
 0x3c2   :  { %v4687_v23 = vpop.eup %4686  ;;  %4688 = vpow2.f32 %v4036_v48 }
 0x3c3   :  { %4690 = vrcp.f32 %v3844_v54  ;;  %v3846_v8 = vadd.f32 1.0, %v4687_v23 }
 0x3c4   :  { %4692 = vrcp.f32 %v3843_v29 }
 0x3c5   :  { %4694 = vrcp.f32 %v3845_v32 }
 0x3c6   :  { %4696 = vrcp.f32 %v3846_v8 }
 0x3cc   :  { %v4689_v56 = vpop.eup %4688 }
 0x3cd   :  { %v4691_v6 = vpop.eup %4690  ;;  %v3847_v39 = vadd.f32 1.0, %v4689_v56 }
 0x3ce   :  { %v4693_v60 = vpop.eup %4692  ;;  %v3859_v2 = vsel %vm3150_vm0, %v4691_v6, 0.0 }
 0x3cf   :  { %v4695_v58 = vpop.eup %4694  ;;  %4698 = vrcp.f32 %v3847_v39  ;;  %v3858_v10 = vsel %vm3150_vm0, %v4693_v60, 0.0 }
 0x3d0   :  { %v4697_v13 = vpop.eup %4696  ;;  %v3861_v1 = vsel %vm3150_vm0, %v4695_v58, 0.0  ;;  %v3860_v5 = vadd.f32 %v3859_v2, %v3858_v10 }
 0x3d1   :  { %v3863_v14 = vsel %vm3150_vm0, %v4697_v13, 0.0 }
 0x3d2   :  { %v3862_v7 = vadd.f32 %v3861_v1, %v3860_v5 }
 0x3d4   :  { %v3864_v3 = vadd.f32 %v3863_v14, %v3862_v7 }
 0x3d9   :  { %v4699_v15 = vpop.eup %4698 }
 0x3da   :  { %v3865_v28 = vsel %vm3150_vm0, %v4699_v15, 0.0 }
 0x3db   :  { %v3866_v42 = vadd.f32 %v3865_v28, %v3864_v3 }
 0x3dd   :  { %3867 = vst.msk [vmem:[%s6824_s6] sm:$0xff] %vm3150_vm0, %v3866_v42 }

</bundles_post_ra>
